<compile_context>
chip_gen: v7x
topology: tpu7x:2x2x1
jax: 0.10.0
libtpu: 0.0.40
codegen_flags: <defaults>
</compile_context>

<pallas_src>
import functools

import numpy as np
import jax
import jax.numpy as jnp
from jax.experimental import pallas as pl
from jax.experimental.pallas import tpu as pltpu


# ---------------------------------------------------------------------------
# Fused Pallas kernel
# ---------------------------------------------------------------------------
def _edsr_fused_kernel(x_ref, th_ref, bh_ref, tb_ref, bb_ref, tu_ref, bu_ref,
                       tt0_ref, tt1_ref, bt_ref, o_ref, *,
                       n_resblocks, img_h, res_scale):
    x = x_ref[...].astype(jnp.float32)            # (M, W*Cin_pad) lane-dense rows
    m, wc = x.shape
    wide = tu_ref.shape[-1]                       # W * 4*n_feats (pre-shuffle)

    # Hoisted per-image top/bottom edge masks (batch merged into M => the H
    # zero padding of every conv is a (row % img_h) test). Computed ONCE.
    row_n = jax.lax.broadcasted_iota(jnp.int32, (m, wc), 0) % img_h
    top_n = row_n == 0
    bot_n = row_n == (img_h - 1)
    row_w = jax.lax.broadcasted_iota(jnp.int32, (m, wide), 0) % img_h
    top_w = row_w == 0
    bot_w = row_w == (img_h - 1)

    def conv(a, t, b, relu=False):
        # 3x3 'same' conv in lane-dense row layout; ky taps K-stacked so the
        # whole conv is one MXU matmul (K = 3*W*Cin).
        dn = jnp.where(top_n, 0.0, pltpu.roll(a, 1, axis=0))        # a[i-1]
        up = jnp.where(bot_n, 0.0, pltpu.roll(a, m - 1, axis=0))    # a[i+1]
        lhs = jnp.concatenate([dn, a, up], axis=1).astype(jnp.bfloat16)
        out = jnp.dot(lhs, t, preferred_element_type=jnp.float32) + b
        if relu:
            out = jnp.maximum(out, 0.0)
        return out

    # head
    feat = conv(x, th_ref[...], bh_ref[...])

    # residual body (unrolled: fine at n_resblocks=2)
    # TODO(synk): use lax.fori_loop with dynamic tb_ref/bb_ref indexing at
    # realistic n_resblocks (16-32) to keep vreg pressure / compile time flat.
    res = feat
    for i in range(n_resblocks):
        h = conv(res, tb_ref[2 * i], bb_ref[2 * i], relu=True)
        res = res + res_scale * conv(h, tb_ref[2 * i + 1], bb_ref[2 * i + 1])
    res = conv(res, tb_ref[2 * n_resblocks], bb_ref[2 * n_resblocks]) + feat

    # upsampler conv -> (M, W*4F), still pre-shuffle channel layout
    t = conv(res, tu_ref[...], bu_ref[...])

    # fused PixelShuffle(2) + tail conv: the shuffle permutation was composed
    # into the tail Toeplitz at prep time, so trunk row h directly emits the
    # upsampled output rows 2h (out0) and 2h+1 (out1).
    t16 = t.astype(jnp.bfloat16)
    dn_t = jnp.where(top_w, 0.0, pltpu.roll(t, 1, axis=0)).astype(jnp.bfloat16)
    up_t = jnp.where(bot_w, 0.0, pltpu.roll(t, m - 1, axis=0)).astype(jnp.bfloat16)
    out0 = jnp.dot(jnp.concatenate([dn_t, t16], axis=1), tt0_ref[...],
                   preferred_element_type=jnp.float32) + bt_ref[...]
    out1 = jnp.dot(jnp.concatenate([t16, up_t], axis=1), tt1_ref[...],
                   preferred_element_type=jnp.float32) + bt_ref[...]
    # lanes [0:128] = output row 2h, lanes [128:256] = output row 2h+1
    o_ref[...] = jnp.concatenate([out0, out1], axis=1).astype(o_ref.dtype)


# ---------------------------------------------------------------------------
# pallas_call wrapper
# ---------------------------------------------------------------------------
def edsr_fused(x_rows, kp, *, n_resblocks, img_h, res_scale):
    m, wc_in = x_rows.shape
    out_w = 2 * kp["t_tail0"].shape[-1]            # r * (W*r*cout_pad) = 256

    def full(shape):
        nd = len(shape)
        return pl.BlockSpec(shape, lambda i, _nd=nd: (0,) * _nd)

    return pl.pallas_call(
        functools.partial(_edsr_fused_kernel, n_resblocks=n_resblocks,
                          img_h=img_h, res_scale=res_scale),
        grid=(1,),
        in_specs=[
            full((m, wc_in)),
            full(kp["t_head"].shape), full(kp["b_head"].shape),
            full(kp["t_body"].shape), full(kp["b_body"].shape),
            full(kp["t_up"].shape), full(kp["b_up"].shape),
            full(kp["t_tail0"].shape), full(kp["t_tail1"].shape),
            full(kp["b_tail"].shape),
        ],
        out_specs=full((m, out_w)),
        out_shape=jax.ShapeDtypeStruct((m, out_w), jnp.float32),
        compiler_params=pltpu.CompilerParams(
            dimension_semantics=("arbitrary",)),
    )(x_rows, kp["t_head"], kp["b_head"], kp["t_body"], kp["b_body"],
      kp["t_up"], kp["b_up"], kp["t_tail0"], kp["t_tail1"], kp["b_tail"])


# ---------------------------------------------------------------------------
# Parameter preparation (one-time, plain JAX / numpy)
# ---------------------------------------------------------------------------
def _row_toeplitz(w, width):
    """(3,3,Cin,Cout) HWIO -> (3, width*Cin, width*Cout) f32 row-Toeplitz.

    T[ky, p*Cin+ci, q*Cout+co] = w[ky, kx, ci, co] where p = q + kx - 1;
    out-of-range kx taps dropped (zero 'same' padding in W folded in).
    """
    _, _, cin, cout = w.shape
    p = jnp.arange(width)[None, :, None]
    q = jnp.arange(width)[None, None, :]
    d = (jnp.arange(3) - 1)[:, None, None]
    band = (p == q + d).astype(jnp.float32)                      # (3, W, W)
    t = jnp.einsum("xpq,yxio->ypiqo", band, w.astype(jnp.float32))
    return t.reshape(3, width * cin, width * cout)


def _row_toeplitz_kstacked(w, width):
    """ky taps stacked along K: (3*width*Cin, width*Cout) bf16 (one matmul/conv)."""
    t = _row_toeplitz(w, width)
    return t.reshape(-1, t.shape[-1]).astype(jnp.bfloat16)


def _row_bias(b, width):
    return jnp.tile(b.astype(jnp.float32), width).reshape(1, width * b.shape[0])


def _fused_tail_weights(w_tail, b_tail, *, width, r, n_feats, cout_pad):
    """Compose PixelShuffle(r=2) with the tail 3x3 conv.

    Trunk lane layout: w*(4F) + c*4 + i*2 + j  (channel = c*r*r + i*r + j).
    Upsampled lane layout: (r*w + j)*F + c.
    For upsampled output row u = 2h + i:
      out[2h]   = trunk[h-1] @ W0_prev + trunk[h] @ W0_cur + b
      out[2h+1] = trunk[h]   @ W1_cur  + trunk[h+1] @ W1_next + b
    with edge terms removed by row masks in the kernel.
    """
    assert r == 2
    _, _, cin, cout = w_tail.shape
    assert cin == n_feats
    w_p = jnp.pad(w_tail, ((0, 0), (0, 0), (0, 0), (0, cout_pad - cout)))
    b_p = jnp.pad(b_tail, (0, cout_pad - cout))
    wr = width * r
    T = _row_toeplitz(w_p, wr)                  # (3, wr*F, wr*cout_pad) f32

    F = n_feats
    S = np.zeros((r, width * r * r * F, wr * F), np.float32)
    for w in range(width):
        for c in range(F):
            for i in range(r):
                for j in range(r):
                    S[i, w * r * r * F + c * r * r + i * r + j,
                      (r * w + j) * F + c] = 1.0
    S = jnp.asarray(S)

    w0_prev = S[1] @ T[0]
    w0_cur = S[0] @ T[1] + S[1] @ T[2]
    w1_cur = S[0] @ T[0] + S[1] @ T[1]
    w1_next = S[0] @ T[2]
    t_tail0 = jnp.concatenate([w0_prev, w0_cur], axis=0).astype(jnp.bfloat16)
    t_tail1 = jnp.concatenate([w1_cur, w1_next], axis=0).astype(jnp.bfloat16)
    return t_tail0, t_tail1, _row_bias(b_p, wr)


def prepare_kernel_params(params, *, width, scale_factor, n_colors, n_feats,
                          cin_pad=8, cout_pad=4):
    hw, hb = params["head"]
    hw = jnp.pad(hw, ((0, 0), (0, 0), (0, cin_pad - n_colors), (0, 0)))

    body_ws, body_bs = [], []
    for (w1, b1, w2, b2) in params["blocks"]:
        body_ws += [w1, w2]
        body_bs += [b1, b2]
    btw, btb = params["body_tail"]
    body_ws.append(btw)
    body_bs.append(btb)

    uw, ub = params["up"]
    tw, tb = params["tail"]
    t_tail0, t_tail1, b_tail = _fused_tail_weights(
        tw, tb, width=width, r=scale_factor, n_feats=n_feats, cout_pad=cout_pad)

    return {
        "t_head": _row_toeplitz_kstacked(hw, width),
        "b_head": _row_bias(hb, width),
        "t_body": jnp.stack([_row_toeplitz_kstacked(w, width) for w in body_ws]),
        "b_body": jnp.stack([_row_bias(b, width) for b in body_bs]),
        "t_up": _row_toeplitz_kstacked(uw, width),
        "b_up": _row_bias(ub, width),
        "t_tail0": t_tail0,
        "t_tail1": t_tail1,
        "b_tail": b_tail,
    }


# ---------------------------------------------------------------------------
# EDSR forward (Pallas) and plain-JAX reference
# ---------------------------------------------------------------------------
def edsr_forward(x_nchw, kp, *, scale_factor, res_scale):
    N, n_colors, H, W = x_nchw.shape
    r = scale_factor
    n_resblocks = (kp["t_body"].shape[0] - 1) // 2
    cin_pad = kp["t_head"].shape[0] // (3 * W)
    cout_pad = kp["b_tail"].shape[-1] // (W * r)

    # NCHW -> lane-dense rows, batch merged into the row (M) axis; input
    # channels zero-padded 3 -> cin_pad so W*Cin = 128 (lane / K aligned).
    x = jnp.transpose(x_nchw, (0, 2, 3, 1)).astype(jnp.float32)
    x = jnp.pad(x, ((0, 0), (0, 0), (0, 0), (0, cin_pad - n_colors)))
    x_rows = x.reshape(N * H, W * cin_pad)

    out_rows = edsr_fused(x_rows, kp, n_resblocks=n_resblocks, img_h=H,
                          res_scale=res_scale)      # (N*H, r*W*r*cout_pad)

    # [row 2h | row 2h+1] per trunk row -> (N, H*r, W*r, cout_pad); drop the
    # zero-padded output channel and go back to NCHW.
    out = out_rows.reshape(N, H * r, W * r, cout_pad)[..., :n_colors]
    return jnp.transpose(out, (0, 3, 1, 2))


def _conv_ref(x, w, b):
    # Match the kernel's MXU rounding: both activations and weights bf16.
    x = x.astype(jnp.bfloat16).astype(jnp.float32)
    w = w.astype(jnp.bfloat16).astype(jnp.float32)
    y = jax.lax.conv_general_dilated(
        x, w, window_strides=(1, 1), padding="SAME",
        dimension_numbers=("NHWC", "HWIO", "NHWC"))
    return y + b.astype(jnp.float32)


def edsr_reference(x_nchw, params, *, res_scale, scale_factor):
    x = jnp.transpose(x_nchw, (0, 2, 3, 1)).astype(jnp.float32)
    hw, hb = params["head"]
    x = _conv_ref(x, hw, hb)
    res = x
    for (w1, b1, w2, b2) in params["blocks"]:
        h = jnp.maximum(_conv_ref(res, w1, b1), 0.0)
        res = res + res_scale * _conv_ref(h, w2, b2)
    bw, bb = params["body_tail"]
    res = _conv_ref(res, bw, bb) + x
    uw, ub = params["up"]
    t = _conv_ref(res, uw, ub)
    N, H, W, _ = t.shape
    r = scale_factor
    C = t.shape[-1] // (r * r)
    t = t.reshape(N, H, W, C, r, r)
    t = jnp.transpose(t, (0, 1, 4, 2, 5, 3)).reshape(N, H * r, W * r, C)
    tw, tb = params["tail"]
    out = _conv_ref(t, tw, tb)
    return jnp.transpose(out, (0, 3, 1, 2))


# ---------------------------------------------------------------------------
# Synthetic deterministic parameters
# ---------------------------------------------------------------------------
def init_edsr_params(key, *, n_resblocks, n_feats, n_colors, scale_factor):
    def conv_p(k, cin, cout):
        kw, kb = jax.random.split(k)
        w = 0.1 * jax.random.normal(kw, (3, 3, cin, cout), jnp.float32)
        b = 0.01 * jax.random.normal(kb, (cout,), jnp.float32)
        return w, b

    keys = jax.random.split(key, 4 + 2 * n_resblocks)
    params = {"head": conv_p(keys[0], n_colors, n_feats)}
    blocks = []
    for i in range(n_resblocks):
        w1, b1 = conv_p(keys[1 + 2 * i], n_feats, n_feats)
        w2, b2 = conv_p(keys[2 + 2 * i], n_feats, n_feats)
        blocks.append((w1, b1, w2, b2))
    params["blocks"] = blocks
    params["body_tail"] = conv_p(keys[1 + 2 * n_resblocks], n_feats, n_feats)
    assert scale_factor == 2, "demo uses scale=2 (one conv + PixelShuffle step)"
    params["up"] = conv_p(keys[2 + 2 * n_resblocks], n_feats, 4 * n_feats)
    params["tail"] = conv_p(keys[3 + 2 * n_resblocks], n_feats, n_colors)
    return params


# ---------------------------------------------------------------------------
if __name__ == "__main__":
    N_RESBLOCKS = 2
    N_FEATS = 8
    RES_SCALE = 0.1
    N_COLORS = 3          # args.n_colors, RCNN_channel == 'off'
    SCALE = 2             # args.scale[0]
    H = W = 16
    BATCH = 2

    key = jax.random.PRNGKey(0)
    kx, kparam = jax.random.split(key)

    x = jax.random.normal(kx, (BATCH, N_COLORS, H, W), jnp.float32)   # NCHW
    params = init_edsr_params(kparam, n_resblocks=N_RESBLOCKS, n_feats=N_FEATS,
                              n_colors=N_COLORS, scale_factor=SCALE)
    kparams = prepare_kernel_params(params, width=W, scale_factor=SCALE,
                                    n_colors=N_COLORS, n_feats=N_FEATS)

    fwd = jax.jit(functools.partial(edsr_forward, scale_factor=SCALE,
                                    res_scale=RES_SCALE))
    out = jax.block_until_ready(fwd(x, kparams))

    assert out.shape == (BATCH, N_COLORS, H * SCALE, W * SCALE), out.shape
    assert out.dtype == jnp.float32
    assert bool(jnp.all(jnp.isfinite(out)))

    # Tight relative-error check against a plain-JAX (XLA conv) reference that
    # uses the same bf16 rounding points as the kernel.
    ref = edsr_reference(x, params, res_scale=RES_SCALE, scale_factor=SCALE)
    abs_err = float(jnp.max(jnp.abs(out - ref)))
    rel_err = abs_err / (float(jnp.max(jnp.abs(ref))) + 1e-6)
    assert rel_err < 5e-3, f"rel err {rel_err} (abs {abs_err})"

    print("KERNEL_OK")
</pallas_src>

<mosaic_0001>
module attributes {stable_mosaic.version = 11 : i64} {
  func.func @_edsr_fused_kernel(%arg0: i32, %arg1: memref<32x128xf32, #tpu.memory_space<vmem>>, %arg2: memref<384x128xbf16, #tpu.memory_space<vmem>>, %arg3: memref<1x128xf32, #tpu.memory_space<vmem>>, %arg4: memref<5x384x128xbf16, #tpu.memory_space<vmem>>, %arg5: memref<5x1x128xf32, #tpu.memory_space<vmem>>, %arg6: memref<384x512xbf16, #tpu.memory_space<vmem>>, %arg7: memref<1x512xf32, #tpu.memory_space<vmem>>, %arg8: memref<1024x128xbf16, #tpu.memory_space<vmem>>, %arg9: memref<1024x128xbf16, #tpu.memory_space<vmem>>, %arg10: memref<1x128xf32, #tpu.memory_space<vmem>>, %arg11: memref<32x256xf32, #tpu.memory_space<vmem>>) attributes {dimension_semantics = [#tpu.dimension_semantics<arbitrary>], iteration_bounds = array<i64: 1>, scalar_prefetch = 0 : i64, scratch_operands = 0 : i64, tpu.core_type = #tpu.core_type<tc>, window_params = [{pipeline_mode = #tpu.pipeline_mode<synchronous>, transform_indices = @transform_0, window_bounds = array<i64: 32, 128>}, {pipeline_mode = #tpu.pipeline_mode<synchronous>, transform_indices = @transform_1, window_bounds = array<i64: 384, 128>}, {pipeline_mode = #tpu.pipeline_mode<synchronous>, transform_indices = @transform_2, window_bounds = array<i64: 1, 128>}, {pipeline_mode = #tpu.pipeline_mode<synchronous>, transform_indices = @transform_3, window_bounds = array<i64: 5, 384, 128>}, {pipeline_mode = #tpu.pipeline_mode<synchronous>, transform_indices = @transform_4, window_bounds = array<i64: 5, 1, 128>}, {pipeline_mode = #tpu.pipeline_mode<synchronous>, transform_indices = @transform_5, window_bounds = array<i64: 384, 512>}, {pipeline_mode = #tpu.pipeline_mode<synchronous>, transform_indices = @transform_6, window_bounds = array<i64: 1, 512>}, {pipeline_mode = #tpu.pipeline_mode<synchronous>, transform_indices = @transform_7, window_bounds = array<i64: 1024, 128>}, {pipeline_mode = #tpu.pipeline_mode<synchronous>, transform_indices = @transform_8, window_bounds = array<i64: 1024, 128>}, {pipeline_mode = #tpu.pipeline_mode<synchronous>, transform_indices = @transform_9, window_bounds = array<i64: 1, 128>}, {pipeline_mode = #tpu.pipeline_mode<synchronous>, transform_indices = @transform_10, window_bounds = array<i64: 32, 256>}]} {
    %c0 = arith.constant 0 : index
    %c0_0 = arith.constant 0 : index
    %0 = vector.load %arg1[%c0, %c0_0] : memref<32x128xf32, #tpu.memory_space<vmem>>, vector<32x128xf32>
    %1 = tpu.iota {dimensions = array<i32: 0>} : vector<32x128xi32>
    %c16_i32 = arith.constant 16 : i32
    %c0_i32 = arith.constant 0 : i32
    %2 = arith.cmpi eq, %c16_i32, %c0_i32 : i32
    %c1_i32 = arith.constant 1 : i32
    %3 = arith.select %2, %c1_i32, %c16_i32 : i32
    %4 = vector.broadcast %3 : i32 to vector<32x128xi32>
    %5 = arith.remsi %1, %4 : vector<32x128xi32>
    %c0_i32_1 = arith.constant 0 : i32
    %6 = vector.broadcast %c0_i32_1 : i32 to vector<32x128xi32>
    %7 = arith.cmpi ne, %5, %6 : vector<32x128xi32>
    %c0_i32_2 = arith.constant 0 : i32
    %8 = vector.broadcast %c0_i32_2 : i32 to vector<32x128xi32>
    %9 = arith.cmpi slt, %5, %8 : vector<32x128xi32>
    %c0_i32_3 = arith.constant 0 : i32
    %10 = arith.cmpi slt, %3, %c0_i32_3 : i32
    %11 = vector.broadcast %10 : i1 to vector<32x128xi1>
    %12 = vector.broadcast %11 : vector<32x128xi1> to vector<32x128xi1>
    %13 = arith.xori %9, %12 : vector<32x128xi1>
    %14 = arith.andi %13, %7 : vector<32x128xi1>
    %15 = vector.broadcast %3 : i32 to vector<32x128xi32>
    %16 = arith.addi %5, %15 : vector<32x128xi32>
    %17 = arith.select %14, %16, %5 : vector<32x128xi1>, vector<32x128xi32>
    %c0_i32_4 = arith.constant 0 : i32
    %18 = vector.broadcast %c0_i32_4 : i32 to vector<32x128xi32>
    %19 = arith.cmpi eq, %17, %18 : vector<32x128xi32>
    %c15_i32 = arith.constant 15 : i32
    %20 = vector.broadcast %c15_i32 : i32 to vector<32x128xi32>
    %21 = arith.cmpi eq, %17, %20 : vector<32x128xi32>
    %22 = tpu.iota {dimensions = array<i32: 0>} : vector<32x512xi32>
    %c16_i32_5 = arith.constant 16 : i32
    %c0_i32_6 = arith.constant 0 : i32
    %23 = arith.cmpi eq, %c16_i32_5, %c0_i32_6 : i32
    %c1_i32_7 = arith.constant 1 : i32
    %24 = arith.select %23, %c1_i32_7, %c16_i32_5 : i32
    %25 = vector.broadcast %24 : i32 to vector<32x512xi32>
    %26 = arith.remsi %22, %25 : vector<32x512xi32>
    %c0_i32_8 = arith.constant 0 : i32
    %27 = vector.broadcast %c0_i32_8 : i32 to vector<32x512xi32>
    %28 = arith.cmpi ne, %26, %27 : vector<32x512xi32>
    %c0_i32_9 = arith.constant 0 : i32
    %29 = vector.broadcast %c0_i32_9 : i32 to vector<32x512xi32>
    %30 = arith.cmpi slt, %26, %29 : vector<32x512xi32>
    %c0_i32_10 = arith.constant 0 : i32
    %31 = arith.cmpi slt, %24, %c0_i32_10 : i32
    %32 = vector.broadcast %31 : i1 to vector<32x512xi1>
    %33 = vector.broadcast %32 : vector<32x512xi1> to vector<32x512xi1>
    %34 = arith.xori %30, %33 : vector<32x512xi1>
    %35 = arith.andi %34, %28 : vector<32x512xi1>
    %36 = vector.broadcast %24 : i32 to vector<32x512xi32>
    %37 = arith.addi %26, %36 : vector<32x512xi32>
    %38 = arith.select %35, %37, %26 : vector<32x512xi1>, vector<32x512xi32>
    %c0_i32_11 = arith.constant 0 : i32
    %39 = vector.broadcast %c0_i32_11 : i32 to vector<32x512xi32>
    %40 = arith.cmpi eq, %38, %39 : vector<32x512xi32>
    %c15_i32_12 = arith.constant 15 : i32
    %41 = vector.broadcast %c15_i32_12 : i32 to vector<32x512xi32>
    %42 = arith.cmpi eq, %38, %41 : vector<32x512xi32>
    %c0_13 = arith.constant 0 : index
    %c0_14 = arith.constant 0 : index
    %43 = vector.load %arg2[%c0_13, %c0_14] : memref<384x128xbf16, #tpu.memory_space<vmem>>, vector<384x128xbf16>
    %c0_15 = arith.constant 0 : index
    %c0_16 = arith.constant 0 : index
    %44 = vector.load %arg3[%c0_15, %c0_16] : memref<1x128xf32, #tpu.memory_space<vmem>>, vector<1x128xf32>
    %c1_i32_17 = arith.constant 1 : i32
    %45 = tpu.dynamic_rotate %0 by %c1_i32_17 dim 0 : vector<32x128xf32>, i32 -> vector<32x128xf32>
    %cst = arith.constant 0.000000e+00 : f32
    %46 = vector.broadcast %cst : f32 to vector<32x128xf32>
    %47 = arith.select %19, %46, %45 : vector<32x128xi1>, vector<32x128xf32>
    %c31_i32 = arith.constant 31 : i32
    %48 = tpu.dynamic_rotate %0 by %c31_i32 dim 0 : vector<32x128xf32>, i32 -> vector<32x128xf32>
    %cst_18 = arith.constant 0.000000e+00 : f32
    %49 = vector.broadcast %cst_18 : f32 to vector<32x128xf32>
    %50 = arith.select %21, %49, %48 : vector<32x128xi1>, vector<32x128xf32>
    %51 = tpu.concatenate %47, %0, %50 in 1 : vector<32x128xf32>, vector<32x128xf32>, vector<32x128xf32> -> vector<32x384xf32>
    %52 = arith.truncf %51 : vector<32x384xf32> to vector<32x384xbf16>
    %cst_19 = arith.constant dense<0.000000e+00> : vector<32x128xf32>
    %53 = tpu.matmul %52, %43, %cst_19 {dimension_numbers = #tpu.dot_dimension_numbers<[1], [0], [0], [1], [0, 0, 1, 1], [], []>} : vector<32x384xbf16>, vector<384x128xbf16>, vector<32x128xf32> -> vector<32x128xf32>
    %54 = vector.broadcast %44 : vector<1x128xf32> to vector<32x128xf32>
    %55 = arith.addf %53, %54 : vector<32x128xf32>
    %c0_20 = arith.constant 0 : index
    %c0_21 = arith.constant 0 : index
    %c0_22 = arith.constant 0 : index
    %56 = vector.load %arg4[%c0_20, %c0_21, %c0_22] : memref<5x384x128xbf16, #tpu.memory_space<vmem>>, vector<1x384x128xbf16>
    %57 = vector.shape_cast %56 : vector<1x384x128xbf16> to vector<384x128xbf16>
    %c0_23 = arith.constant 0 : index
    %c0_24 = arith.constant 0 : index
    %c0_25 = arith.constant 0 : index
    %58 = vector.load %arg5[%c0_23, %c0_24, %c0_25] : memref<5x1x128xf32, #tpu.memory_space<vmem>>, vector<1x1x128xf32>
    %59 = vector.shape_cast %58 : vector<1x1x128xf32> to vector<1x128xf32>
    %c1_i32_26 = arith.constant 1 : i32
    %60 = tpu.dynamic_rotate %55 by %c1_i32_26 dim 0 : vector<32x128xf32>, i32 -> vector<32x128xf32>
    %cst_27 = arith.constant 0.000000e+00 : f32
    %61 = vector.broadcast %cst_27 : f32 to vector<32x128xf32>
    %62 = arith.select %19, %61, %60 : vector<32x128xi1>, vector<32x128xf32>
    %c31_i32_28 = arith.constant 31 : i32
    %63 = tpu.dynamic_rotate %55 by %c31_i32_28 dim 0 : vector<32x128xf32>, i32 -> vector<32x128xf32>
    %cst_29 = arith.constant 0.000000e+00 : f32
    %64 = vector.broadcast %cst_29 : f32 to vector<32x128xf32>
    %65 = arith.select %21, %64, %63 : vector<32x128xi1>, vector<32x128xf32>
    %66 = tpu.concatenate %62, %55, %65 in 1 : vector<32x128xf32>, vector<32x128xf32>, vector<32x128xf32> -> vector<32x384xf32>
    %67 = arith.truncf %66 : vector<32x384xf32> to vector<32x384xbf16>
    %cst_30 = arith.constant dense<0.000000e+00> : vector<32x128xf32>
    %68 = tpu.matmul %67, %57, %cst_30 {dimension_numbers = #tpu.dot_dimension_numbers<[1], [0], [0], [1], [0, 0, 1, 1], [], []>} : vector<32x384xbf16>, vector<384x128xbf16>, vector<32x128xf32> -> vector<32x128xf32>
    %69 = vector.broadcast %59 : vector<1x128xf32> to vector<32x128xf32>
    %70 = arith.addf %68, %69 : vector<32x128xf32>
    %cst_31 = arith.constant 0.000000e+00 : f32
    %71 = vector.broadcast %cst_31 : f32 to vector<32x128xf32>
    %72 = arith.maximumf %70, %71 : vector<32x128xf32>
    %c1 = arith.constant 1 : index
    %c0_32 = arith.constant 0 : index
    %c0_33 = arith.constant 0 : index
    %73 = vector.load %arg4[%c1, %c0_32, %c0_33] : memref<5x384x128xbf16, #tpu.memory_space<vmem>>, vector<1x384x128xbf16>
    %74 = vector.shape_cast %73 : vector<1x384x128xbf16> to vector<384x128xbf16>
    %c1_34 = arith.constant 1 : index
    %c0_35 = arith.constant 0 : index
    %c0_36 = arith.constant 0 : index
    %75 = vector.load %arg5[%c1_34, %c0_35, %c0_36] : memref<5x1x128xf32, #tpu.memory_space<vmem>>, vector<1x1x128xf32>
    %76 = vector.shape_cast %75 : vector<1x1x128xf32> to vector<1x128xf32>
    %c1_i32_37 = arith.constant 1 : i32
    %77 = tpu.dynamic_rotate %72 by %c1_i32_37 dim 0 : vector<32x128xf32>, i32 -> vector<32x128xf32>
    %cst_38 = arith.constant 0.000000e+00 : f32
    %78 = vector.broadcast %cst_38 : f32 to vector<32x128xf32>
    %79 = arith.select %19, %78, %77 : vector<32x128xi1>, vector<32x128xf32>
    %c31_i32_39 = arith.constant 31 : i32
    %80 = tpu.dynamic_rotate %72 by %c31_i32_39 dim 0 : vector<32x128xf32>, i32 -> vector<32x128xf32>
    %cst_40 = arith.constant 0.000000e+00 : f32
    %81 = vector.broadcast %cst_40 : f32 to vector<32x128xf32>
    %82 = arith.select %21, %81, %80 : vector<32x128xi1>, vector<32x128xf32>
    %83 = tpu.concatenate %79, %72, %82 in 1 : vector<32x128xf32>, vector<32x128xf32>, vector<32x128xf32> -> vector<32x384xf32>
    %84 = arith.truncf %83 : vector<32x384xf32> to vector<32x384xbf16>
    %cst_41 = arith.constant dense<0.000000e+00> : vector<32x128xf32>
    %85 = tpu.matmul %84, %74, %cst_41 {dimension_numbers = #tpu.dot_dimension_numbers<[1], [0], [0], [1], [0, 0, 1, 1], [], []>} : vector<32x384xbf16>, vector<384x128xbf16>, vector<32x128xf32> -> vector<32x128xf32>
    %86 = vector.broadcast %76 : vector<1x128xf32> to vector<32x128xf32>
    %87 = arith.addf %85, %86 : vector<32x128xf32>
    %cst_42 = arith.constant 1.000000e-01 : f32
    %88 = vector.broadcast %cst_42 : f32 to vector<32x128xf32>
    %89 = arith.mulf %88, %87 : vector<32x128xf32>
    %90 = arith.addf %55, %89 : vector<32x128xf32>
    %c2 = arith.constant 2 : index
    %c0_43 = arith.constant 0 : index
    %c0_44 = arith.constant 0 : index
    %91 = vector.load %arg4[%c2, %c0_43, %c0_44] : memref<5x384x128xbf16, #tpu.memory_space<vmem>>, vector<1x384x128xbf16>
    %92 = vector.shape_cast %91 : vector<1x384x128xbf16> to vector<384x128xbf16>
    %c2_45 = arith.constant 2 : index
    %c0_46 = arith.constant 0 : index
    %c0_47 = arith.constant 0 : index
    %93 = vector.load %arg5[%c2_45, %c0_46, %c0_47] : memref<5x1x128xf32, #tpu.memory_space<vmem>>, vector<1x1x128xf32>
    %94 = vector.shape_cast %93 : vector<1x1x128xf32> to vector<1x128xf32>
    %c1_i32_48 = arith.constant 1 : i32
    %95 = tpu.dynamic_rotate %90 by %c1_i32_48 dim 0 : vector<32x128xf32>, i32 -> vector<32x128xf32>
    %cst_49 = arith.constant 0.000000e+00 : f32
    %96 = vector.broadcast %cst_49 : f32 to vector<32x128xf32>
    %97 = arith.select %19, %96, %95 : vector<32x128xi1>, vector<32x128xf32>
    %c31_i32_50 = arith.constant 31 : i32
    %98 = tpu.dynamic_rotate %90 by %c31_i32_50 dim 0 : vector<32x128xf32>, i32 -> vector<32x128xf32>
    %cst_51 = arith.constant 0.000000e+00 : f32
    %99 = vector.broadcast %cst_51 : f32 to vector<32x128xf32>
    %100 = arith.select %21, %99, %98 : vector<32x128xi1>, vector<32x128xf32>
    %101 = tpu.concatenate %97, %90, %100 in 1 : vector<32x128xf32>, vector<32x128xf32>, vector<32x128xf32> -> vector<32x384xf32>
    %102 = arith.truncf %101 : vector<32x384xf32> to vector<32x384xbf16>
    %cst_52 = arith.constant dense<0.000000e+00> : vector<32x128xf32>
    %103 = tpu.matmul %102, %92, %cst_52 {dimension_numbers = #tpu.dot_dimension_numbers<[1], [0], [0], [1], [0, 0, 1, 1], [], []>} : vector<32x384xbf16>, vector<384x128xbf16>, vector<32x128xf32> -> vector<32x128xf32>
    %104 = vector.broadcast %94 : vector<1x128xf32> to vector<32x128xf32>
    %105 = arith.addf %103, %104 : vector<32x128xf32>
    %cst_53 = arith.constant 0.000000e+00 : f32
    %106 = vector.broadcast %cst_53 : f32 to vector<32x128xf32>
    %107 = arith.maximumf %105, %106 : vector<32x128xf32>
    %c3 = arith.constant 3 : index
    %c0_54 = arith.constant 0 : index
    %c0_55 = arith.constant 0 : index
    %108 = vector.load %arg4[%c3, %c0_54, %c0_55] : memref<5x384x128xbf16, #tpu.memory_space<vmem>>, vector<1x384x128xbf16>
    %109 = vector.shape_cast %108 : vector<1x384x128xbf16> to vector<384x128xbf16>
    %c3_56 = arith.constant 3 : index
    %c0_57 = arith.constant 0 : index
    %c0_58 = arith.constant 0 : index
    %110 = vector.load %arg5[%c3_56, %c0_57, %c0_58] : memref<5x1x128xf32, #tpu.memory_space<vmem>>, vector<1x1x128xf32>
    %111 = vector.shape_cast %110 : vector<1x1x128xf32> to vector<1x128xf32>
    %c1_i32_59 = arith.constant 1 : i32
    %112 = tpu.dynamic_rotate %107 by %c1_i32_59 dim 0 : vector<32x128xf32>, i32 -> vector<32x128xf32>
    %cst_60 = arith.constant 0.000000e+00 : f32
    %113 = vector.broadcast %cst_60 : f32 to vector<32x128xf32>
    %114 = arith.select %19, %113, %112 : vector<32x128xi1>, vector<32x128xf32>
    %c31_i32_61 = arith.constant 31 : i32
    %115 = tpu.dynamic_rotate %107 by %c31_i32_61 dim 0 : vector<32x128xf32>, i32 -> vector<32x128xf32>
    %cst_62 = arith.constant 0.000000e+00 : f32
    %116 = vector.broadcast %cst_62 : f32 to vector<32x128xf32>
    %117 = arith.select %21, %116, %115 : vector<32x128xi1>, vector<32x128xf32>
    %118 = tpu.concatenate %114, %107, %117 in 1 : vector<32x128xf32>, vector<32x128xf32>, vector<32x128xf32> -> vector<32x384xf32>
    %119 = arith.truncf %118 : vector<32x384xf32> to vector<32x384xbf16>
    %cst_63 = arith.constant dense<0.000000e+00> : vector<32x128xf32>
    %120 = tpu.matmul %119, %109, %cst_63 {dimension_numbers = #tpu.dot_dimension_numbers<[1], [0], [0], [1], [0, 0, 1, 1], [], []>} : vector<32x384xbf16>, vector<384x128xbf16>, vector<32x128xf32> -> vector<32x128xf32>
    %121 = vector.broadcast %111 : vector<1x128xf32> to vector<32x128xf32>
    %122 = arith.addf %120, %121 : vector<32x128xf32>
    %cst_64 = arith.constant 1.000000e-01 : f32
    %123 = vector.broadcast %cst_64 : f32 to vector<32x128xf32>
    %124 = arith.mulf %123, %122 : vector<32x128xf32>
    %125 = arith.addf %90, %124 : vector<32x128xf32>
    %c4 = arith.constant 4 : index
    %c0_65 = arith.constant 0 : index
    %c0_66 = arith.constant 0 : index
    %126 = vector.load %arg4[%c4, %c0_65, %c0_66] : memref<5x384x128xbf16, #tpu.memory_space<vmem>>, vector<1x384x128xbf16>
    %127 = vector.shape_cast %126 : vector<1x384x128xbf16> to vector<384x128xbf16>
    %c4_67 = arith.constant 4 : index
    %c0_68 = arith.constant 0 : index
    %c0_69 = arith.constant 0 : index
    %128 = vector.load %arg5[%c4_67, %c0_68, %c0_69] : memref<5x1x128xf32, #tpu.memory_space<vmem>>, vector<1x1x128xf32>
    %129 = vector.shape_cast %128 : vector<1x1x128xf32> to vector<1x128xf32>
    %c1_i32_70 = arith.constant 1 : i32
    %130 = tpu.dynamic_rotate %125 by %c1_i32_70 dim 0 : vector<32x128xf32>, i32 -> vector<32x128xf32>
    %cst_71 = arith.constant 0.000000e+00 : f32
    %131 = vector.broadcast %cst_71 : f32 to vector<32x128xf32>
    %132 = arith.select %19, %131, %130 : vector<32x128xi1>, vector<32x128xf32>
    %c31_i32_72 = arith.constant 31 : i32
    %133 = tpu.dynamic_rotate %125 by %c31_i32_72 dim 0 : vector<32x128xf32>, i32 -> vector<32x128xf32>
    %cst_73 = arith.constant 0.000000e+00 : f32
    %134 = vector.broadcast %cst_73 : f32 to vector<32x128xf32>
    %135 = arith.select %21, %134, %133 : vector<32x128xi1>, vector<32x128xf32>
    %136 = tpu.concatenate %132, %125, %135 in 1 : vector<32x128xf32>, vector<32x128xf32>, vector<32x128xf32> -> vector<32x384xf32>
    %137 = arith.truncf %136 : vector<32x384xf32> to vector<32x384xbf16>
    %cst_74 = arith.constant dense<0.000000e+00> : vector<32x128xf32>
    %138 = tpu.matmul %137, %127, %cst_74 {dimension_numbers = #tpu.dot_dimension_numbers<[1], [0], [0], [1], [0, 0, 1, 1], [], []>} : vector<32x384xbf16>, vector<384x128xbf16>, vector<32x128xf32> -> vector<32x128xf32>
    %139 = vector.broadcast %129 : vector<1x128xf32> to vector<32x128xf32>
    %140 = arith.addf %138, %139 : vector<32x128xf32>
    %141 = arith.addf %140, %55 : vector<32x128xf32>
    %c0_75 = arith.constant 0 : index
    %c0_76 = arith.constant 0 : index
    %142 = vector.load %arg6[%c0_75, %c0_76] : memref<384x512xbf16, #tpu.memory_space<vmem>>, vector<384x512xbf16>
    %c0_77 = arith.constant 0 : index
    %c0_78 = arith.constant 0 : index
    %143 = vector.load %arg7[%c0_77, %c0_78] : memref<1x512xf32, #tpu.memory_space<vmem>>, vector<1x512xf32>
    %c1_i32_79 = arith.constant 1 : i32
    %144 = tpu.dynamic_rotate %141 by %c1_i32_79 dim 0 : vector<32x128xf32>, i32 -> vector<32x128xf32>
    %cst_80 = arith.constant 0.000000e+00 : f32
    %145 = vector.broadcast %cst_80 : f32 to vector<32x128xf32>
    %146 = arith.select %19, %145, %144 : vector<32x128xi1>, vector<32x128xf32>
    %c31_i32_81 = arith.constant 31 : i32
    %147 = tpu.dynamic_rotate %141 by %c31_i32_81 dim 0 : vector<32x128xf32>, i32 -> vector<32x128xf32>
    %cst_82 = arith.constant 0.000000e+00 : f32
    %148 = vector.broadcast %cst_82 : f32 to vector<32x128xf32>
    %149 = arith.select %21, %148, %147 : vector<32x128xi1>, vector<32x128xf32>
    %150 = tpu.concatenate %146, %141, %149 in 1 : vector<32x128xf32>, vector<32x128xf32>, vector<32x128xf32> -> vector<32x384xf32>
    %151 = arith.truncf %150 : vector<32x384xf32> to vector<32x384xbf16>
    %cst_83 = arith.constant dense<0.000000e+00> : vector<32x512xf32>
    %152 = tpu.matmul %151, %142, %cst_83 {dimension_numbers = #tpu.dot_dimension_numbers<[1], [0], [0], [1], [0, 0, 1, 1], [], []>} : vector<32x384xbf16>, vector<384x512xbf16>, vector<32x512xf32> -> vector<32x512xf32>
    %153 = vector.broadcast %143 : vector<1x512xf32> to vector<32x512xf32>
    %154 = arith.addf %152, %153 : vector<32x512xf32>
    %155 = arith.truncf %154 : vector<32x512xf32> to vector<32x512xbf16>
    %c1_i32_84 = arith.constant 1 : i32
    %156 = tpu.dynamic_rotate %154 by %c1_i32_84 dim 0 : vector<32x512xf32>, i32 -> vector<32x512xf32>
    %cst_85 = arith.constant 0.000000e+00 : f32
    %157 = vector.broadcast %cst_85 : f32 to vector<32x512xf32>
    %158 = arith.select %40, %157, %156 : vector<32x512xi1>, vector<32x512xf32>
    %159 = arith.truncf %158 : vector<32x512xf32> to vector<32x512xbf16>
    %c31_i32_86 = arith.constant 31 : i32
    %160 = tpu.dynamic_rotate %154 by %c31_i32_86 dim 0 : vector<32x512xf32>, i32 -> vector<32x512xf32>
    %cst_87 = arith.constant 0.000000e+00 : f32
    %161 = vector.broadcast %cst_87 : f32 to vector<32x512xf32>
    %162 = arith.select %42, %161, %160 : vector<32x512xi1>, vector<32x512xf32>
    %163 = arith.truncf %162 : vector<32x512xf32> to vector<32x512xbf16>
    %164 = tpu.concatenate %159, %155 in 1 : vector<32x512xbf16>, vector<32x512xbf16> -> vector<32x1024xbf16>
    %c0_88 = arith.constant 0 : index
    %c0_89 = arith.constant 0 : index
    %165 = vector.load %arg8[%c0_88, %c0_89] : memref<1024x128xbf16, #tpu.memory_space<vmem>>, vector<1024x128xbf16>
    %cst_90 = arith.constant dense<0.000000e+00> : vector<32x128xf32>
    %166 = tpu.matmul %164, %165, %cst_90 {dimension_numbers = #tpu.dot_dimension_numbers<[1], [0], [0], [1], [0, 0, 1, 1], [], []>} : vector<32x1024xbf16>, vector<1024x128xbf16>, vector<32x128xf32> -> vector<32x128xf32>
    %c0_91 = arith.constant 0 : index
    %c0_92 = arith.constant 0 : index
    %167 = vector.load %arg10[%c0_91, %c0_92] : memref<1x128xf32, #tpu.memory_space<vmem>>, vector<1x128xf32>
    %168 = vector.broadcast %167 : vector<1x128xf32> to vector<32x128xf32>
    %169 = arith.addf %166, %168 : vector<32x128xf32>
    %170 = tpu.concatenate %155, %163 in 1 : vector<32x512xbf16>, vector<32x512xbf16> -> vector<32x1024xbf16>
    %c0_93 = arith.constant 0 : index
    %c0_94 = arith.constant 0 : index
    %171 = vector.load %arg9[%c0_93, %c0_94] : memref<1024x128xbf16, #tpu.memory_space<vmem>>, vector<1024x128xbf16>
    %cst_95 = arith.constant dense<0.000000e+00> : vector<32x128xf32>
    %172 = tpu.matmul %170, %171, %cst_95 {dimension_numbers = #tpu.dot_dimension_numbers<[1], [0], [0], [1], [0, 0, 1, 1], [], []>} : vector<32x1024xbf16>, vector<1024x128xbf16>, vector<32x128xf32> -> vector<32x128xf32>
    %c0_96 = arith.constant 0 : index
    %c0_97 = arith.constant 0 : index
    %173 = vector.load %arg10[%c0_96, %c0_97] : memref<1x128xf32, #tpu.memory_space<vmem>>, vector<1x128xf32>
    %174 = vector.broadcast %173 : vector<1x128xf32> to vector<32x128xf32>
    %175 = arith.addf %172, %174 : vector<32x128xf32>
    %176 = tpu.concatenate %169, %175 in 1 : vector<32x128xf32>, vector<32x128xf32> -> vector<32x256xf32>
    %c0_98 = arith.constant 0 : index
    %c0_99 = arith.constant 0 : index
    %177 = vector.load %arg11[%c0_98, %c0_99] : memref<32x256xf32, #tpu.memory_space<vmem>>, vector<32x256xf32>
    tpu.vector_store %arg11[%c0_98, %c0_99], %176 {strides = array<i32>} : memref<32x256xf32, #tpu.memory_space<vmem>>, vector<32x256xf32>,
    return
  }
  func.func @transform_0(%arg0: i32) -> (i32, i32) {
    %c0_i32 = arith.constant 0 : i32
    %c0_i32_0 = arith.constant 0 : i32
    %c0_i32_1 = arith.constant 0 : i32
    return %c0_i32, %c0_i32_0 : i32, i32
  }
  func.func @transform_1(%arg0: i32) -> (i32, i32) {
    %c0_i32 = arith.constant 0 : i32
    %c0_i32_0 = arith.constant 0 : i32
    %c0_i32_1 = arith.constant 0 : i32
    return %c0_i32, %c0_i32_0 : i32, i32
  }
  func.func @transform_2(%arg0: i32) -> (i32, i32) {
    %c0_i32 = arith.constant 0 : i32
    %c0_i32_0 = arith.constant 0 : i32
    %c0_i32_1 = arith.constant 0 : i32
    return %c0_i32, %c0_i32_0 : i32, i32
  }
  func.func @transform_3(%arg0: i32) -> (i32, i32, i32) {
    %c0_i32 = arith.constant 0 : i32
    %c0_i32_0 = arith.constant 0 : i32
    %c0_i32_1 = arith.constant 0 : i32
    %c0_i32_2 = arith.constant 0 : i32
    return %c0_i32, %c0_i32_0, %c0_i32_1 : i32, i32, i32
  }
  func.func @transform_4(%arg0: i32) -> (i32, i32, i32) {
    %c0_i32 = arith.constant 0 : i32
    %c0_i32_0 = arith.constant 0 : i32
    %c0_i32_1 = arith.constant 0 : i32
    %c0_i32_2 = arith.constant 0 : i32
    return %c0_i32, %c0_i32_0, %c0_i32_1 : i32, i32, i32
  }
  func.func @transform_5(%arg0: i32) -> (i32, i32) {
    %c0_i32 = arith.constant 0 : i32
    %c0_i32_0 = arith.constant 0 : i32
    %c0_i32_1 = arith.constant 0 : i32
    return %c0_i32, %c0_i32_0 : i32, i32
  }
  func.func @transform_6(%arg0: i32) -> (i32, i32) {
    %c0_i32 = arith.constant 0 : i32
    %c0_i32_0 = arith.constant 0 : i32
    %c0_i32_1 = arith.constant 0 : i32
    return %c0_i32, %c0_i32_0 : i32, i32
  }
  func.func @transform_7(%arg0: i32) -> (i32, i32) {
    %c0_i32 = arith.constant 0 : i32
    %c0_i32_0 = arith.constant 0 : i32
    %c0_i32_1 = arith.constant 0 : i32
    return %c0_i32, %c0_i32_0 : i32, i32
  }
  func.func @transform_8(%arg0: i32) -> (i32, i32) {
    %c0_i32 = arith.constant 0 : i32
    %c0_i32_0 = arith.constant 0 : i32
    %c0_i32_1 = arith.constant 0 : i32
    return %c0_i32, %c0_i32_0 : i32, i32
  }
  func.func @transform_9(%arg0: i32) -> (i32, i32) {
    %c0_i32 = arith.constant 0 : i32
    %c0_i32_0 = arith.constant 0 : i32
    %c0_i32_1 = arith.constant 0 : i32
    return %c0_i32, %c0_i32_0 : i32, i32
  }
  func.func @transform_10(%arg0: i32) -> (i32, i32) {
    %c0_i32 = arith.constant 0 : i32
    %c0_i32_0 = arith.constant 0 : i32
    %c0_i32_1 = arith.constant 0 : i32
    return %c0_i32, %c0_i32_0 : i32, i32
  }
}

</mosaic_0001>

<bundles_post_ra>
// kernel: edsr_forward.1
= control target key start
LH: loop header
LB: loop body
LE: loop exit
PB: predicated region body
PF: predicated region fallthrough
CT: control target
= control target key end

     0   :  { %15 = vsyncpa [#allocation3], 0  ;;  %s7642_s0 = inlined_call_operand.vmem [shape: f32[32,128], index: 0, kind: input, shape index: {}]   ;;  %s7643_s1 = inlined_call_operand.hbm [shape: bf16[384,128], index: 1, kind: input, shape index: {}]   ;;  %s7644_s2 = inlined_call_operand.vmem [shape: f32[1,128], index: 2, kind: input, shape index: {}]   ;;  %s7645_s3 = inlined_call_operand.vmem [shape: bf16[5,384,128], index: 3, kind: input, shape index: {}]   ;;  %s7646_s4 = inlined_call_operand.vmem [shape: f32[5,1,128], index: 4, kind: input, shape index: {}]   ;;  %s7647_s5 = inlined_call_operand.hbm [shape: bf16[384,512], index: 5, kind: input, shape index: {}]   ;;  %s7648_s6 = inlined_call_operand.vmem [shape: f32[1,512], index: 6, kind: input, shape index: {}]   ;;  %s7649_s7 = inlined_call_operand.hbm [shape: bf16[1024,128], index: 7, kind: input, shape index: {}]   ;;  %s7650_s8 = inlined_call_operand.hbm [shape: bf16[1024,128], index: 8, kind: input, shape index: {}]   ;;  %s7651_s9 = inlined_call_operand.vmem [shape: f32[1,128], index: 9, kind: input, shape index: {}]   ;;  %s7652_s10 = inlined_call_operand.vmem [shape: f32[32,256], index: 10, kind: output, shape index: {}]  }
   0x1   :  { %16 = vsyncpa [#allocation5], 0 }
   0x2   :  { %17 = vsyncpa [#allocation8], 0  ;;  %s6445_s13 = smov [#allocation4]   ;;  %s6351_s17 = scalar_lea.hbm %s7647_s5, 12288 }
   0x3   :  { %s43_s14 = sshll.u32 %s6445_s13, 4  ;;  %p6352_p0 = scmp.ne.s32.totalorder %s7647_s5, %s6351_s17  ;;  %s44_s14 = int_to_ptr.vmem [resolvable:$true] %s43_s14 }
   0x4   :  { %p6355_p1 = scmp.lt.u32.totalorder %s6351_s17, %s7647_s5 }
   0x6   :  { %p6357_p2 = pnand %p6355_p1, %p6352_p0 }
   0x8   :  { %6360 = shalt.err (!%p6357_p2)
}
   0x9   :  { %s6361_s22 = scalar_lea.vmem %s44_s14, 12288  ;;  %p6366_p4 = scmp.lt.s32.totalorder %s44_s14, %s44_s14 }
   0xa   :  { %p6362_p3 = scmp.ne.s32.totalorder %s44_s14, %s6361_s22  ;;  %p6367_p5 = scmp.lt.s32.totalorder %s6361_s22, %s6361_s22 }
   0xc   :  { %p6368_p6 = por %p6367_p5, %p6366_p4 }
   0xe   :  { %p6369_p7 = pnand %p6368_p6, %p6362_p3 }
  0x10   :  { %6372 = shalt.err (!%p6369_p7)
}
  0x11   :  { %s6446_s23 = smov 256   ;;  %s6447_s24 = smov 16  }
  0x12   :  { %49 = dma.hbm_to_vmem [thread:$0]  %s7647_s5, 12288, %s44_s14, [#allocation5], %s6446_s23, %s6446_s23, %s6447_s24  }
  0x13   :  { %s6448_s27 = smov [#allocation2]   ;;  %s6373_s11 = scalar_lea.hbm %s7643_s1, 3072 }
  0x14   :  { %s25_s28 = sshll.u32 %s6448_s27, 4  ;;  %p6374_p8 = scmp.ne.s32.totalorder %s7643_s1, %s6373_s11  ;;  %s26_s28 = int_to_ptr.vmem [resolvable:$true] %s25_s28 }
  0x15   :  { %p6377_p9 = scmp.lt.u32.totalorder %s6373_s11, %s7643_s1 }
  0x17   :  { %p6379_p10 = pnand %p6377_p9, %p6374_p8 }
  0x19   :  { %6382 = shalt.err (!%p6379_p10)
}
  0x1a   :  { %s6383_s17 = scalar_lea.vmem %s26_s28, 3072  ;;  %p6388_p12 = scmp.lt.s32.totalorder %s26_s28, %s26_s28 }
  0x1b   :  { %p6384_p11 = scmp.ne.s32.totalorder %s26_s28, %s6383_s17  ;;  %p6389_p13 = scmp.lt.s32.totalorder %s6383_s17, %s6383_s17 }
  0x1d   :  { %p6390_p0 = por %p6389_p13, %p6388_p12 }
  0x1f   :  { %p6391_p1 = pnand %p6390_p0, %p6384_p11 }
  0x21   :  { %6394 = shalt.err (!%p6391_p1)
}
  0x22   :  { %s6449_s5 = smov 64   ;;  %s6450_s14 = smov 4  }
  0x23   :  { %31 = dma.hbm_to_vmem [thread:$0]  %s7643_s1, 3072, %s26_s28, [#allocation3], %s6449_s5, %s6449_s5, %s6450_s14  }
  0x24   :  { %s6451_s20 = smov [#allocation6]   ;;  %s6452_s22 = smov [#allocation7]  }
  0x25   :  { %s57_s21 = sshll.u32 %s6451_s20, 4  ;;  %s69_s23 = sshll.u32 %s6452_s22, 4  ;;  %s58_s21 = int_to_ptr.vmem [resolvable:$true] %s57_s21  ;;  %s6537_s23 = int_to_ptr.vmem [resolvable:$true] %s69_s23 }
  0x26   :  { %s6395_s26 = scalar_lea.hbm %s7649_s7, 8192 }
  0x27   :  { %p6396_p2 = scmp.ne.s32.totalorder %s7649_s7, %s6395_s26  ;;  %p6399_p3 = scmp.lt.u32.totalorder %s6395_s26, %s7649_s7 }
  0x29   :  { %p6401_p4 = pnand %p6399_p3, %p6396_p2 }
  0x2b   :  { %6404 = shalt.err (!%p6401_p4)
}
  0x2c   :  { %s6405_s1 = scalar_lea.vmem %s58_s21, 8192  ;;  %p6410_p6 = scmp.lt.s32.totalorder %s58_s21, %s58_s21 }
  0x2d   :  { %p6406_p5 = scmp.ne.s32.totalorder %s58_s21, %s6405_s1  ;;  %p6411_p7 = scmp.lt.s32.totalorder %s6405_s1, %s6405_s1 }
  0x2f   :  { %p6412_p8 = por %p6411_p7, %p6410_p6 }
  0x31   :  { %p6413_p9 = pnand %p6412_p8, %p6406_p5 }
  0x33   :  { %6416 = shalt.err (!%p6413_p9)
}
  0x34   :  { %63 = dma.hbm_to_vmem [thread:$0]  %s7649_s7, 8192, %s58_s21, [#allocation5], %s6449_s5, %s6449_s5, %s6450_s14  }
  0x35   :  { %s6417_s16 = scalar_lea.hbm %s7650_s8, 8192 }
  0x36   :  { %p6418_p10 = scmp.ne.s32.totalorder %s7650_s8, %s6417_s16  ;;  %p6421_p11 = scmp.lt.u32.totalorder %s6417_s16, %s7650_s8 }
  0x38   :  { %p6423_p12 = pnand %p6421_p11, %p6418_p10 }
  0x3a   :  { %6426 = shalt.err (!%p6423_p12)
}
  0x3b   :  { %s6427_s22 = scalar_lea.vmem %s6537_s23, 8192  ;;  %p6432_p0 = scmp.lt.s32.totalorder %s6537_s23, %s6537_s23 }
  0x3c   :  { %p6428_p13 = scmp.ne.s32.totalorder %s6537_s23, %s6427_s22  ;;  %p6433_p1 = scmp.lt.s32.totalorder %s6427_s22, %s6427_s22 }
  0x3e   :  { %p6434_p2 = por %p6433_p1, %p6432_p0 }
  0x40   :  { %p6435_p3 = pnand %p6434_p2, %p6428_p13 }
  0x42   :  { %6438 = shalt.err (!%p6435_p3)
}
  0x43   :  { %75 = dma.hbm_to_vmem [thread:$0]  %s7650_s8, 8192, %s6537_s23, [#allocation8], %s6449_s5, %s6449_s5, %s6450_s14  }
  0x44   :  { %6439 = dma.done.wait [#allocation3], 3072  }
  0x45   :  { %6440 = vsyncadd [#allocation3], 4294964224 }
  0x46   :  { %6441 = dma.done.wait [#allocation5], 20480  }
  0x47   :  { %6442 = vsyncadd [#allocation5], 4294946816 }
  0x48   :  { %6443 = dma.done.wait [#allocation8], 8192  }
  0x49   :  { %6444 = vsyncadd [#allocation8], 4294959104  ;;  %v5935_v0 = vld [vmem:[#allocation2 + $0x40] sm:$0xff]   ;;  %v5937_v2 = vld [vmem:[#allocation2 + $0x48] sm:$0xff]   ;;  %v95_v8 = vlaneseq  ;;  %vm6453_vm5 = vmmov 1  }
  0x4a   :  { %v5936_v1 = vld [vmem:[#allocation2] sm:$0xff]   ;;  %5321 = vmatprep.subr.bf16.mxu0 %v5935_v0  ;;  %v5939_v4 = vld [vmem:[#allocation2 + $0x8] sm:$0xff]   ;;  %v5940_v5 = vld [vmem:[#allocation2 + $0x50] sm:$0xff]  }
  0x4b   :  { %5322 = vmatpush3.bf16.msra.mxu0 %v5936_v1  ;;  %v5938_v3 = vld [vmem:[#allocation2 + $0x80] sm:$0xff]   ;;  %v5941_v6 = vld [vmem:[#allocation2 + $0x88] sm:$0xff]   ;;  %v5942_v7 = vld [vmem:[#allocation2 + $0x10] sm:$0xff]   ;;  %v6574_v13 = vshrl.u32 %v95_v8, 7 }
  0x4c   :  { %5323 = vmatprep.subr.bf16.mxu0 %v5937_v2  ;;  %5773 = vmatprep.subr.bf16.mxu1 %v5938_v3  ;;  %v5943_v9 = vld [vmem:[#allocation2 + $0x58] sm:$0xff]   ;;  %v5944_v10 = vld [vmem:[#allocation2 + $0x90] sm:$0xff]   ;;  %v5946_v12 = vld [vmem:[#allocation2 + $0x60] sm:$0xff]  }
  0x4d   :  { %5774 = vmatpush3.bf16.msra.mxu1 %v5938_v3  ;;  %v5945_v11 = vld [vmem:[#allocation2 + $0x18] sm:$0xff]   ;;  %v5948_v15 = vld [vmem:[#allocation2 + $0x20] sm:$0xff]   ;;  %v97_v17 = vadd.s32 8, %v6574_v13  ;;  %v5949_v18 = vld [vmem:[#allocation2 + $0x68] sm:$0xff]   ;;  %v104_v19 = vand.u32 15, %v6574_v13  ;;  %v99_v20 = vadd.s32 24, %v6574_v13 }
  0x4e   :  { %5775 = vmatprep.subr.bf16.mxu1 %v5941_v6  ;;  %v5947_v14 = vld [vmem:[#allocation2 + $0x98] sm:$0xff]   ;;  %v5950_v16 = vld [vmem:[#allocation2 + $0xa0] sm:$0xff]   ;;  %v5951_v21 = vld [vmem:[#allocation2 + $0x28] sm:$0xff]   ;;  %v98_v22 = vadd.s32 16, %v6574_v13  ;;  %vm209_vm0 = vcmp.lt.s32.totalorder %v6574_v13, 1  ;;  %vm222_vm1 = vcmp.lt.s32.totalorder %v6574_v13, 7 }
  0x4f   :  { %5324 = vmatpush3.bf16.msra.mxu0 %v5939_v4  ;;  %v5953_v23 = vld [vmem:[#allocation2 + $0xa8] sm:$0xff]   ;;  %v111_v24 = vand.u32 15, %v97_v17  ;;  %v5952_v25 = vld [vmem:[#allocation2 + $0x70] sm:$0xff]   ;;  %v125_v27 = vand.u32 15, %v99_v20  ;;  %v5955_v28 = vld [vmem:[#allocation2 + $0x78] sm:$0xff]   ;;  %vm6591_vm2 = vcmp.ne.s32.totalorder %v104_v19, 0 }
  0x50   :  { %5325 = vmatprep.subr.bf16.mxu0 %v5940_v5  ;;  %v5954_v26 = vld [vmem:[#allocation2 + $0x30] sm:$0xff]   ;;  %v91_v30 = vld [vmem:[%s7642_s0] sm:$0xff]  ;;  %v92_v31 = vld [vmem:[%s7642_s0 + $0x8] sm:$0xff]  ;;  %v118_v35 = vand.u32 15, %v98_v22 }
  0x51   :  { %5776 = vmatpush3.bf16.msra.mxu1 %v5941_v6  ;;  %v5956_v29 = vld [vmem:[#allocation2 + $0xb0] sm:$0xff]   ;;  %v94_v32 = vld [vmem:[%s7642_s0 + $0x18] sm:$0xff]  ;;  %vm6595_vm3 = vcmp.ne.s32.totalorder %v111_v24, 15  ;;  %v205_v36 = vrot.slane %v91_v30, 7  ;;  %v206_v37 = vrot.slane %v92_v31, 7  ;;  %v218_v38 = vrot.slane %v91_v30, 1  ;;  %vm6615_vm6 = vmpackc.low %vm6453_vm5, %vm6591_vm2 }
  0x52   :  { %5777 = vmatprep.subr.bf16.mxu1 %v5944_v10  ;;  %v219_v39 = vrot.slane %v92_v31, 1  ;;  %v5957_v40 = vld [vmem:[#allocation2 + $0x38] sm:$0xff]   ;;  %v232_v41 = vpack.c.bf16 %v92_v31, %v91_v30  ;;  %v208_v42 = vrot.slane %v94_v32, 7  ;;  %v93_v43 = vld [vmem:[%s7642_s0 + $0x10] sm:$0xff]  ;;  %vm6602_vm4 = vcmp.ne.s32.totalorder %v125_v27, 15  ;;  %vm6624_vm7 = vmpackc.low %vm6595_vm3, %vm6453_vm5 }
  0x53   :  { %5326 = vmatpush3.bf16.msra.mxu0 %v5942_v7  ;;  %v220_v45 = vrot.slane %v93_v43, 1  ;;  %v221_v47 = vrot.slane %v94_v32, 1  ;;  %v212_v48 = vsel %vm209_vm0, %v205_v36, %v206_v37  ;;  %v5958_v51 = vld [vmem:[#allocation2 + $0xb8] sm:$0xff]   ;;  %vm5318_vm8 = vcmp.ne.s32.totalorder %v118_v35, 0  ;;  %v5959_v54 = vld [vmem:[%s7645_s3 + $0x40] sm:$0xff]   ;;  %vm6634_vm9 = vmpackc.low %vm6602_vm4, %vm6453_vm5 }
  0x54   :  { %5327 = vmatprep.subr.bf16.mxu0 %v5943_v9  ;;  %v225_v46 = vsel %vm222_vm1, %v218_v38, %v219_v39  ;;  %v213_v49 = vsel %vm209_vm0, %v208_v42, %v205_v36  ;;  %419 = vmatprep.mubr.bf16.mxu0 %v232_v41  ;;  %v5960_v60 = vld [vmem:[%s7645_s3 + $0x80] sm:$0xff]   ;;  %v207_v61 = vrot.slane %v93_v43, 7  ;;  %v235_v62 = vpack.c.bf16 %v94_v32, %v93_v43  ;;  %vm6646_vm10 = vmpackc.low %vm6453_vm5, %vm5318_vm8  ;;  %v5962_v1 = vld [vmem:[%s7645_s3 + $0x48] sm:$0xff]  }
  0x55   :  { %5778 = vmatpush3.bf16.msra.mxu1 %v5944_v10  ;;  %v224_v52 = vsel %vm222_vm1, %v219_v39, %v220_v45  ;;  %v4581_v57 = vpack.c.bf16 %v212_v48, %v213_v49  ;;  %v223_v58 = vsel %vm222_vm1, %v220_v45, %v221_v47  ;;  %v226_v59 = vsel %vm222_vm1, %v221_v47, %v218_v38  ;;  %v5961_v0 = vld [vmem:[%s7645_s3] sm:$0xff]   ;;  %v5963_v3 = vld [vmem:[%s7645_s3 + $0x88] sm:$0xff]   ;;  %v5965_v7 = vld [vmem:[%s7645_s3 + $0x50] sm:$0xff]  }
  0x56   :  { %5779 = vmatprep.subr.bf16.mxu1 %v5947_v14  ;;  %v4589_v55 = vpack.c.bf16 %v224_v52, %v225_v46  ;;  %v4593_v2 = vpack.c.bf16 %v226_v59, %v223_v58  ;;  %v5964_v4 = vld [vmem:[%s7645_s3 + $0x8] sm:$0xff]   ;;  %v210_v5 = vsel %vm209_vm0, %v207_v61, %v208_v42  ;;  %v211_v6 = vsel %vm209_vm0, %v206_v37, %v207_v61  ;;  %v5966_v8 = vld [vmem:[%s7645_s3 + $0x90] sm:$0xff]   ;;  %v5973_v17 = vld [vmem:[%s7645_s3 + $0x20] sm:$0xff]  }
  0x57   :  { %5328 = vmatpush3.bf16.msra.mxu0 %v5945_v11  ;;  %v4585_v9 = vpack.c.bf16 %v210_v5, %v211_v6  ;;  %v5967_v10 = vld [vmem:[%s7645_s3 + $0x10] sm:$0xff]   ;;  %v5968_v11 = vld [vmem:[%s7645_s3 + $0x58] sm:$0xff]   ;;  %v5975_v19 = vld [vmem:[%s7645_s3 + $0xa8] sm:$0xff]  }
  0x58   :  { %5329 = vmatprep.subr.bf16.mxu0 %v5946_v12  ;;  %5789 = vmatprep.mubr.msk.bf16.mxu1 %vm6624_vm7, %v4589_v55  ;;  %v5969_v12 = vld [vmem:[%s7645_s3 + $0x98] sm:$0xff]   ;;  %v5976_v20 = vld [vmem:[%s7645_s3 + $0x28] sm:$0xff]   ;;  %v5978_v22 = vld [vmem:[%s7645_s3 + $0xb0] sm:$0xff]  }
  0x59   :  { %5780 = vmatpush3.bf16.msra.mxu1 %v5947_v14  ;;  %v5970_v14 = vld [vmem:[%s7645_s3 + $0x18] sm:$0xff]   ;;  %v5983_v27 = vld [vmem:[%s7645_s3 + $0x100] sm:$0xff]   ;;  %v6275_v63 = vld [vmem:[#allocation6 + $0x168] sm:$0xff]  }
  0x5a   :  { %5781 = vmatprep.subr.bf16.mxu1 %v5950_v16  ;;  %v5980_v24 = vld [vmem:[%s7645_s3 + $0x78] sm:$0xff]   ;;  %v4554_v31 = vld [vmem:[%s7644_s2] ss:$0 sm:$0xff] }
  0x5b   :  { %5330 = vmatpush3.bf16.msra.mxu0 %v5948_v15  ;;  %v5971_v15 = vld [vmem:[%s7645_s3 + $0x60] sm:$0xff]  }
  0x5c   :  { %5331 = vmatprep.subr.bf16.mxu0 %v5949_v18  ;;  %v5974_v18 = vld [vmem:[%s7645_s3 + $0x68] sm:$0xff]  }
  0x5d   :  { %5782 = vmatpush3.bf16.msra.mxu1 %v5950_v16  ;;  %v5972_v16 = vld [vmem:[%s7645_s3 + $0xa0] sm:$0xff]  }
  0x5e   :  { %5783 = vmatprep.subr.bf16.mxu1 %v5953_v23 }
  0x5f   :  { %5332 = vmatpush3.bf16.msra.mxu0 %v5951_v21  ;;  %v5977_v21 = vld [vmem:[%s7645_s3 + $0x70] sm:$0xff]  }
  0x60   :  { %5333 = vmatprep.subr.bf16.mxu0 %v5952_v25  ;;  %v5981_v25 = vld [vmem:[%s7645_s3 + $0xb8] sm:$0xff]  }
  0x61   :  { %5784 = vmatpush3.bf16.msra.mxu1 %v5953_v23  ;;  %v5979_v23 = vld [vmem:[%s7645_s3 + $0x30] sm:$0xff]  }
  0x62   :  { %5785 = vmatprep.subr.bf16.mxu1 %v5956_v29 }
  0x63   :  { %5334 = vmatpush3.bf16.msra.mxu0 %v5954_v26  ;;  %v5982_v26 = vld [vmem:[%s7645_s3 + $0x38] sm:$0xff]  }
  0x64   :  { %5335 = vmatprep.subr.bf16.mxu0 %v5955_v28  ;;  %v5984_v28 = vld [vmem:[%s7645_s3 + $0x140] sm:$0xff]  }
  0x65   :  { %5786 = vmatpush3.bf16.msra.mxu1 %v5956_v29 }
  0x66   :  { %5787 = vmatprep.subr.bf16.mxu1 %v5958_v51 }
  0x67   :  { %5336 = vmatpush3.bf16.msra.mxu0 %v5957_v40 }
  0x68   :  { %5359 = vmatprep.subr.bf16.mxu0 %v5959_v54 }
  0x69   :  { %5788 = vmatpush3.bf16.msra.mxu1 %v5958_v51 }
  0x6a   :  { %4582 = vmatmul.mubr.msk.bf16.vlgmr.msra.gmra.mrb[0].mxu0 %vm6615_vm6, %v4581_v57  ;;  %5793 = vmatprep.subr.bf16.mxu1 %v5960_v60 }
  0x6b   :  { %427 = vmatprep.mubr.bf16.mxu0 %v235_v62  ;;  %5360 = vmatpush3.bf16.msra.mxu0 %v5961_v0 }
  0x6c   :  { %5790 = vmatmul.mubr.msk.bf16.vlgmr.msra.gmra.mrb[0].mxu1 %vm6634_vm9, %v4593_v2  ;;  %5361 = vmatprep.subr.bf16.mxu0 %v5962_v1 }
  0x6d   :  { %5794 = vmatpush3.bf16.msra.mxu1 %v5960_v60 }
  0x6e   :  { %5795 = vmatprep.subr.bf16.mxu1 %v5963_v3 }
  0x6f   :  { %5362 = vmatpush3.bf16.msra.mxu0 %v5964_v4 }
  0x70   :  { %5363 = vmatprep.subr.bf16.mxu0 %v5965_v7 }
  0x71   :  { %5796 = vmatpush3.bf16.msra.mxu1 %v5963_v3 }
  0x72   :  { %4586 = vmatmul.mubr.msk.bf16.gmra.mrb[4].mxu0 %vm6646_vm10, %v4585_v9  ;;  %5797 = vmatprep.subr.bf16.mxu1 %v5966_v8  ;;  %v5985_v9 = vld [vmem:[%s7645_s3 + $0xc0] sm:$0xff]  }
  0x73   :  { %5364 = vmatpush3.bf16.msra.mxu0 %v5967_v10 }
  0x74   :  { %5365 = vmatprep.subr.bf16.mxu0 %v5968_v11 }
  0x75   :  { %5798 = vmatpush3.bf16.msra.mxu1 %v5966_v8 }
  0x76   :  { %5799 = vmatprep.subr.bf16.mxu1 %v5969_v12 }
  0x77   :  { %5366 = vmatpush3.bf16.msra.mxu0 %v5970_v14 }
  0x78   :  { %5367 = vmatprep.subr.bf16.mxu0 %v5971_v15  ;;  %v5987_v15 = vld [vmem:[%s7645_s3 + $0x148] sm:$0xff]  }
  0x79   :  { %5800 = vmatpush3.bf16.msra.mxu1 %v5969_v12  ;;  %v5986_v12 = vld [vmem:[%s7645_s3 + $0x108] sm:$0xff]  }
  0x7a   :  { %5801 = vmatprep.subr.bf16.mxu1 %v5972_v16 }
  0x7b   :  { %5368 = vmatpush3.bf16.msra.mxu0 %v5973_v17  ;;  %v5988_v17 = vld [vmem:[%s7645_s3 + $0xc8] sm:$0xff]  }
  0x7c   :  { %5369 = vmatprep.subr.bf16.mxu0 %v5974_v18 }
  0x7d   :  { %5802 = vmatpush3.bf16.msra.mxu1 %v5972_v16 }
  0x7e   :  { %5803 = vmatprep.subr.bf16.mxu1 %v5975_v19 }
  0x7f   :  { %5370 = vmatpush3.bf16.msra.mxu0 %v5976_v20 }
  0x80   :  { %5371 = vmatprep.subr.bf16.mxu0 %v5977_v21  ;;  %v5989_v21 = vld [vmem:[%s7645_s3 + $0x110] sm:$0xff]  }
  0x81   :  { %5804 = vmatpush3.bf16.msra.mxu1 %v5975_v19 }
  0x82   :  { %5805 = vmatprep.subr.bf16.mxu1 %v5978_v22 }
  0x83   :  { %5372 = vmatpush3.bf16.msra.mxu0 %v5979_v23  ;;  %v5991_v23 = vld [vmem:[%s7645_s3 + $0xd0] sm:$0xff]  }
  0x84   :  { %5373 = vmatprep.subr.bf16.mxu0 %v5980_v24  ;;  %v5992_v24 = vld [vmem:[%s7645_s3 + $0x118] sm:$0xff]  }
  0x85   :  { %5806 = vmatpush3.bf16.msra.mxu1 %v5978_v22  ;;  %v5990_v22 = vld [vmem:[%s7645_s3 + $0x150] sm:$0xff]  }
  0x86   :  { %5807 = vmatprep.subr.bf16.mxu1 %v5981_v25 }
  0x87   :  { %5374 = vmatpush3.bf16.msra.mxu0 %v5982_v26  ;;  %v5994_v26 = vld [vmem:[%s7645_s3 + $0xd8] sm:$0xff]  }
  0x88   :  { %5397 = vmatprep.subr.bf16.mxu0 %v5983_v27  ;;  %v5995_v27 = vld [vmem:[%s7645_s3 + $0x120] sm:$0xff]  }
  0x89   :  { %5808 = vmatpush3.bf16.msra.mxu1 %v5981_v25  ;;  %v5993_v25 = vld [vmem:[%s7645_s3 + $0x158] sm:$0xff]  }
  0x8a   :  { %5813 = vmatprep.subr.bf16.mxu1 %v5984_v28 }
 0x13d   :  { %v5337_v29 = vpop.f32.mrb[0].mxu0 }
 0x13e   :  { %v5338_v30 = vpop.f32.mrb[1].mxu0 }
 0x13f   :  { %v5339_v32 = vadd.f32 %v5338_v30, %v5337_v29  ;;  %v5340_v33 = vpop.f32.mrb[2].mxu0  ;;  %v5791_v35 = vpop.f32.mrb[0].mxu1  ;;  %v5997_v29 = vld [vmem:[%s7645_s3 + $0xe0] sm:$0xff]   ;;  %v5998_v30 = vld [vmem:[%s7645_s3 + $0x128] sm:$0xff]  }
 0x140   :  { %v5341_v34 = vpop.f32.mrb[3].mxu0  ;;  %v470_v38 = vpop.f32.mrb[1].mxu1 }
 0x141   :  { %v5342_v36 = vadd.f32 %v5341_v34, %v5340_v33  ;;  %v422_v37 = vadd.f32 %v5339_v32, %v4554_v31  ;;  %v5792_v39 = vpop.f32.mrb[2].mxu1  ;;  %v6000_v32 = vld [vmem:[%s7645_s3 + $0xe8] sm:$0xff]   ;;  %v6001_v33 = vld [vmem:[%s7645_s3 + $0x130] sm:$0xff]  }
 0x142   :  { %v473_v42 = vpop.f32.mrb[3].mxu1  ;;  %v6002_v34 = vld [vmem:[%s7645_s3 + $0x170] sm:$0xff]  }
 0x143   :  { %v6737_v40 = vadd.f32 %v470_v38, %v422_v37  ;;  %v425_v41 = vadd.f32 %v5342_v36, %v4554_v31  ;;  %v6004_v36 = vld [vmem:[%s7645_s3 + $0x138] sm:$0xff]  }
 0x144   :  { %v6005_v37 = vld [vmem:[%s7645_s3 + $0x178] sm:$0xff]  }
 0x145   :  { %v6739_v43 = vadd.f32 %v473_v42, %v425_v41  ;;  %v5343_v44 = vpop.f32.mrb[4].mxu0  ;;  %v546_v60 = vrot.slane %v6737_v40, 1  ;;  %v534_v62 = vrot.slane %v6737_v40, 7  ;;  %v6006_v38 = vld [vmem:[%s7645_s3 + $0xf8] sm:$0xff]   ;;  %v6008_v41 = vld [vmem:[%s7645_s3 + $0x200] sm:$0xff]  }
 0x146   :  { %v5344_v45 = vpop.f32.mrb[5].mxu0 }
 0x147   :  { %v5345_v46 = vadd.f32 %v5344_v45, %v5343_v44  ;;  %v5346_v47 = vpop.f32.mrb[6].mxu0  ;;  %v559_v48 = vpack.c.bf16 %v6739_v43, %v6737_v40  ;;  %v547_v57 = vrot.slane %v6739_v43, 1  ;;  %v535_v58 = vrot.slane %v6739_v43, 7 }
 0x148   :  { %v5347_v49 = vpop.f32.mrb[7].mxu0 }
 0x149   :  { %v430_v51 = vadd.f32 %v5345_v46, %v4554_v31  ;;  %v5348_v52 = vadd.f32 %v5347_v49, %v5346_v47  ;;  %746 = vmatprep.mubr.bf16.mxu0 %v559_v48  ;;  %v552_v3 = vsel %vm222_vm1, %v546_v60, %v547_v57  ;;  %v540_v5 = vsel %vm209_vm0, %v534_v62, %v535_v58  ;;  %v4595_v46 = vld [vmem:[%s7646_s4] ss:$0 sm:$0xff] }
 0x14b   :  { %v6743_v54 = vadd.f32 %v5791_v35, %v430_v51  ;;  %v433_v55 = vadd.f32 %v5348_v52, %v4554_v31  ;;  %v5999_v31 = vld [vmem:[%s7645_s3 + $0x168] sm:$0xff]   ;;  %v6003_v35 = vld [vmem:[%s7645_s3 + $0xf0] sm:$0xff]  }
 0x14d   :  { %v6747_v59 = vadd.f32 %v5792_v39, %v433_v55  ;;  %v548_v61 = vrot.slane %v6743_v54, 1  ;;  %v536_v16 = vrot.slane %v6743_v54, 7  ;;  %v6007_v39 = vld [vmem:[%s7645_s3 + $0x1c0] sm:$0xff]  }
 0x14f   :  { %v537_v0 = vrot.slane %v6747_v59, 7  ;;  %v549_v1 = vrot.slane %v6747_v59, 1  ;;  %v551_v2 = vsel %vm222_vm1, %v547_v57, %v548_v61  ;;  %v562_v14 = vpack.c.bf16 %v6747_v59, %v6743_v54 }
 0x150   :  { %v4630_v4 = vpack.c.bf16 %v551_v2, %v552_v3  ;;  %v539_v19 = vsel %vm209_vm0, %v535_v58, %v536_v16 }
 0x151   :  { %v541_v6 = vsel %vm209_vm0, %v537_v0, %v534_v62  ;;  %v550_v7 = vsel %vm222_vm1, %v548_v61, %v549_v1  ;;  %v553_v8 = vsel %vm222_vm1, %v549_v1, %v546_v60  ;;  %v538_v18 = vsel %vm209_vm0, %v536_v16, %v537_v0 }
 0x152   :  { %5809 = vmatprep.mubr.msk.bf16.mxu1 %vm6624_vm7, %v4630_v4  ;;  %v4622_v10 = vpack.c.bf16 %v540_v5, %v541_v6  ;;  %v4634_v11 = vpack.c.bf16 %v553_v8, %v550_v7  ;;  %v4626_v20 = vpack.c.bf16 %v538_v18, %v539_v19 }
 0x154   :  { %4623 = vmatmul.mubr.msk.bf16.vlgmr.msra.gmra.mrb[8].mxu0 %vm6615_vm6, %v4622_v10  ;;  %5810 = vmatmul.mubr.msk.bf16.vlgmr.msra.gmra.mrb[4].mxu1 %vm6634_vm9, %v4634_v11 }
 0x155   :  { %754 = vmatprep.mubr.bf16.mxu0 %v562_v14  ;;  %5398 = vmatpush3.bf16.msra.mxu0 %v5985_v9 }
 0x156   :  { %5814 = vmatpush3.bf16.msra.mxu1 %v5984_v28  ;;  %5399 = vmatprep.subr.bf16.mxu0 %v5986_v12  ;;  %v5996_v28 = vld [vmem:[%s7645_s3 + $0x160] sm:$0xff]  }
 0x157   :  { %5815 = vmatprep.subr.bf16.mxu1 %v5987_v15 }
 0x159   :  { %5400 = vmatpush3.bf16.msra.mxu0 %v5988_v17 }
 0x15a   :  { %5816 = vmatpush3.bf16.msra.mxu1 %v5987_v15  ;;  %5401 = vmatprep.subr.bf16.mxu0 %v5989_v21 }
 0x15b   :  { %5817 = vmatprep.subr.bf16.mxu1 %v5990_v22 }
 0x15c   :  { %4627 = vmatmul.mubr.msk.bf16.gmra.mrb[12].mxu0 %vm6646_vm10, %v4626_v20 }
 0x15d   :  { %5402 = vmatpush3.bf16.msra.mxu0 %v5991_v23 }
 0x15e   :  { %5818 = vmatpush3.bf16.msra.mxu1 %v5990_v22  ;;  %5403 = vmatprep.subr.bf16.mxu0 %v5992_v24 }
 0x15f   :  { %5819 = vmatprep.subr.bf16.mxu1 %v5993_v25 }
 0x161   :  { %5404 = vmatpush3.bf16.msra.mxu0 %v5994_v26 }
 0x162   :  { %5820 = vmatpush3.bf16.msra.mxu1 %v5993_v25  ;;  %5405 = vmatprep.subr.bf16.mxu0 %v5995_v27 }
 0x163   :  { %5821 = vmatprep.subr.bf16.mxu1 %v5996_v28 }
 0x165   :  { %5406 = vmatpush3.bf16.msra.mxu0 %v5997_v29 }
 0x166   :  { %5822 = vmatpush3.bf16.msra.mxu1 %v5996_v28  ;;  %5407 = vmatprep.subr.bf16.mxu0 %v5998_v30 }
 0x167   :  { %5823 = vmatprep.subr.bf16.mxu1 %v5999_v31 }
 0x169   :  { %5408 = vmatpush3.bf16.msra.mxu0 %v6000_v32 }
 0x16a   :  { %5824 = vmatpush3.bf16.msra.mxu1 %v5999_v31  ;;  %5409 = vmatprep.subr.bf16.mxu0 %v6001_v33 }
 0x16b   :  { %5825 = vmatprep.subr.bf16.mxu1 %v6002_v34 }
 0x16d   :  { %5410 = vmatpush3.bf16.msra.mxu0 %v6003_v35 }
 0x16e   :  { %5826 = vmatpush3.bf16.msra.mxu1 %v6002_v34  ;;  %5411 = vmatprep.subr.bf16.mxu0 %v6004_v36  ;;  %v6009_v34 = vld [vmem:[%s7645_s3 + $0x180] sm:$0xff]  }
 0x16f   :  { %5827 = vmatprep.subr.bf16.mxu1 %v6005_v37 }
 0x171   :  { %5412 = vmatpush3.bf16.msra.mxu0 %v6006_v38  ;;  %v6010_v38 = vld [vmem:[%s7645_s3 + $0x1c8] sm:$0xff]  }
 0x172   :  { %5828 = vmatpush3.bf16.msra.mxu1 %v6005_v37  ;;  %5435 = vmatprep.subr.bf16.mxu0 %v6007_v39  ;;  %v6011_v39 = vld [vmem:[%s7645_s3 + $0x208] sm:$0xff]  }
 0x173   :  { %5833 = vmatprep.subr.bf16.mxu1 %v6008_v41 }
 0x227   :  { %v5375_v42 = vpop.f32.mrb[8].mxu0  ;;  %v5811_v44 = vpop.f32.mrb[4].mxu1 }
 0x228   :  { %v5376_v45 = vpop.f32.mrb[9].mxu0  ;;  %v797_v47 = vpop.f32.mrb[5].mxu1 }
 0x229   :  { %v5377_v48 = vadd.f32 %v5376_v45, %v5375_v42  ;;  %v5378_v49 = vpop.f32.mrb[10].mxu0  ;;  %v5812_v51 = vpop.f32.mrb[6].mxu1  ;;  %v6012_v42 = vld [vmem:[%s7645_s3 + $0x188] sm:$0xff]   ;;  %v6014_v45 = vld [vmem:[%s7645_s3 + $0x210] sm:$0xff]  }
 0x22a   :  { %v5379_v52 = vpop.f32.mrb[11].mxu0  ;;  %v800_v55 = vpop.f32.mrb[7].mxu1 }
 0x22b   :  { %v749_v57 = vadd.f32 %v5377_v48, %v4595_v46  ;;  %v5380_v58 = vadd.f32 %v5379_v52, %v5378_v49  ;;  %v6018_v48 = vld [vmem:[%s7645_s3 + $0x198] sm:$0xff]   ;;  %v6019_v49 = vld [vmem:[%s7645_s3 + $0x1e0] sm:$0xff]  }
 0x22c   :  { %v6021_v52 = vld [vmem:[%s7645_s3 + $0x1a0] sm:$0xff]  }
 0x22d   :  { %v798_v60 = vadd.f32 %v797_v47, %v749_v57  ;;  %v752_v61 = vadd.f32 %v5380_v58, %v4595_v46  ;;  %v6017_v47 = vld [vmem:[%s7645_s3 + $0x218] sm:$0xff]   ;;  %v6023_v57 = vld [vmem:[%s7645_s3 + $0x228] sm:$0xff]  }
 0x22e   :  { %v6024_v58 = vld [vmem:[%s7645_s3 + $0x1a8] sm:$0xff]  }
 0x22f   :  { %v812_v62 = vmax.f32 %v798_v60, 0.0  ;;  %v801_v0 = vadd.f32 %v800_v55, %v752_v61  ;;  %v5381_v1 = vpop.f32.mrb[12].mxu0  ;;  %v6022_v55 = vld [vmem:[%s7645_s3 + $0x1e8] sm:$0xff]   ;;  %v6025_v60 = vld [vmem:[%s7645_s3 + $0x1f0] sm:$0xff]  }
 0x230   :  { %v5382_v2 = vpop.f32.mrb[13].mxu0  ;;  %v6026_v61 = vld [vmem:[%s7645_s3 + $0x230] sm:$0xff]  }
 0x231   :  { %v813_v3 = vmax.f32 %v801_v0, 0.0  ;;  %v5383_v4 = vadd.f32 %v5382_v2, %v5381_v1  ;;  %v5384_v5 = vpop.f32.mrb[14].mxu0  ;;  %v867_v6 = vrot.slane %v812_v62, 7  ;;  %v879_v7 = vrot.slane %v812_v62, 1  ;;  %v6028_v0 = vld [vmem:[%s7645_s3 + $0x1f8] sm:$0xff]  }
 0x232   :  { %v5385_v8 = vpop.f32.mrb[15].mxu0  ;;  %v6029_v1 = vld [vmem:[%s7645_s3 + $0x238] sm:$0xff]  }
 0x233   :  { %v868_v9 = vrot.slane %v813_v3, 7  ;;  %v880_v10 = vrot.slane %v813_v3, 1  ;;  %v757_v11 = vadd.f32 %v5383_v4, %v4595_v46  ;;  %v5386_v12 = vadd.f32 %v5385_v8, %v5384_v5  ;;  %v6030_v2 = vld [vmem:[%s7645_s3 + $0x1b8] sm:$0xff]   ;;  %v6952_v4 = vld [vmem:[%s7645_s3 + $0x2c0] sm:$0xff]  }
 0x234   :  { %v892_v14 = vpack.c.bf16 %v813_v3, %v812_v62  ;;  %v6027_v62 = vld [vmem:[%s7645_s3 + $0x1b0] sm:$0xff]   ;;  %v6031_v3 = vld [vmem:[%s7645_s3 + $0x280] sm:$0xff]  }
 0x235   :  { %v873_v15 = vsel %vm209_vm0, %v867_v6, %v868_v9  ;;  %v806_v16 = vadd.f32 %v5811_v44, %v757_v11  ;;  %v760_v17 = vadd.f32 %v5386_v12, %v4595_v46  ;;  %v885_v18 = vsel %vm222_vm1, %v879_v7, %v880_v10  ;;  %v6013_v44 = vld [vmem:[%s7645_s3 + $0x1d0] sm:$0xff]   ;;  %v6016_v46 = vld [vmem:[%s7645_s3 + $0x1d8] sm:$0xff]   ;;  %v4685_v8 = vld [vmem:[%s7646_s4 + $0x1] ss:$0 sm:$0xff] }
 0x236   :  { %1079 = vmatprep.mubr.bf16.mxu0 %v892_v14 }
 0x237   :  { %v814_v19 = vmax.f32 %v806_v16, 0.0  ;;  %v809_v20 = vadd.f32 %v5812_v51, %v760_v17  ;;  %v6020_v51 = vld [vmem:[%s7645_s3 + $0x220] sm:$0xff]  }
 0x239   :  { %v869_v21 = vrot.slane %v814_v19, 7  ;;  %v881_v22 = vrot.slane %v814_v19, 1  ;;  %v815_v23 = vmax.f32 %v809_v20, 0.0 }
 0x23b   :  { %v870_v24 = vrot.slane %v815_v23, 7  ;;  %v882_v25 = vrot.slane %v815_v23, 1  ;;  %v884_v26 = vsel %vm222_vm1, %v880_v10, %v881_v22  ;;  %v895_v27 = vpack.c.bf16 %v815_v23, %v814_v19 }
 0x23c   :  { %v4720_v28 = vpack.c.bf16 %v884_v26, %v885_v18  ;;  %v872_v29 = vsel %vm209_vm0, %v868_v9, %v869_v21 }
 0x23d   :  { %v874_v30 = vsel %vm209_vm0, %v870_v24, %v867_v6  ;;  %v883_v31 = vsel %vm222_vm1, %v881_v22, %v882_v25  ;;  %v886_v32 = vsel %vm222_vm1, %v882_v25, %v879_v7  ;;  %v871_v33 = vsel %vm209_vm0, %v869_v21, %v870_v24 }
 0x23e   :  { %v4712_v35 = vpack.c.bf16 %v873_v15, %v874_v30  ;;  %5829 = vmatprep.mubr.msk.bf16.mxu1 %vm6624_vm7, %v4720_v28  ;;  %v4724_v36 = vpack.c.bf16 %v886_v32, %v883_v31  ;;  %v4716_v37 = vpack.c.bf16 %v871_v33, %v872_v29 }
 0x240   :  { %4713 = vmatmul.mubr.msk.bf16.vlgmr.msra.gmra.mrb[16].mxu0 %vm6615_vm6, %v4712_v35  ;;  %5830 = vmatmul.mubr.msk.bf16.vlgmr.msra.gmra.mrb[8].mxu1 %vm6634_vm9, %v4724_v36 }
 0x241   :  { %1087 = vmatprep.mubr.bf16.mxu0 %v895_v27  ;;  %5436 = vmatpush3.bf16.msra.mxu0 %v6009_v34 }
 0x242   :  { %5834 = vmatpush3.bf16.msra.mxu1 %v6008_v41  ;;  %5437 = vmatprep.subr.bf16.mxu0 %v6010_v38  ;;  %v6015_v41 = vld [vmem:[%s7645_s3 + $0x190] sm:$0xff]  }
 0x243   :  { %5835 = vmatprep.subr.bf16.mxu1 %v6011_v39 }
 0x245   :  { %5438 = vmatpush3.bf16.msra.mxu0 %v6012_v42 }
 0x246   :  { %5836 = vmatpush3.bf16.msra.mxu1 %v6011_v39  ;;  %5439 = vmatprep.subr.bf16.mxu0 %v6013_v44 }
 0x247   :  { %5837 = vmatprep.subr.bf16.mxu1 %v6014_v45 }
 0x248   :  { %4717 = vmatmul.mubr.msk.bf16.gmra.mrb[20].mxu0 %vm6646_vm10, %v4716_v37 }
 0x249   :  { %5440 = vmatpush3.bf16.msra.mxu0 %v6015_v41 }
 0x24a   :  { %5838 = vmatpush3.bf16.msra.mxu1 %v6014_v45  ;;  %5441 = vmatprep.subr.bf16.mxu0 %v6016_v46 }
 0x24b   :  { %5839 = vmatprep.subr.bf16.mxu1 %v6017_v47 }
 0x24d   :  { %5442 = vmatpush3.bf16.msra.mxu0 %v6018_v48 }
 0x24e   :  { %5840 = vmatpush3.bf16.msra.mxu1 %v6017_v47  ;;  %5443 = vmatprep.subr.bf16.mxu0 %v6019_v49 }
 0x24f   :  { %5841 = vmatprep.subr.bf16.mxu1 %v6020_v51 }
 0x251   :  { %5444 = vmatpush3.bf16.msra.mxu0 %v6021_v52 }
 0x252   :  { %5842 = vmatpush3.bf16.msra.mxu1 %v6020_v51  ;;  %5445 = vmatprep.subr.bf16.mxu0 %v6022_v55 }
 0x253   :  { %5843 = vmatprep.subr.bf16.mxu1 %v6023_v57 }
 0x255   :  { %5446 = vmatpush3.bf16.msra.mxu0 %v6024_v58 }
 0x256   :  { %5844 = vmatpush3.bf16.msra.mxu1 %v6023_v57  ;;  %5447 = vmatprep.subr.bf16.mxu0 %v6025_v60 }
 0x257   :  { %5845 = vmatprep.subr.bf16.mxu1 %v6026_v61 }
 0x259   :  { %5448 = vmatpush3.bf16.msra.mxu0 %v6027_v62 }
 0x25a   :  { %5846 = vmatpush3.bf16.msra.mxu1 %v6026_v61  ;;  %5449 = vmatprep.subr.bf16.mxu0 %v6028_v0  ;;  %v6033_v61 = vld [vmem:[%s7645_s3 + $0x240] sm:$0xff]  }
 0x25b   :  { %5847 = vmatprep.subr.bf16.mxu1 %v6029_v1 }
 0x25d   :  { %5450 = vmatpush3.bf16.msra.mxu0 %v6030_v2 }
 0x25e   :  { %5848 = vmatpush3.bf16.msra.mxu1 %v6029_v1  ;;  %5473 = vmatprep.subr.bf16.mxu0 %v6031_v3  ;;  %v6034_v1 = vld [vmem:[%s7645_s3 + $0x288] sm:$0xff]  }
 0x25f   :  { %5853 = vmatprep.subr.bf16.mxu1 %v6952_v4  ;;  %v6035_v3 = vld [vmem:[%s7645_s3 + $0x2c8] sm:$0xff]  }
 0x313   :  { %v5413_v5 = vpop.f32.mrb[16].mxu0  ;;  %v5831_v6 = vpop.f32.mrb[8].mxu1 }
 0x314   :  { %v5414_v7 = vpop.f32.mrb[17].mxu0  ;;  %v1130_v9 = vpop.f32.mrb[9].mxu1 }
 0x315   :  { %v5415_v10 = vadd.f32 %v5414_v7, %v5413_v5  ;;  %v5416_v11 = vpop.f32.mrb[18].mxu0  ;;  %v5832_v12 = vpop.f32.mrb[10].mxu1 }
 0x316   :  { %v5417_v14 = vpop.f32.mrb[19].mxu0  ;;  %v1133_v15 = vpop.f32.mrb[11].mxu1 }
 0x317   :  { %v1082_v16 = vadd.f32 %v5415_v10, %v4685_v8  ;;  %v5418_v17 = vadd.f32 %v5417_v14, %v5416_v11  ;;  %v6037_v10 = vld [vmem:[%s7645_s3 + $0x290] sm:$0xff]   ;;  %v6041_v14 = vld [vmem:[%s7645_s3 + $0x2d8] sm:$0xff]  }
 0x318   :  { %v6039_v11 = vld [vmem:[%s7645_s3 + $0x250] sm:$0xff]  }
 0x319   :  { %v1131_v18 = vadd.f32 %v1130_v9, %v1082_v16  ;;  %v1085_v19 = vadd.f32 %v5418_v17, %v4685_v8  ;;  %v6043_v16 = vld [vmem:[%s7645_s3 + $0x2a0] sm:$0xff]  }
 0x31a   :  { %v6044_v17 = vld [vmem:[%s7645_s3 + $0x2e0] sm:$0xff]  }
 0x31b   :  { %v1145_v20 = vmul.f32 0.1, %v1131_v18  ;;  %v1134_v21 = vadd.f32 %v1133_v15, %v1085_v19  ;;  %v5419_v22 = vpop.f32.mrb[20].mxu0  ;;  %v6042_v15 = vld [vmem:[%s7645_s3 + $0x258] sm:$0xff]   ;;  %v6045_v18 = vld [vmem:[%s7645_s3 + $0x260] sm:$0xff]   ;;  %v6046_v19 = vld [vmem:[%s7645_s3 + $0x2a8] sm:$0xff]  }
 0x31c   :  { %v5420_v23 = vpop.f32.mrb[21].mxu0 }
 0x31d   :  { %v1146_v24 = vmul.f32 0.1, %v1134_v21  ;;  %v5421_v25 = vadd.f32 %v5420_v23, %v5419_v22  ;;  %v5422_v26 = vpop.f32.mrb[22].mxu0  ;;  %v6959_v28 = vadd.f32 %v1145_v20, %v6737_v40  ;;  %v6047_v20 = vld [vmem:[%s7645_s3 + $0x2e8] sm:$0xff]   ;;  %v6049_v22 = vld [vmem:[%s7645_s3 + $0x2b0] sm:$0xff]  }
 0x31e   :  { %v5423_v27 = vpop.f32.mrb[23].mxu0  ;;  %v6048_v21 = vld [vmem:[%s7645_s3 + $0x268] sm:$0xff]   ;;  %v6050_v23 = vld [vmem:[%s7645_s3 + $0x2f0] sm:$0xff]  }
 0x31f   :  { %v6962_v29 = vadd.f32 %v1146_v24, %v6739_v43  ;;  %v1090_v30 = vadd.f32 %v5421_v25, %v4685_v8  ;;  %v5424_v31 = vadd.f32 %v5423_v27, %v5422_v26  ;;  %v1216_v42 = vrot.slane %v6959_v28, 1  ;;  %v6051_v24 = vld [vmem:[%s7645_s3 + $0x270] sm:$0xff]   ;;  %v6052_v25 = vld [vmem:[%s7645_s3 + $0x2b8] sm:$0xff]  }
 0x320   :  { %v1204_v48 = vrot.slane %v6959_v28, 7  ;;  %v6053_v26 = vld [vmem:[%s7645_s3 + $0x2f8] sm:$0xff]  }
 0x321   :  { %v1139_v32 = vadd.f32 %v5831_v6, %v1090_v30  ;;  %v1229_v33 = vpack.c.bf16 %v6962_v29, %v6959_v28  ;;  %v1093_v34 = vadd.f32 %v5424_v31, %v4685_v8  ;;  %v1217_v37 = vrot.slane %v6962_v29, 1  ;;  %v6036_v6 = vld [vmem:[%s7645_s3 + $0x248] sm:$0xff]   ;;  %v6054_v27 = vld [vmem:[%s7645_s3 + $0x278] sm:$0xff]   ;;  %v6055_v30 = vld [vmem:[%s7645_s3 + $0x340] sm:$0xff]  }
 0x322   :  { %v1205_v45 = vrot.slane %v6962_v29, 7  ;;  %v6056_v31 = vld [vmem:[%s7645_s3 + $0x380] sm:$0xff]  }
 0x323   :  { %v1147_v35 = vmul.f32 0.1, %v1139_v32  ;;  %1416 = vmatprep.mubr.bf16.mxu0 %v1229_v33  ;;  %v1142_v36 = vadd.f32 %v5832_v12, %v1093_v34  ;;  %v1222_v47 = vsel %vm222_vm1, %v1216_v42, %v1217_v37  ;;  %v6040_v12 = vld [vmem:[%s7645_s3 + $0x298] sm:$0xff]  }
 0x324   :  { %v1210_v55 = vsel %vm209_vm0, %v1204_v48, %v1205_v45 }
 0x325   :  { %v6968_v38 = vadd.f32 %v1147_v35, %v6743_v54  ;;  %v1148_v39 = vmul.f32 0.1, %v1142_v36  ;;  %v4775_v35 = vld [vmem:[%s7646_s4 + $0x2] ss:$0 sm:$0xff] }
 0x327   :  { %v1218_v44 = vrot.slane %v6968_v38, 1  ;;  %v6974_v41 = vadd.f32 %v1148_v39, %v6747_v59  ;;  %v1206_v5 = vrot.slane %v6968_v38, 7 }
 0x329   :  { %v1221_v46 = vsel %vm222_vm1, %v1217_v37, %v1218_v44  ;;  %v1207_v49 = vrot.slane %v6974_v41, 7  ;;  %v1219_v51 = vrot.slane %v6974_v41, 1  ;;  %v1232_v2 = vpack.c.bf16 %v6974_v41, %v6968_v38 }
 0x32a   :  { %v4810_v52 = vpack.c.bf16 %v1221_v46, %v1222_v47  ;;  %v1209_v8 = vsel %vm209_vm0, %v1205_v45, %v1206_v5 }
 0x32b   :  { %v1211_v57 = vsel %vm209_vm0, %v1207_v49, %v1204_v48  ;;  %v1220_v58 = vsel %vm222_vm1, %v1218_v44, %v1219_v51  ;;  %v1223_v60 = vsel %vm222_vm1, %v1219_v51, %v1216_v42  ;;  %v1208_v7 = vsel %vm209_vm0, %v1206_v5, %v1207_v49 }
 0x32c   :  { %5849 = vmatprep.mubr.msk.bf16.mxu1 %vm6624_vm7, %v4810_v52  ;;  %v4802_v62 = vpack.c.bf16 %v1210_v55, %v1211_v57  ;;  %v4814_v0 = vpack.c.bf16 %v1223_v60, %v1220_v58  ;;  %v4806_v9 = vpack.c.bf16 %v1208_v7, %v1209_v8 }
 0x32e   :  { %4803 = vmatmul.mubr.msk.bf16.vlgmr.msra.gmra.mrb[24].mxu0 %vm6615_vm6, %v4802_v62  ;;  %5850 = vmatmul.mubr.msk.bf16.vlgmr.msra.gmra.mrb[12].mxu1 %vm6634_vm9, %v4814_v0 }
 0x32f   :  { %1424 = vmatprep.mubr.bf16.mxu0 %v1232_v2  ;;  %5474 = vmatpush3.bf16.msra.mxu0 %v6033_v61 }
 0x330   :  { %5854 = vmatpush3.bf16.msra.mxu1 %v6952_v4  ;;  %5475 = vmatprep.subr.bf16.mxu0 %v6034_v1  ;;  %v6038_v4 = vld [vmem:[%s7645_s3 + $0x2d0] sm:$0xff]  }
 0x331   :  { %5855 = vmatprep.subr.bf16.mxu1 %v6035_v3 }
 0x333   :  { %5476 = vmatpush3.bf16.msra.mxu0 %v6036_v6 }
 0x334   :  { %5856 = vmatpush3.bf16.msra.mxu1 %v6035_v3  ;;  %5477 = vmatprep.subr.bf16.mxu0 %v6037_v10 }
 0x335   :  { %5857 = vmatprep.subr.bf16.mxu1 %v6038_v4 }
 0x336   :  { %4807 = vmatmul.mubr.msk.bf16.gmra.mrb[28].mxu0 %vm6646_vm10, %v4806_v9 }
 0x337   :  { %5478 = vmatpush3.bf16.msra.mxu0 %v6039_v11 }
 0x338   :  { %5858 = vmatpush3.bf16.msra.mxu1 %v6038_v4  ;;  %5479 = vmatprep.subr.bf16.mxu0 %v6040_v12 }
 0x339   :  { %5859 = vmatprep.subr.bf16.mxu1 %v6041_v14 }
 0x33b   :  { %5480 = vmatpush3.bf16.msra.mxu0 %v6042_v15 }
 0x33c   :  { %5860 = vmatpush3.bf16.msra.mxu1 %v6041_v14  ;;  %5481 = vmatprep.subr.bf16.mxu0 %v6043_v16 }
 0x33d   :  { %5861 = vmatprep.subr.bf16.mxu1 %v6044_v17 }
 0x33f   :  { %5482 = vmatpush3.bf16.msra.mxu0 %v6045_v18 }
 0x340   :  { %5862 = vmatpush3.bf16.msra.mxu1 %v6044_v17  ;;  %5483 = vmatprep.subr.bf16.mxu0 %v6046_v19 }
 0x341   :  { %5863 = vmatprep.subr.bf16.mxu1 %v6047_v20 }
 0x343   :  { %5484 = vmatpush3.bf16.msra.mxu0 %v6048_v21 }
 0x344   :  { %5864 = vmatpush3.bf16.msra.mxu1 %v6047_v20  ;;  %5485 = vmatprep.subr.bf16.mxu0 %v6049_v22 }
 0x345   :  { %5865 = vmatprep.subr.bf16.mxu1 %v6050_v23 }
 0x347   :  { %5486 = vmatpush3.bf16.msra.mxu0 %v6051_v24 }
 0x348   :  { %5866 = vmatpush3.bf16.msra.mxu1 %v6050_v23  ;;  %5487 = vmatprep.subr.bf16.mxu0 %v6052_v25 }
 0x349   :  { %5867 = vmatprep.subr.bf16.mxu1 %v6053_v26 }
 0x34b   :  { %5488 = vmatpush3.bf16.msra.mxu0 %v6054_v27  ;;  %v6057_v27 = vld [vmem:[%s7645_s3 + $0x300] sm:$0xff]  }
 0x34c   :  { %5868 = vmatpush3.bf16.msra.mxu1 %v6053_v26  ;;  %5511 = vmatprep.subr.bf16.mxu0 %v6055_v30 }
 0x34d   :  { %5873 = vmatprep.subr.bf16.mxu1 %v6056_v31 }
 0x401   :  { %v5451_v32 = vpop.f32.mrb[24].mxu0  ;;  %v5851_v33 = vpop.f32.mrb[12].mxu1 }
 0x402   :  { %v5452_v34 = vpop.f32.mrb[25].mxu0  ;;  %v1467_v36 = vpop.f32.mrb[13].mxu1 }
 0x403   :  { %v5453_v37 = vadd.f32 %v5452_v34, %v5451_v32  ;;  %v5454_v39 = vpop.f32.mrb[26].mxu0  ;;  %v5852_v42 = vpop.f32.mrb[14].mxu1  ;;  %v6058_v34 = vld [vmem:[%s7645_s3 + $0x348] sm:$0xff]  }
 0x404   :  { %v5455_v44 = vpop.f32.mrb[27].mxu0  ;;  %v1470_v45 = vpop.f32.mrb[15].mxu1 }
 0x405   :  { %v1419_v46 = vadd.f32 %v5453_v37, %v4775_v35  ;;  %v5456_v47 = vadd.f32 %v5455_v44, %v5454_v39  ;;  %v6061_v37 = vld [vmem:[%s7645_s3 + $0x350] sm:$0xff]   ;;  %v6065_v44 = vld [vmem:[%s7645_s3 + $0x398] sm:$0xff]  }
 0x406   :  { %v6062_v39 = vld [vmem:[%s7645_s3 + $0x390] sm:$0xff]  }
 0x407   :  { %v1468_v48 = vadd.f32 %v1467_v36, %v1419_v46  ;;  %v1422_v49 = vadd.f32 %v5456_v47, %v4775_v35  ;;  %v6060_v36 = vld [vmem:[%s7645_s3 + $0x308] sm:$0xff]   ;;  %v6067_v46 = vld [vmem:[%s7645_s3 + $0x360] sm:$0xff]  }
 0x408   :  { %v6068_v47 = vld [vmem:[%s7645_s3 + $0x3a0] sm:$0xff]  }
 0x409   :  { %v1482_v51 = vmax.f32 %v1468_v48, 0.0  ;;  %v1471_v52 = vadd.f32 %v1470_v45, %v1422_v49  ;;  %v5457_v55 = vpop.f32.mrb[28].mxu0  ;;  %v6066_v45 = vld [vmem:[%s7645_s3 + $0x318] sm:$0xff]   ;;  %v6069_v48 = vld [vmem:[%s7645_s3 + $0x320] sm:$0xff]   ;;  %v6070_v49 = vld [vmem:[%s7645_s3 + $0x368] sm:$0xff]  }
 0x40a   :  { %v5458_v57 = vpop.f32.mrb[29].mxu0 }
 0x40b   :  { %v1483_v58 = vmax.f32 %v1471_v52, 0.0  ;;  %v5459_v60 = vadd.f32 %v5458_v57, %v5457_v55  ;;  %v5460_v61 = vpop.f32.mrb[30].mxu0  ;;  %v1537_v62 = vrot.slane %v1482_v51, 7  ;;  %v1549_v0 = vrot.slane %v1482_v51, 1  ;;  %v6072_v52 = vld [vmem:[%s7645_s3 + $0x328] sm:$0xff]   ;;  %v6073_v55 = vld [vmem:[%s7645_s3 + $0x370] sm:$0xff]  }
 0x40c   :  { %v5461_v1 = vpop.f32.mrb[31].mxu0  ;;  %v6074_v57 = vld [vmem:[%s7645_s3 + $0x3b0] sm:$0xff]  }
 0x40d   :  { %v1538_v2 = vrot.slane %v1483_v58, 7  ;;  %v1550_v3 = vrot.slane %v1483_v58, 1  ;;  %v1427_v5 = vadd.f32 %v5459_v60, %v4775_v35  ;;  %v5462_v6 = vadd.f32 %v5461_v1, %v5460_v61  ;;  %v6076_v60 = vld [vmem:[%s7645_s3 + $0x378] sm:$0xff]  }
 0x40e   :  { %v1562_v7 = vpack.c.bf16 %v1483_v58, %v1482_v51  ;;  %v6071_v51 = vld [vmem:[%s7645_s3 + $0x3a8] sm:$0xff]   ;;  %v6075_v58 = vld [vmem:[%s7645_s3 + $0x330] sm:$0xff]   ;;  %v6077_v61 = vld [vmem:[%s7645_s3 + $0x3b8] sm:$0xff]  }
 0x40f   :  { %v1543_v8 = vsel %vm209_vm0, %v1537_v62, %v1538_v2  ;;  %v1476_v9 = vadd.f32 %v5851_v33, %v1427_v5  ;;  %v1430_v10 = vadd.f32 %v5462_v6, %v4775_v35  ;;  %v1555_v4 = vsel %vm222_vm1, %v1549_v0, %v1550_v3  ;;  %v6059_v35 = vld [vmem:[%s7645_s3 + $0x388] sm:$0xff]   ;;  %v4865_v6 = vld [vmem:[%s7646_s4 + $0x3] ss:$0 sm:$0xff] }
 0x410   :  { %1749 = vmatprep.mubr.bf16.mxu0 %v1562_v7  ;;  %v6084_v1 = vld [vmem:[#allocation4 + $0xc] ss:$16 sps:$4 sm:$0xff]  }
 0x411   :  { %v1484_v11 = vmax.f32 %v1476_v9, 0.0  ;;  %v1479_v12 = vadd.f32 %v5852_v42, %v1430_v10  ;;  %v6064_v42 = vld [vmem:[%s7645_s3 + $0x358] sm:$0xff]  }
 0x413   :  { %v1539_v14 = vrot.slane %v1484_v11, 7  ;;  %v1551_v15 = vrot.slane %v1484_v11, 1  ;;  %v1485_v16 = vmax.f32 %v1479_v12, 0.0 }
 0x415   :  { %v1540_v17 = vrot.slane %v1485_v16, 7  ;;  %v1552_v18 = vrot.slane %v1485_v16, 1  ;;  %v1554_v19 = vsel %vm222_vm1, %v1550_v3, %v1551_v15  ;;  %v1565_v20 = vpack.c.bf16 %v1485_v16, %v1484_v11 }
 0x416   :  { %v4900_v21 = vpack.c.bf16 %v1554_v19, %v1555_v4  ;;  %v1542_v22 = vsel %vm209_vm0, %v1538_v2, %v1539_v14 }
 0x417   :  { %v1544_v23 = vsel %vm209_vm0, %v1540_v17, %v1537_v62  ;;  %v1553_v24 = vsel %vm222_vm1, %v1551_v15, %v1552_v18  ;;  %v1556_v25 = vsel %vm222_vm1, %v1552_v18, %v1549_v0  ;;  %v1541_v26 = vsel %vm209_vm0, %v1539_v14, %v1540_v17  ;;  %v6078_v62 = vld [vmem:[%s7645_s3 + $0x338] sm:$0xff]   ;;  %v6081_v0 = vld [vmem:[#allocation4 + $0x4] ss:$16 sps:$4 sm:$0xff]  }
 0x418   :  { %v4892_v30 = vpack.c.bf16 %v1543_v8, %v1544_v23  ;;  %5869 = vmatprep.mubr.msk.bf16.mxu1 %vm6624_vm7, %v4900_v21  ;;  %v4904_v32 = vpack.c.bf16 %v1556_v25, %v1553_v24  ;;  %v4896_v33 = vpack.c.bf16 %v1541_v26, %v1542_v22 }
 0x41a   :  { %4893 = vmatmul.mubr.msk.bf16.vlgmr.msra.gmra.mrb[32].mxu0 %vm6615_vm6, %v4892_v30  ;;  %5870 = vmatmul.mubr.msk.bf16.vlgmr.msra.gmra.mrb[16].mxu1 %vm6634_vm9, %v4904_v32 }
 0x41b   :  { %1757 = vmatprep.mubr.bf16.mxu0 %v1565_v20  ;;  %5512 = vmatpush3.bf16.msra.mxu0 %v6057_v27 }
 0x41c   :  { %5874 = vmatpush3.bf16.msra.mxu1 %v6056_v31  ;;  %5513 = vmatprep.subr.bf16.mxu0 %v6058_v34  ;;  %v6063_v31 = vld [vmem:[%s7645_s3 + $0x310] sm:$0xff]  }
 0x41d   :  { %5875 = vmatprep.subr.bf16.mxu1 %v6059_v35 }
 0x41f   :  { %5514 = vmatpush3.bf16.msra.mxu0 %v6060_v36 }
 0x420   :  { %5876 = vmatpush3.bf16.msra.mxu1 %v6059_v35  ;;  %5515 = vmatprep.subr.bf16.mxu0 %v6061_v37 }
 0x421   :  { %5877 = vmatprep.subr.bf16.mxu1 %v6062_v39 }
 0x422   :  { %4897 = vmatmul.mubr.msk.bf16.gmra.mrb[36].mxu0 %vm6646_vm10, %v4896_v33 }
 0x423   :  { %5516 = vmatpush3.bf16.msra.mxu0 %v6063_v31 }
 0x424   :  { %5878 = vmatpush3.bf16.msra.mxu1 %v6062_v39  ;;  %5517 = vmatprep.subr.bf16.mxu0 %v6064_v42 }
 0x425   :  { %5879 = vmatprep.subr.bf16.mxu1 %v6065_v44 }
 0x427   :  { %5518 = vmatpush3.bf16.msra.mxu0 %v6066_v45 }
 0x428   :  { %5880 = vmatpush3.bf16.msra.mxu1 %v6065_v44  ;;  %5519 = vmatprep.subr.bf16.mxu0 %v6067_v46 }
 0x429   :  { %5881 = vmatprep.subr.bf16.mxu1 %v6068_v47 }
 0x42b   :  { %5520 = vmatpush3.bf16.msra.mxu0 %v6069_v48 }
 0x42c   :  { %5882 = vmatpush3.bf16.msra.mxu1 %v6068_v47  ;;  %5521 = vmatprep.subr.bf16.mxu0 %v6070_v49 }
 0x42d   :  { %5883 = vmatprep.subr.bf16.mxu1 %v6071_v51 }
 0x42f   :  { %5522 = vmatpush3.bf16.msra.mxu0 %v6072_v52 }
 0x430   :  { %5884 = vmatpush3.bf16.msra.mxu1 %v6071_v51  ;;  %5523 = vmatprep.subr.bf16.mxu0 %v6073_v55 }
 0x431   :  { %5885 = vmatprep.subr.bf16.mxu1 %v6074_v57 }
 0x433   :  { %5524 = vmatpush3.bf16.msra.mxu0 %v6075_v58 }
 0x434   :  { %5886 = vmatpush3.bf16.msra.mxu1 %v6074_v57  ;;  %5525 = vmatprep.subr.bf16.mxu0 %v6076_v60 }
 0x435   :  { %5887 = vmatprep.subr.bf16.mxu1 %v6077_v61 }
 0x437   :  { %5526 = vmatpush3.bf16.msra.mxu0 %v6078_v62  ;;  %v6079_v62 = vld [vmem:[#allocation4] ss:$16 sps:$4 sm:$0xff]  }
 0x438   :  { %5888 = vmatpush3.bf16.msra.mxu1 %v6077_v61  ;;  %2784 = vmatprep.subr.bf16.mxu0 %v6081_v0 }
 0x439   :  { %2890 = vmatprep.subr.bf16.mxu1 %v6084_v1 }
 0x4ed   :  { %v5489_v2 = vpop.f32.mrb[32].mxu0  ;;  %v5871_v3 = vpop.f32.mrb[16].mxu1 }
 0x4ee   :  { %v5490_v5 = vpop.f32.mrb[33].mxu0  ;;  %v1800_v7 = vpop.f32.mrb[17].mxu1 }
 0x4ef   :  { %v5491_v8 = vadd.f32 %v5490_v5, %v5489_v2  ;;  %v5492_v9 = vpop.f32.mrb[34].mxu0  ;;  %v5872_v10 = vpop.f32.mrb[18].mxu1  ;;  %v6087_v5 = vld [vmem:[#allocation4 + $0x24] ss:$16 sps:$4 sm:$0xff]  }
 0x4f0   :  { %v5493_v4 = vpop.f32.mrb[35].mxu0  ;;  %v1803_v11 = vpop.f32.mrb[19].mxu1 }
 0x4f1   :  { %v1752_v12 = vadd.f32 %v5491_v8, %v4865_v6  ;;  %v5494_v14 = vadd.f32 %v5493_v4, %v5492_v9  ;;  %v6088_v8 = vld [vmem:[#allocation4 + $0x28] ss:$16 sps:$4 sm:$0xff]   ;;  %v6093_v9 = vld [vmem:[#allocation4 + $0x44] ss:$16 sps:$4 sm:$0xff]   ;;  %v6091_v4 = vld [vmem:[#allocation4 + $0x40] ss:$16 sps:$4 sm:$0xff]  }
 0x4f3   :  { %v1801_v15 = vadd.f32 %v1800_v7, %v1752_v12  ;;  %v1755_v16 = vadd.f32 %v5494_v14, %v4865_v6  ;;  %v6085_v7 = vld [vmem:[#allocation4 + $0x20] ss:$16 sps:$4 sm:$0xff]   ;;  %v6099_v12 = vld [vmem:[#allocation4 + $0x64] ss:$16 sps:$4 sm:$0xff]   ;;  %v6102_v14 = vld [vmem:[#allocation4 + $0x6c] ss:$16 sps:$4 sm:$0xff]  }
 0x4f5   :  { %v1815_v17 = vmul.f32 0.1, %v1801_v15  ;;  %v1804_v18 = vadd.f32 %v1803_v11, %v1755_v16  ;;  %v5495_v19 = vpop.f32.mrb[36].mxu0  ;;  %v6094_v11 = vld [vmem:[#allocation4 + $0x48] ss:$16 sps:$4 sm:$0xff]  }
 0x4f6   :  { %v5496_v20 = vpop.f32.mrb[37].mxu0  ;;  %v6097_v15 = vld [vmem:[#allocation4 + $0x60] ss:$16 sps:$4 sm:$0xff]   ;;  %v6100_v16 = vld [vmem:[#allocation4 + $0x68] ss:$16 sps:$4 sm:$0xff]  }
 0x4f7   :  { %v1819_v21 = vadd.f32 %v1815_v17, %v6959_v28  ;;  %v1816_v22 = vmul.f32 0.1, %v1804_v18  ;;  %v5497_v23 = vadd.f32 %v5496_v20, %v5495_v19  ;;  %v5498_v24 = vpop.f32.mrb[38].mxu0  ;;  %v6105_v17 = vld [vmem:[#allocation4 + $0x84] ss:$16 sps:$4 sm:$0xff]  }
 0x4f8   :  { %v5499_v25 = vpop.f32.mrb[39].mxu0  ;;  %v6108_v18 = vld [vmem:[#allocation4 + $0x8c] ss:$16 sps:$4 sm:$0xff]   ;;  %v6103_v19 = vld [vmem:[#allocation4 + $0x80] ss:$16 sps:$4 sm:$0xff]  }
 0x4f9   :  { %v1820_v26 = vadd.f32 %v1816_v22, %v6962_v29  ;;  %v1760_v27 = vadd.f32 %v5497_v23, %v4865_v6  ;;  %v1874_v30 = vrot.slane %v1819_v21, 7  ;;  %v1886_v32 = vrot.slane %v1819_v21, 1  ;;  %v6106_v20 = vld [vmem:[#allocation4 + $0x88] ss:$16 sps:$4 sm:$0xff]   ;;  %v6114_v22 = vld [vmem:[#allocation4 + $0xac] ss:$16 sps:$4 sm:$0xff]  }
 0x4fa   :  { %v5500_v33 = vadd.f32 %v5499_v25, %v5498_v24  ;;  %v6109_v23 = vld [vmem:[#allocation4 + $0xa0] ss:$16 sps:$4 sm:$0xff]   ;;  %v6112_v24 = vld [vmem:[#allocation4 + $0xa8] ss:$16 sps:$4 sm:$0xff]   ;;  %v6117_v25 = vld [vmem:[#allocation4 + $0xc4] ss:$16 sps:$4 sm:$0xff]  }
 0x4fb   :  { %v1875_v34 = vrot.slane %v1820_v26, 7  ;;  %v1887_v35 = vrot.slane %v1820_v26, 1  ;;  %v1809_v36 = vadd.f32 %v5871_v3, %v1760_v27  ;;  %v1899_v37 = vpack.c.bf16 %v1820_v26, %v1819_v21  ;;  %v6082_v3 = vld [vmem:[#allocation4 + $0x8] ss:$16 sps:$4 sm:$0xff]   ;;  %v6111_v21 = vld [vmem:[#allocation4 + $0xa4] ss:$16 sps:$4 sm:$0xff]  }
 0x4fc   :  { %v1763_v39 = vadd.f32 %v5500_v33, %v4865_v6  ;;  %v6090_v6 = vld [vmem:[#allocation4 + $0x2c] ss:$16 sps:$4 sm:$0xff]   ;;  %v6115_v27 = vld [vmem:[#allocation4 + $0xc0] ss:$16 sps:$4 sm:$0xff]  }
 0x4fd   :  { %v1880_v31 = vsel %vm209_vm0, %v1874_v30, %v1875_v34  ;;  %v1817_v42 = vmul.f32 0.1, %v1809_v36  ;;  %2086 = vmatprep.mubr.bf16.mxu0 %v1899_v37  ;;  %v1892_v28 = vsel %vm222_vm1, %v1886_v32, %v1887_v35  ;;  %v6120_v26 = vld [vmem:[#allocation4 + $0xcc] ss:$16 sps:$4 sm:$0xff]   ;;  %v6129_v36 = vld [vmem:[#allocation4 + $0x104] ss:$16 sps:$4 sm:$0xff]  }
 0x4fe   :  { %v1812_v44 = vadd.f32 %v5872_v10, %v1763_v39  ;;  %v6096_v10 = vld [vmem:[#allocation4 + $0x4c] ss:$16 sps:$4 sm:$0xff]   ;;  %v6127_v39 = vld [vmem:[#allocation4 + $0x100] ss:$16 sps:$4 sm:$0xff]  }
 0x4ff   :  { %v1821_v29 = vadd.f32 %v1817_v42, %v6968_v38  ;;  %v6126_v33 = vld [vmem:[#allocation4 + $0xec] ss:$16 sps:$4 sm:$0xff]   ;;  %v6135_v42 = vld [vmem:[#allocation4 + $0x124] ss:$16 sps:$4 sm:$0xff]  }
 0x500   :  { %v1818_v45 = vmul.f32 0.1, %v1812_v44  ;;  %v6132_v37 = vld [vmem:[#allocation4 + $0x10c] ss:$16 sps:$4 sm:$0xff]   ;;  %v6133_v44 = vld [vmem:[#allocation4 + $0x120] ss:$16 sps:$4 sm:$0xff]  }
 0x501   :  { %v1876_v46 = vrot.slane %v1821_v29, 7  ;;  %v1888_v47 = vrot.slane %v1821_v29, 1 }
 0x502   :  { %v1822_v48 = vadd.f32 %v1818_v45, %v6974_v41  ;;  %v6141_v45 = vld [vmem:[#allocation4 + $0x144] ss:$16 sps:$4 sm:$0xff]  }
 0x503   :  { %v1891_v49 = vsel %vm222_vm1, %v1887_v35, %v1888_v47  ;;  %v1879_v51 = vsel %vm209_vm0, %v1875_v34, %v1876_v46  ;;  %v6121_v34 = vld [vmem:[#allocation4 + $0xe0] ss:$16 sps:$4 sm:$0xff]   ;;  %v6124_v35 = vld [vmem:[#allocation4 + $0xe8] ss:$16 sps:$4 sm:$0xff]  }
 0x504   :  { %v1877_v52 = vrot.slane %v1822_v48, 7  ;;  %v1889_v55 = vrot.slane %v1822_v48, 1  ;;  %v4990_v57 = vpack.c.bf16 %v1891_v49, %v1892_v28  ;;  %v1902_v58 = vpack.c.bf16 %v1822_v48, %v1821_v29  ;;  %v6138_v28 = vld [vmem:[#allocation4 + $0x12c] ss:$16 sps:$4 sm:$0xff]   ;;  %v6136_v29 = vld [vmem:[#allocation4 + $0x128] ss:$16 sps:$4 sm:$0xff]  }
 0x505   :  { %v6142_v48 = vld [vmem:[#allocation4 + $0x148] ss:$16 sps:$4 sm:$0xff]   ;;  %v6147_v49 = vld [vmem:[#allocation4 + $0x164] ss:$16 sps:$4 sm:$0xff]  }
 0x506   :  { %v1881_v60 = vsel %vm209_vm0, %v1877_v52, %v1874_v30  ;;  %5889 = vmatprep.mubr.msk.bf16.mxu1 %vm6624_vm7, %v4990_v57  ;;  %v1890_v38 = vsel %vm222_vm1, %v1888_v47, %v1889_v55  ;;  %v1893_v41 = vsel %vm222_vm1, %v1889_v55, %v1886_v32  ;;  %v1878_v61 = vsel %vm209_vm0, %v1876_v46, %v1877_v52  ;;  %v6118_v30 = vld [vmem:[#allocation4 + $0xc8] ss:$16 sps:$4 sm:$0xff]   ;;  %v6123_v32 = vld [vmem:[#allocation4 + $0xe4] ss:$16 sps:$4 sm:$0xff]   ;;  %v6144_v46 = vld [vmem:[#allocation4 + $0x14c] ss:$16 sps:$4 sm:$0xff]  }
 0x507   :  { %v4982_v0 = vpack.c.bf16 %v1880_v31, %v1881_v60  ;;  %v4994_v1 = vpack.c.bf16 %v1893_v41, %v1890_v38  ;;  %v4986_v2 = vpack.c.bf16 %v1878_v61, %v1879_v51  ;;  %v6130_v31 = vld [vmem:[#allocation4 + $0x108] ss:$16 sps:$4 sm:$0xff]   ;;  %v6139_v47 = vld [vmem:[#allocation4 + $0x140] ss:$16 sps:$4 sm:$0xff]   ;;  %v6150_v51 = vld [vmem:[#allocation4 + $0x16c] ss:$16 sps:$4 sm:$0xff]  }
 0x508   :  { %v6145_v52 = vld [vmem:[#allocation4 + $0x160] ss:$16 sps:$4 sm:$0xff]   ;;  %v6148_v55 = vld [vmem:[#allocation4 + $0x168] ss:$16 sps:$4 sm:$0xff]   ;;  %v6153_v57 = vld [vmem:[#allocation4 + $0x184] ss:$16 sps:$4 sm:$0xff]  }
 0x509   :  { %4983 = vmatmul.mubr.msk.bf16.vlgmr.msra.gmra.mrb[40].mxu0 %vm6615_vm6, %v4982_v0  ;;  %5890 = vmatmul.mubr.msk.bf16.vlgmr.msra.gmra.mrb[20].mxu1 %vm6634_vm9, %v4994_v1  ;;  %v6151_v60 = vld [vmem:[#allocation4 + $0x180] ss:$16 sps:$4 sm:$0xff]   ;;  %v6154_v38 = vld [vmem:[#allocation4 + $0x188] ss:$16 sps:$4 sm:$0xff]   ;;  %v6159_v41 = vld [vmem:[#allocation4 + $0x1a4] ss:$16 sps:$4 sm:$0xff]  }
 0x50a   :  { %2094 = vmatprep.mubr.bf16.mxu0 %v1902_v58  ;;  %2785 = vmatpush1.bf16.msra.mxu0 %v6079_v62  ;;  %v6156_v58 = vld [vmem:[#allocation4 + $0x18c] ss:$16 sps:$4 sm:$0xff]   ;;  %v6157_v62 = vld [vmem:[#allocation4 + $0x1a0] ss:$16 sps:$4 sm:$0xff]   ;;  %v6160_v0 = vld [vmem:[#allocation4 + $0x1a8] ss:$16 sps:$4 sm:$0xff]  }
 0x50b   :  { %2891 = vmatpush1.bf16.msra.mxu1 %v6082_v3  ;;  %2786 = vmatprep.subr.bf16.mxu0 %v6087_v5  ;;  %v6162_v61 = vld [vmem:[#allocation4 + $0x1ac] ss:$16 sps:$4 sm:$0xff]   ;;  %v6165_v1 = vld [vmem:[#allocation4 + $0x1c4] ss:$16 sps:$4 sm:$0xff]   ;;  %v6163_v3 = vld [vmem:[#allocation4 + $0x1c0] ss:$16 sps:$4 sm:$0xff]  }
 0x50c   :  { %2892 = vmatprep.subr.bf16.mxu1 %v6090_v6  ;;  %v6166_v5 = vld [vmem:[#allocation4 + $0x1c8] ss:$16 sps:$4 sm:$0xff]   ;;  %v6171_v6 = vld [vmem:[#allocation4 + $0x1e4] ss:$16 sps:$4 sm:$0xff]  }
 0x50e   :  { %2787 = vmatpush1.bf16.msra.mxu0 %v6085_v7  ;;  %v6174_v7 = vld [vmem:[#allocation4 + $0x1ec] ss:$16 sps:$4 sm:$0xff]  }
 0x50f   :  { %2893 = vmatpush1.bf16.msra.mxu1 %v6088_v8  ;;  %2788 = vmatprep.subr.bf16.mxu0 %v6093_v9  ;;  %v6169_v8 = vld [vmem:[#allocation4 + $0x1e0] ss:$16 sps:$4 sm:$0xff]   ;;  %v6172_v9 = vld [vmem:[#allocation4 + $0x1e8] ss:$16 sps:$4 sm:$0xff]  }
 0x510   :  { %2894 = vmatprep.subr.bf16.mxu1 %v6096_v10  ;;  %v6177_v10 = vld [vmem:[#allocation4 + $0x204] ss:$16 sps:$4 sm:$0xff]  }
 0x511   :  { %4987 = vmatmul.mubr.msk.bf16.gmra.mrb[44].mxu0 %vm6646_vm10, %v4986_v2  ;;  %v6168_v2 = vld [vmem:[#allocation4 + $0x1cc] ss:$16 sps:$4 sm:$0xff]  }
 0x512   :  { %2789 = vmatpush1.bf16.msra.mxu0 %v6091_v4  ;;  %v6180_v4 = vld [vmem:[#allocation4 + $0x20c] ss:$16 sps:$4 sm:$0xff]  }
 0x513   :  { %2895 = vmatpush1.bf16.msra.mxu1 %v6094_v11  ;;  %2790 = vmatprep.subr.bf16.mxu0 %v6099_v12 }
 0x514   :  { %2896 = vmatprep.subr.bf16.mxu1 %v6102_v14 }
 0x516   :  { %2791 = vmatpush1.bf16.msra.mxu0 %v6097_v15  ;;  %v4955_v15 = vld [vmem:[%s7646_s4 + $0x4] ss:$0 sm:$0xff] }
 0x517   :  { %2897 = vmatpush1.bf16.msra.mxu1 %v6100_v16  ;;  %2792 = vmatprep.subr.bf16.mxu0 %v6105_v17 }
 0x518   :  { %2898 = vmatprep.subr.bf16.mxu1 %v6108_v18 }
 0x51a   :  { %2793 = vmatpush1.bf16.msra.mxu0 %v6103_v19 }
 0x51b   :  { %2899 = vmatpush1.bf16.msra.mxu1 %v6106_v20  ;;  %2794 = vmatprep.subr.bf16.mxu0 %v6111_v21 }
 0x51c   :  { %2900 = vmatprep.subr.bf16.mxu1 %v6114_v22 }
 0x51e   :  { %2795 = vmatpush1.bf16.msra.mxu0 %v6109_v23 }
 0x51f   :  { %2901 = vmatpush1.bf16.msra.mxu1 %v6112_v24  ;;  %2796 = vmatprep.subr.bf16.mxu0 %v6117_v25 }
 0x520   :  { %2902 = vmatprep.subr.bf16.mxu1 %v6120_v26 }
 0x522   :  { %2797 = vmatpush1.bf16.msra.mxu0 %v6115_v27 }
 0x523   :  { %2903 = vmatpush1.bf16.msra.mxu1 %v6118_v30  ;;  %2798 = vmatprep.subr.bf16.mxu0 %v6123_v32 }
 0x524   :  { %2904 = vmatprep.subr.bf16.mxu1 %v6126_v33 }
 0x526   :  { %2799 = vmatpush1.bf16.msra.mxu0 %v6121_v34 }
 0x527   :  { %2905 = vmatpush1.bf16.msra.mxu1 %v6124_v35  ;;  %2800 = vmatprep.subr.bf16.mxu0 %v6129_v36 }
 0x528   :  { %2906 = vmatprep.subr.bf16.mxu1 %v6132_v37 }
 0x52a   :  { %2801 = vmatpush1.bf16.msra.mxu0 %v6127_v39 }
 0x52b   :  { %2907 = vmatpush1.bf16.msra.mxu1 %v6130_v31  ;;  %2802 = vmatprep.subr.bf16.mxu0 %v6135_v42 }
 0x52c   :  { %2908 = vmatprep.subr.bf16.mxu1 %v6138_v28 }
 0x52e   :  { %2803 = vmatpush1.bf16.msra.mxu0 %v6133_v44 }
 0x52f   :  { %2909 = vmatpush1.bf16.msra.mxu1 %v6136_v29  ;;  %2804 = vmatprep.subr.bf16.mxu0 %v6141_v45 }
 0x530   :  { %2910 = vmatprep.subr.bf16.mxu1 %v6144_v46 }
 0x532   :  { %2805 = vmatpush1.bf16.msra.mxu0 %v6139_v47 }
 0x533   :  { %2911 = vmatpush1.bf16.msra.mxu1 %v6142_v48  ;;  %2806 = vmatprep.subr.bf16.mxu0 %v6147_v49 }
 0x534   :  { %2912 = vmatprep.subr.bf16.mxu1 %v6150_v51 }
 0x536   :  { %2807 = vmatpush1.bf16.msra.mxu0 %v6145_v52 }
 0x537   :  { %2913 = vmatpush1.bf16.msra.mxu1 %v6148_v55  ;;  %2808 = vmatprep.subr.bf16.mxu0 %v6153_v57 }
 0x538   :  { %2914 = vmatprep.subr.bf16.mxu1 %v6156_v58 }
 0x53a   :  { %2809 = vmatpush1.bf16.msra.mxu0 %v6151_v60 }
 0x53b   :  { %2915 = vmatpush1.bf16.msra.mxu1 %v6154_v38  ;;  %2810 = vmatprep.subr.bf16.mxu0 %v6159_v41 }
 0x53c   :  { %2916 = vmatprep.subr.bf16.mxu1 %v6162_v61 }
 0x53e   :  { %2811 = vmatpush1.bf16.msra.mxu0 %v6157_v62  ;;  %v6178_v62 = vld [vmem:[#allocation4 + $0x208] ss:$16 sps:$4 sm:$0xff]  }
 0x53f   :  { %2917 = vmatpush1.bf16.msra.mxu1 %v6160_v0  ;;  %2812 = vmatprep.subr.bf16.mxu0 %v6165_v1 }
 0x540   :  { %2918 = vmatprep.subr.bf16.mxu1 %v6168_v2 }
 0x542   :  { %2813 = vmatpush1.bf16.msra.mxu0 %v6163_v3 }
 0x543   :  { %2919 = vmatpush1.bf16.msra.mxu1 %v6166_v5  ;;  %2814 = vmatprep.subr.bf16.mxu0 %v6171_v6  ;;  %v6183_v6 = vld [vmem:[#allocation4 + $0x224] ss:$16 sps:$4 sm:$0xff]  }
 0x544   :  { %2920 = vmatprep.subr.bf16.mxu1 %v6174_v7  ;;  %v6186_v7 = vld [vmem:[#allocation4 + $0x22c] ss:$16 sps:$4 sm:$0xff]  }
 0x546   :  { %2815 = vmatpush1.bf16.msra.mxu0 %v6169_v8  ;;  %v6181_v8 = vld [vmem:[#allocation4 + $0x220] ss:$16 sps:$4 sm:$0xff]  }
 0x547   :  { %2921 = vmatpush1.bf16.msra.mxu1 %v6172_v9  ;;  %2837 = vmatprep.subr.bf16.mxu0 %v6177_v10  ;;  %v6184_v9 = vld [vmem:[#allocation4 + $0x228] ss:$16 sps:$4 sm:$0xff]   ;;  %v6189_v10 = vld [vmem:[#allocation4 + $0x244] ss:$16 sps:$4 sm:$0xff]  }
 0x548   :  { %2943 = vmatprep.subr.bf16.mxu1 %v6180_v4  ;;  %v6192_v4 = vld [vmem:[#allocation4 + $0x24c] ss:$16 sps:$4 sm:$0xff]  }
 0x5dc   :  { %v5527_v11 = vpop.f32.mrb[40].mxu0  ;;  %v5891_v12 = vpop.f32.mrb[20].mxu1 }
 0x5dd   :  { %v5528_v14 = vpop.f32.mrb[41].mxu0  ;;  %v2137_v16 = vpop.f32.mrb[21].mxu1 }
 0x5de   :  { %v5529_v17 = vadd.f32 %v5528_v14, %v5527_v11  ;;  %v5530_v18 = vpop.f32.mrb[42].mxu0  ;;  %v5892_v19 = vpop.f32.mrb[22].mxu1  ;;  %v6187_v11 = vld [vmem:[#allocation4 + $0x240] ss:$16 sps:$4 sm:$0xff]   ;;  %v6195_v14 = vld [vmem:[#allocation4 + $0x264] ss:$16 sps:$4 sm:$0xff]  }
 0x5df   :  { %v5531_v20 = vpop.f32.mrb[43].mxu0  ;;  %v2140_v21 = vpop.f32.mrb[23].mxu1 }
 0x5e0   :  { %v2089_v22 = vadd.f32 %v5529_v17, %v4955_v15  ;;  %v5532_v23 = vadd.f32 %v5531_v20, %v5530_v18  ;;  %v6196_v17 = vld [vmem:[#allocation4 + $0x268] ss:$16 sps:$4 sm:$0xff]   ;;  %v6201_v18 = vld [vmem:[#allocation4 + $0x284] ss:$16 sps:$4 sm:$0xff]   ;;  %v6454_v20 = vmov 0  }
 0x5e2   :  { %v2138_v24 = vadd.f32 %v2137_v16, %v2089_v22  ;;  %v2092_v25 = vadd.f32 %v5532_v23, %v4955_v15  ;;  %v6193_v16 = vld [vmem:[#allocation4 + $0x260] ss:$16 sps:$4 sm:$0xff]   ;;  %v6202_v22 = vld [vmem:[#allocation4 + $0x288] ss:$16 sps:$4 sm:$0xff]   ;;  %v6207_v23 = vld [vmem:[#allocation4 + $0x2a4] ss:$16 sps:$4 sm:$0xff]  }
 0x5e4   :  { %v2152_v26 = vadd.f32 %v2138_v24, %v6737_v40  ;;  %v2141_v27 = vadd.f32 %v2140_v21, %v2092_v25  ;;  %v5533_v30 = vpop.f32.mrb[44].mxu0  ;;  %v6199_v21 = vld [vmem:[#allocation4 + $0x280] ss:$16 sps:$4 sm:$0xff]   ;;  %v6210_v24 = vld [vmem:[#allocation4 + $0x2ac] ss:$16 sps:$4 sm:$0xff]  }
 0x5e5   :  { %v5534_v32 = vpop.f32.mrb[45].mxu0  ;;  %v6205_v25 = vld [vmem:[#allocation4 + $0x2a0] ss:$16 sps:$4 sm:$0xff]  }
 0x5e6   :  { %v2153_v33 = vadd.f32 %v2141_v27, %v6739_v43  ;;  %v5535_v34 = vadd.f32 %v5534_v32, %v5533_v30  ;;  %v5536_v35 = vpop.f32.mrb[46].mxu0  ;;  %v2253_v36 = vrot.slane %v2152_v26, 7  ;;  %v2265_v37 = vrot.slane %v2152_v26, 1  ;;  %v6213_v27 = vld [vmem:[#allocation4 + $0x2c4] ss:$16 sps:$4 sm:$0xff]  }
 0x5e7   :  { %v5537_v39 = vpop.f32.mrb[47].mxu0  ;;  %v6216_v30 = vld [vmem:[#allocation4 + $0x2cc] ss:$16 sps:$4 sm:$0xff]   ;;  %v6211_v32 = vld [vmem:[#allocation4 + $0x2c0] ss:$16 sps:$4 sm:$0xff]  }
 0x5e8   :  { %v2254_v31 = vrot.slane %v2153_v33, 7  ;;  %v2266_v42 = vrot.slane %v2153_v33, 1  ;;  %v2097_v28 = vadd.f32 %v5535_v34, %v4955_v15  ;;  %v5538_v44 = vadd.f32 %v5537_v39, %v5536_v35  ;;  %v6219_v34 = vld [vmem:[#allocation4 + $0x2e4] ss:$16 sps:$4 sm:$0xff]   ;;  %v6222_v35 = vld [vmem:[#allocation4 + $0x2ec] ss:$16 sps:$4 sm:$0xff]  }
 0x5e9   :  { %v2278_v29 = vpack.c.bf16 %v2153_v33, %v2152_v26  ;;  %v6208_v26 = vld [vmem:[#allocation4 + $0x2a8] ss:$16 sps:$4 sm:$0xff]   ;;  %v6223_v39 = vld [vmem:[#allocation6 + $0x40] sm:$0xff]  }
 0x5ea   :  { %v2259_v45 = vsel %vm209_vm0, %v2253_v36, %v2254_v31  ;;  %v2271_v40 = vsel %vm222_vm1, %v2265_v37, %v2266_v42  ;;  %v2146_v46 = vadd.f32 %v5891_v12, %v2097_v28  ;;  %v2100_v47 = vadd.f32 %v5538_v44, %v4955_v15  ;;  %v6190_v12 = vld [vmem:[#allocation4 + $0x248] ss:$16 sps:$4 sm:$0xff]   ;;  %v6198_v15 = vld [vmem:[#allocation4 + $0x26c] ss:$16 sps:$4 sm:$0xff]   ;;  %v6226_v28 = vld [vmem:[#allocation6 + $0x80] sm:$0xff]  }
 0x5eb   :  { %2816 = vmatprep.mubr.bf16.mxu0 %v2278_v29  ;;  %2922 = vmatprep.mubr.bf16.mxu1 %v2278_v29  ;;  %v6214_v33 = vld [vmem:[#allocation4 + $0x2c8] ss:$16 sps:$4 sm:$0xff]  }
 0x5ec   :  { %v2154_v43 = vadd.f32 %v2146_v46, %v6743_v54  ;;  %v2149_v48 = vadd.f32 %v5892_v19, %v2100_v47  ;;  %v6175_v54 = vld [vmem:[#allocation4 + $0x200] ss:$16 sps:$4 sm:$0xff]   ;;  %v6204_v19 = vld [vmem:[#allocation4 + $0x28c] ss:$16 sps:$4 sm:$0xff]  }
 0x5ed   :  { %v6227_v44 = vld [vmem:[#allocation6 + $0x48] sm:$0xff]   ;;  %v6231_v46 = vld [vmem:[#allocation6 + $0x50] sm:$0xff]  }
 0x5ee   :  { %v2255_v49 = vrot.slane %v2154_v43, 7  ;;  %v2267_v51 = vrot.slane %v2154_v43, 1  ;;  %v2155_v52 = vadd.f32 %v2149_v48, %v6747_v59  ;;  %v6228_v29 = vld [vmem:[#allocation6 + $0xc8] sm:$0xff]   ;;  %v6232_v47 = vld [vmem:[#allocation6 + $0xd0] sm:$0xff]  }
 0x5ef   :  { %v6234_v48 = vld [vmem:[#allocation6 + $0x90] sm:$0xff]  }
 0x5f0   :  { %v2270_v55 = vsel %vm222_vm1, %v2266_v42, %v2267_v51  ;;  %v2256_v57 = vrot.slane %v2155_v52, 7  ;;  %v2268_v58 = vrot.slane %v2155_v52, 1  ;;  %v2281_v60 = vpack.c.bf16 %v2155_v52, %v2154_v43  ;;  %v6225_v42 = vld [vmem:[#allocation6] sm:$0xff]   ;;  %v6233_v43 = vld [vmem:[#allocation6 + $0x10] sm:$0xff]   ;;  %v6237_v52 = vld [vmem:[#allocation6 + $0x18] sm:$0xff]  }
 0x5f1   :  { %v7216_v38 = vpack.c.bf16 %v2270_v55, %v2271_v40  ;;  %v2258_v41 = vsel %vm209_vm0, %v2254_v31, %v2255_v49  ;;  %v6224_v31 = vld [vmem:[#allocation6 + $0xc0] sm:$0xff]   ;;  %v6230_v40 = vld [vmem:[#allocation6 + $0x88] sm:$0xff]   ;;  %v6238_v55 = vld [vmem:[#allocation6 + $0x98] sm:$0xff]  }
 0x5f2   :  { %v2260_v61 = vsel %vm209_vm0, %v2256_v57, %v2253_v36  ;;  %v2257_v0 = vsel %vm209_vm0, %v2255_v49, %v2256_v57  ;;  %v2269_v59 = vsel %vm222_vm1, %v2267_v51, %v2268_v58  ;;  %v2272_v1 = vsel %vm222_vm1, %v2268_v58, %v2265_v37  ;;  %v6217_v36 = vld [vmem:[#allocation4 + $0x2e0] ss:$16 sps:$4 sm:$0xff]   ;;  %v6220_v37 = vld [vmem:[#allocation4 + $0x2e8] ss:$16 sps:$4 sm:$0xff]  }
 0x5f3   :  { %v5094_v2 = vpack.c.bf16 %v2259_v45, %v2260_v61  ;;  %v5098_v3 = vpack.c.bf16 %v2257_v0, %v2258_v41  ;;  %v7228_v5 = vpack.c.bf16 %v2272_v1, %v2269_v59  ;;  %v6229_v45 = vld [vmem:[#allocation6 + $0x8] sm:$0xff]   ;;  %v6235_v49 = vld [vmem:[#allocation6 + $0x58] sm:$0xff]   ;;  %v6239_v57 = vld [vmem:[#allocation6 + $0x60] sm:$0xff]  }
 0x5f4   :  { %v6236_v51 = vld [vmem:[#allocation6 + $0xd8] sm:$0xff]   ;;  %v6240_v58 = vld [vmem:[#allocation6 + $0xe0] sm:$0xff]   ;;  %v6243_v41 = vld [vmem:[#allocation6 + $0x68] sm:$0xff]  }
 0x5f5   :  { %5095 = vmatmul.mubr.msk.bf16.vlgmr.msra.gmra.mrb[48].mxu0 %vm6615_vm6, %v5094_v2  ;;  %5111 = vmatmul.mubr.msk.bf16.vlgmr.msra.gmra.mrb[24].mxu1 %vm6615_vm6, %v5094_v2  ;;  %v6244_v61 = vld [vmem:[#allocation6 + $0xe8] sm:$0xff]   ;;  %v6247_v0 = vld [vmem:[#allocation6 + $0x70] sm:$0xff]  }
 0x5f6   :  { %2838 = vmatpush1.bf16.msra.mxu0 %v6175_v54  ;;  %2944 = vmatpush1.bf16.msra.mxu1 %v6178_v62  ;;  %v6245_v54 = vld [vmem:[#allocation6 + $0x28] sm:$0xff]   ;;  %v6248_v59 = vld [vmem:[#allocation6 + $0xf0] sm:$0xff]  }
 0x5f7   :  { %2826 = vmatprep.mubr.bf16.mxu0 %v2281_v60  ;;  %2932 = vmatprep.mubr.bf16.mxu1 %v2281_v60  ;;  %v6241_v60 = vld [vmem:[#allocation6 + $0x20] sm:$0xff]   ;;  %v6246_v62 = vld [vmem:[#allocation6 + $0xa8] sm:$0xff]   ;;  %v6249_v1 = vld [vmem:[#allocation6 + $0x30] sm:$0xff]  }
 0x5f8   :  { %2839 = vmatprep.subr.bf16.mxu0 %v6183_v6  ;;  %2945 = vmatprep.subr.bf16.mxu1 %v6186_v7  ;;  %v6250_v2 = vld [vmem:[#allocation6 + $0xb0] sm:$0xff]   ;;  %v6253_v6 = vld [vmem:[#allocation6 + $0x38] sm:$0xff]  }
 0x5f9   :  { %v6254_v7 = vld [vmem:[#allocation6 + $0xb8] sm:$0xff]  }
 0x5fa   :  { %2840 = vmatpush1.bf16.msra.mxu0 %v6181_v8  ;;  %2946 = vmatpush1.bf16.msra.mxu1 %v6184_v9  ;;  %v6255_v8 = vld [vmem:[#allocation6 + $0x140] sm:$0xff]  }
 0x5fb   :  { %2841 = vmatprep.subr.bf16.mxu0 %v6189_v10  ;;  %2947 = vmatprep.subr.bf16.mxu1 %v6192_v4  ;;  %v6256_v9 = vld [vmem:[#allocation6 + $0x1c0] sm:$0xff]   ;;  %v2286_v10 = vsub.s32 0, %v6574_v13 }
 0x5fc   :  { %v2252_v4 = vld [vmem:[%s7648_s6] sm:$0xf] }
 0x5fd   :  { %5099 = vmatmul.mubr.msk.bf16.gmra.mrb[52].mxu0 %vm6646_vm10, %v5098_v3  ;;  %5115 = vmatmul.mubr.msk.bf16.gmra.mrb[28].mxu1 %vm6646_vm10, %v5098_v3  ;;  %v6251_v3 = vld [vmem:[#allocation6 + $0x78] sm:$0xff]  }
 0x5fe   :  { %2842 = vmatpush1.bf16.msra.mxu0 %v6187_v11  ;;  %2948 = vmatpush1.bf16.msra.mxu1 %v6190_v12  ;;  %v2294_v11 = vsub.s32 2, %v6574_v13  ;;  %v2290_v12 = vsub.s32 1, %v6574_v13 }
 0x5ff   :  { %2843 = vmatprep.subr.bf16.mxu0 %v6195_v14  ;;  %2949 = vmatprep.subr.bf16.mxu1 %v6198_v15  ;;  %v2298_v14 = vsub.s32 3, %v6574_v13  ;;  %v2287_v15 = vrot.slane %v2252_v4, %v2286_v10  ;;  %v6271_v13 = vld [vmem:[#allocation6 + $0x160] sm:$0xff]  }
 0x600   :  { %2869 = vmatprep.mubr.bf16.mxu0 %v6454_v20  ;;  %2975 = vmatprep.mubr.bf16.mxu1 %v6454_v20 }
 0x602   :  { %2844 = vmatpush1.bf16.msra.mxu0 %v6193_v16  ;;  %2950 = vmatpush1.bf16.msra.mxu1 %v6196_v17  ;;  %v2295_v16 = vrot.slane %v2252_v4, %v2294_v11  ;;  %v7257_v17 = vrot.slane %v2252_v4, %v2290_v12 }
 0x603   :  { %2845 = vmatprep.subr.bf16.mxu0 %v6201_v18  ;;  %2951 = vmatprep.subr.bf16.mxu1 %v6204_v19 }
 0x606   :  { %2846 = vmatpush1.bf16.msra.mxu0 %v6199_v21  ;;  %2952 = vmatpush1.bf16.msra.mxu1 %v6202_v22 }
 0x607   :  { %2847 = vmatprep.subr.bf16.mxu0 %v6207_v23  ;;  %2953 = vmatprep.subr.bf16.mxu1 %v6210_v24 }
 0x60a   :  { %2848 = vmatpush1.bf16.msra.mxu0 %v6205_v25  ;;  %2954 = vmatpush1.bf16.msra.mxu1 %v6208_v26 }
 0x60b   :  { %2849 = vmatprep.subr.bf16.mxu0 %v6213_v27  ;;  %2955 = vmatprep.subr.bf16.mxu1 %v6216_v30 }
 0x60e   :  { %2850 = vmatpush1.bf16.msra.mxu0 %v6211_v32  ;;  %2956 = vmatpush1.bf16.msra.mxu1 %v6214_v33 }
 0x60f   :  { %2851 = vmatprep.subr.bf16.mxu0 %v6219_v34  ;;  %2957 = vmatprep.subr.bf16.mxu1 %v6222_v35 }
 0x612   :  { %2852 = vmatpush1.bf16.msra.mxu0 %v6217_v36  ;;  %2958 = vmatpush1.bf16.msra.mxu1 %v6220_v37 }
 0x613   :  { %5549 = vmatprep.subr.bf16.mxu0 %v6223_v39  ;;  %5577 = vmatprep.subr.bf16.mxu1 %v6224_v31 }
 0x615   :  { %5103 = vmatmul.mubr.msk.bf16.vlgmr.msra.gmra.mrb[48].mxu0 %vm6624_vm7, %v7216_v38  ;;  %5119 = vmatmul.mubr.msk.bf16.vlgmr.msra.gmra.mrb[24].mxu1 %vm6624_vm7, %v7216_v38  ;;  %v6242_v38 = vld [vmem:[#allocation6 + $0xa0] sm:$0xff]  }
 0x616   :  { %2879 = vmatprep.mubr.bf16.mxu0 %v6454_v20  ;;  %2985 = vmatprep.mubr.bf16.mxu1 %v6454_v20  ;;  %v7259_v20 = vrot.slane %v2252_v4, %v2298_v14 }
 0x617   :  { %5550 = vmatpush3.bf16.msra.mxu0 %v6225_v42  ;;  %5578 = vmatpush3.bf16.msra.mxu1 %v6226_v28 }
 0x618   :  { %5551 = vmatprep.subr.bf16.mxu0 %v6227_v44  ;;  %5579 = vmatprep.subr.bf16.mxu1 %v6228_v29 }
 0x61b   :  { %5552 = vmatpush3.bf16.msra.mxu0 %v6229_v45  ;;  %5580 = vmatpush3.bf16.msra.mxu1 %v6230_v40 }
 0x61c   :  { %5553 = vmatprep.subr.bf16.mxu0 %v6231_v46  ;;  %5581 = vmatprep.subr.bf16.mxu1 %v6232_v47 }
 0x61d   :  { %5107 = vmatmul.mubr.msk.bf16.gmra.mrb[52].mxu0 %vm6634_vm9, %v7228_v5  ;;  %5123 = vmatmul.mubr.msk.bf16.gmra.mrb[28].mxu1 %vm6634_vm9, %v7228_v5  ;;  %v6252_v5 = vld [vmem:[#allocation6 + $0xf8] sm:$0xff]  }
 0x61f   :  { %5554 = vmatpush3.bf16.msra.mxu0 %v6233_v43  ;;  %5582 = vmatpush3.bf16.msra.mxu1 %v6234_v48 }
 0x620   :  { %5555 = vmatprep.subr.bf16.mxu0 %v6235_v49  ;;  %5583 = vmatprep.subr.bf16.mxu1 %v6236_v51 }
 0x623   :  { %5556 = vmatpush3.bf16.msra.mxu0 %v6237_v52  ;;  %5584 = vmatpush3.bf16.msra.mxu1 %v6238_v55 }
 0x624   :  { %5557 = vmatprep.subr.bf16.mxu0 %v6239_v57  ;;  %5585 = vmatprep.subr.bf16.mxu1 %v6240_v58 }
 0x627   :  { %5558 = vmatpush3.bf16.msra.mxu0 %v6241_v60  ;;  %5586 = vmatpush3.bf16.msra.mxu1 %v6242_v38 }
 0x628   :  { %5559 = vmatprep.subr.bf16.mxu0 %v6243_v41  ;;  %5587 = vmatprep.subr.bf16.mxu1 %v6244_v61 }
 0x62b   :  { %5560 = vmatpush3.bf16.msra.mxu0 %v6245_v54  ;;  %5588 = vmatpush3.bf16.msra.mxu1 %v6246_v62 }
 0x62c   :  { %5561 = vmatprep.subr.bf16.mxu0 %v6247_v0  ;;  %5589 = vmatprep.subr.bf16.mxu1 %v6248_v59 }
 0x62f   :  { %5562 = vmatpush3.bf16.msra.mxu0 %v6249_v1  ;;  %5590 = vmatpush3.bf16.msra.mxu1 %v6250_v2 }
 0x630   :  { %5563 = vmatprep.subr.bf16.mxu0 %v6251_v3  ;;  %5591 = vmatprep.subr.bf16.mxu1 %v6252_v5 }
 0x633   :  { %5564 = vmatpush3.bf16.msra.mxu0 %v6253_v6  ;;  %5592 = vmatpush3.bf16.msra.mxu1 %v6254_v7 }
 0x634   :  { %5605 = vmatprep.subr.bf16.mxu0 %v6255_v8  ;;  %5633 = vmatprep.subr.bf16.mxu1 %v6256_v9 }
 0x6e8   :  { %v2871_v18 = vpop.f32.mrb[48].mxu0  ;;  %v2977_v19 = vpop.f32.mrb[24].mxu1 }
 0x6e9   :  { %v7261_v21 = vadd.f32 %v2871_v18, %v2287_v15  ;;  %v2873_v22 = vpop.f32.mrb[49].mxu0  ;;  %v2979_v23 = vpop.f32.mrb[25].mxu1  ;;  %v7263_v24 = vadd.f32 %v2977_v19, %v2295_v16 }
 0x6ea   :  { %v7266_v25 = vadd.f32 %v2873_v22, %v7257_v17  ;;  %v2875_v26 = vpop.f32.mrb[50].mxu0  ;;  %v2981_v27 = vpop.f32.mrb[26].mxu1  ;;  %v7270_v34 = vadd.f32 %v2979_v23, %v7259_v20 }
 0x6eb   :  { %v2877_v30 = vpop.f32.mrb[51].mxu0  ;;  %v2983_v32 = vpop.f32.mrb[27].mxu1  ;;  %v3004_v33 = vrot.slane %v7261_v21, 7  ;;  %v3060_v35 = vrot.slane %v7261_v21, 1  ;;  %v7273_v36 = vadd.f32 %v2875_v26, %v2287_v15  ;;  %v7275_v37 = vadd.f32 %v2981_v27, %v2295_v16  ;;  %v6257_v27 = vld [vmem:[#allocation6 + $0x100] sm:$0xff]  }
 0x6ec   :  { %v7278_v39 = vadd.f32 %v2877_v30, %v7257_v17  ;;  %v3006_v31 = vrot.slane %v7263_v24, 7  ;;  %v7653_v42 = vrot.slane %v7263_v24, 1  ;;  %v3005_v28 = vrot.slane %v7266_v25, 7  ;;  %v6258_v26 = vld [vmem:[#allocation6 + $0x180] sm:$0xff]  }
 0x6ed   :  { %v3061_v44 = vrot.slane %v7266_v25, 1  ;;  %v7286_v29 = vpack.c.bf16 %v7273_v36, %v7261_v21  ;;  %v3008_v45 = vrot.slane %v7273_v36, 7  ;;  %v3064_v40 = vrot.slane %v7273_v36, 1 }
 0x6ee   :  { %v7292_v46 = vpack.c.bf16 %v7275_v37, %v7263_v24  ;;  %v3007_v47 = vrot.slane %v7270_v34, 7  ;;  %v3010_v43 = vrot.slane %v7275_v37, 7  ;;  %v3066_v48 = vrot.slane %v7275_v37, 1 }
 0x6ef   :  { %v7298_v49 = vadd.f32 %v2983_v32, %v7259_v20  ;;  %v3063_v55 = vrot.slane %v7270_v34, 1  ;;  %v7303_v57 = vsel %vm209_vm0, %v3004_v33, %v3008_v45  ;;  %v7309_v58 = vsel %vm222_vm1, %v3060_v35, %v3064_v40 }
 0x6f0   :  { %v2881_v51 = vpop.f32.mrb[52].mxu0  ;;  %v2987_v52 = vpop.f32.mrb[28].mxu1  ;;  %v3009_v60 = vrot.slane %v7278_v39, 7  ;;  %v7316_v61 = vsel %vm209_vm0, %v3006_v31, %v3010_v43  ;;  %v7322_v54 = vsel %vm222_vm1, %v7653_v42, %v3066_v48  ;;  %v3065_v9 = vrot.slane %v7278_v39, 1 }
 0x6f1   :  { %v2883_v38 = vpop.f32.mrb[53].mxu0  ;;  %v2989_v41 = vpop.f32.mrb[29].mxu1  ;;  %v7324_v62 = vadd.f32 %v2881_v51, %v2287_v15  ;;  %v7326_v0 = vadd.f32 %v2987_v52, %v2295_v16  ;;  %v3011_v10 = vrot.slane %v7298_v49, 7  ;;  %v3067_v12 = vrot.slane %v7298_v49, 1 }
 0x6f2   :  { %v2885_v59 = vpop.f32.mrb[54].mxu0  ;;  %v2991_v1 = vpop.f32.mrb[30].mxu1  ;;  %v7329_v2 = vadd.f32 %v2883_v38, %v7257_v17  ;;  %v7332_v3 = vadd.f32 %v2989_v41, %v7259_v20  ;;  %v3029_v51 = vsel %vm209_vm0, %v3005_v28, %v3009_v60  ;;  %v7429_v37 = vpack.c.bf16 %v7298_v49, %v7270_v34  ;;  %v6266_v34 = vld [vmem:[#allocation6 + $0x190] sm:$0xff]  }
 0x6f3   :  { %v7334_v5 = vadd.f32 %v2885_v59, %v2287_v15  ;;  %v7336_v6 = vadd.f32 %v2991_v1, %v2295_v16  ;;  %v2887_v7 = vpop.f32.mrb[55].mxu0  ;;  %v2993_v8 = vpop.f32.mrb[31].mxu1  ;;  %v3068_v4 = vrot.slane %v7324_v62, 1  ;;  %v3070_v11 = vrot.slane %v7326_v0, 1 }
 0x6f4   :  { %v3012_v14 = vrot.slane %v7324_v62, 7  ;;  %v3014_v18 = vrot.slane %v7326_v0, 7  ;;  %v3013_v15 = vrot.slane %v7329_v2, 7  ;;  %v3069_v22 = vrot.slane %v7329_v2, 1 }
 0x6f5   :  { %v7350_v16 = vsel %vm222_vm1, %v3064_v40, %v3068_v4  ;;  %v7356_v19 = vsel %vm222_vm1, %v3066_v48, %v3070_v11  ;;  %v3016_v23 = vrot.slane %v7334_v5, 7  ;;  %v3015_v30 = vrot.slane %v7332_v3, 7 }
 0x6f6   :  { %v3018_v32 = vrot.slane %v7336_v6, 7  ;;  %v7369_v40 = vadd.f32 %v2887_v7, %v7257_v17  ;;  %v7372_v48 = vadd.f32 %v2993_v8, %v7259_v20  ;;  %v3031_v41 = vsel %vm209_vm0, %v3007_v47, %v3011_v10 }
 0x6f7   :  { %v3032_v36 = vsel %vm209_vm0, %v3016_v23, %v3004_v33  ;;  %v3025_v17 = vsel %vm209_vm0, %v3009_v60, %v3013_v15  ;;  %v3071_v33 = vrot.slane %v7332_v3, 1  ;;  %v7398_v60 = vsel %vm209_vm0, %v3008_v45, %v3012_v14 }
 0x6f8   :  { %v5195_v52 = vpack.c.bf16 %v7303_v57, %v3032_v36  ;;  %v3034_v38 = vsel %vm209_vm0, %v3018_v32, %v3006_v31  ;;  %v3017_v59 = vrot.slane %v7369_v40, 7  ;;  %v3019_v1 = vrot.slane %v7372_v48, 7 }
 0x6f9   :  { %v5211_v20 = vpack.c.bf16 %v7316_v61, %v3034_v38  ;;  %v3073_v7 = vrot.slane %v7369_v40, 1  ;;  %v3027_v57 = vsel %vm209_vm0, %v3011_v10, %v3015_v30  ;;  %v7394_v31 = vsel %vm209_vm0, %v3012_v14, %v3016_v23 }
 0x6fa   :  { %v3033_v61 = vsel %vm209_vm0, %v3017_v59, %v3005_v28  ;;  %v3035_v8 = vsel %vm209_vm0, %v3019_v1, %v3007_v47  ;;  %v3021_v36 = vsel %vm209_vm0, %v3013_v15, %v3017_v59  ;;  %v3023_v10 = vsel %vm209_vm0, %v3015_v30, %v3019_v1 }
 0x6fb   :  { %v5191_v23 = vpack.c.bf16 %v3029_v51, %v3033_v61  ;;  %v5207_v38 = vpack.c.bf16 %v3031_v41, %v3035_v8  ;;  %v5199_v45 = vpack.c.bf16 %v3021_v36, %v3025_v17  ;;  %v5215_v14 = vpack.c.bf16 %v3023_v10, %v3027_v57  ;;  %v6259_v51 = vld [vmem:[#allocation6 + $0x148] sm:$0xff]   ;;  %v6274_v61 = vld [vmem:[#allocation6 + $0x1a0] sm:$0xff]   ;;  %v6279_v10 = vld [vmem:[#allocation6 + $0x170] sm:$0xff]  }
 0x6fc   :  { %v5203_v42 = vpack.c.bf16 %v7394_v31, %v7398_v60  ;;  %v3022_v28 = vsel %vm209_vm0, %v3014_v18, %v3018_v32  ;;  %v3026_v47 = vsel %vm209_vm0, %v3010_v43, %v3014_v18  ;;  %v7420_v15 = vpack.c.bf16 %v7278_v39, %v7266_v25  ;;  %v6260_v41 = vld [vmem:[#allocation6 + $0x1c8] sm:$0xff]   ;;  %v6264_v39 = vld [vmem:[#allocation6 + $0x1d0] sm:$0xff]   ;;  %v6273_v60 = vld [vmem:[#allocation6 + $0x120] sm:$0xff]  }
 0x6fd   :  { %v3075_v30 = vrot.slane %v7372_v48, 1  ;;  %5192 = vmatprep.mubr.msk.bf16.mxu0 %vm6615_vm6, %v5191_v23  ;;  %5208 = vmatprep.mubr.msk.bf16.mxu1 %vm6615_vm6, %v5207_v38  ;;  %v5219_v32 = vpack.c.bf16 %v3022_v28, %v3026_v47  ;;  %v7433_v43 = vpack.c.bf16 %v7369_v40, %v7329_v2  ;;  %v3072_v18 = vrot.slane %v7334_v5, 1  ;;  %v6262_v57 = vld [vmem:[#allocation6 + $0x188] sm:$0xff]   ;;  %v6280_v23 = vld [vmem:[#allocation6 + $0x1f0] sm:$0xff]   ;;  %v6284_v28 = vld [vmem:[#allocation6 + $0x1f8] sm:$0xff]  }
 0x6fe   :  { %5196 = vmatmul.mubr.msk.bf16.vlgmr.msra.gmra.mrb[56].mxu0 %vm6615_vm6, %v5195_v52  ;;  %5212 = vmatmul.mubr.msk.bf16.vlgmr.msra.gmra.mrb[32].mxu1 %vm6615_vm6, %v5211_v20  ;;  %v7442_v17 = vpack.c.bf16 %v7372_v48, %v7332_v3  ;;  %v7446_v59 = vpack.c.bf16 %v7334_v5, %v7324_v62  ;;  %v7450_v40 = vpack.c.bf16 %v7336_v6, %v7326_v0  ;;  %v3074_v1 = vrot.slane %v7336_v6, 1  ;;  %v6261_v52 = vld [vmem:[#allocation6 + $0x108] sm:$0xff]   ;;  %v6263_v6 = vld [vmem:[#allocation6 + $0x150] sm:$0xff]   ;;  %v6267_v20 = vld [vmem:[#allocation6 + $0x158] sm:$0xff]  }
 0x6ff   :  { %5606 = vmatpush3.bf16.msra.mxu0 %v6257_v27  ;;  %5634 = vmatpush3.bf16.msra.mxu1 %v6258_v26  ;;  %v7459_v50 = vsel %vm222_vm1, %v3065_v9, %v3069_v22  ;;  %v7467_v3 = vsel %vm222_vm1, %v3061_v44, %v3065_v9  ;;  %v7473_v5 = vsel %vm222_vm1, %v3067_v12, %v3071_v33  ;;  %v7668_v21 = vrot.slane %v7263_v24, 1  ;;  %v6269_v0 = vld [vmem:[#allocation6 + $0x118] sm:$0xff]   ;;  %v6272_v24 = vld [vmem:[#allocation6 + $0x1e0] sm:$0xff]   ;;  %v6277_v8 = vld [vmem:[#allocation6 + $0x128] sm:$0xff]  }
 0x700   :  { %5200 = vmatprep.mubr.msk.bf16.mxu0 %vm6646_vm10, %v5199_v45  ;;  %5216 = vmatprep.mubr.msk.bf16.mxu1 %vm6646_vm10, %v5215_v14  ;;  %v5287_v26 = vpack.c.bf16 %v7459_v50, %v7467_v3  ;;  %v7487_v9 = vsel %vm222_vm1, %v3063_v55, %v3067_v12  ;;  %v7493_v27 = vsel %vm222_vm1, %v3069_v22, %v3073_v7  ;;  %v6278_v36 = vld [vmem:[#allocation6 + $0x1a8] sm:$0xff]   ;;  %v6281_v38 = vld [vmem:[#allocation6 + $0x130] sm:$0xff]   ;;  %v6283_v14 = vld [vmem:[#allocation6 + $0x178] sm:$0xff]  }
 0x701   :  { %5607 = vmatprep.subr.bf16.mxu0 %v6259_v51  ;;  %5635 = vmatprep.subr.bf16.mxu1 %v6260_v41  ;;  %v5303_v48 = vpack.c.bf16 %v7473_v5, %v7487_v9  ;;  %v7501_v49 = vsel %vm222_vm1, %v3073_v7, %v3061_v44  ;;  %v7505_v12 = vsel %vm222_vm1, %v3071_v33, %v3075_v30  ;;  %v6265_v33 = vld [vmem:[#allocation6 + $0x110] sm:$0xff]   ;;  %v6268_v7 = vld [vmem:[#allocation6 + $0x1d8] sm:$0xff]   ;;  %v6287_v51 = vld [vmem:[#allocation7 + $0x40] sm:$0xff]  }
 0x702   :  { %v5295_v2 = vpack.c.bf16 %v7501_v49, %v7493_v27  ;;  %v7513_v22 = vsel %vm222_vm1, %v3075_v30, %v3063_v55  ;;  %v7519_v25 = vsel %vm222_vm1, %v3068_v4, %v3072_v18  ;;  %v7525_v44 = vsel %vm222_vm1, %v3072_v18, %v3060_v35  ;;  %v6282_v45 = vld [vmem:[#allocation6 + $0x1b0] sm:$0xff]   ;;  %v6285_v47 = vld [vmem:[#allocation6 + $0x138] sm:$0xff]   ;;  %v6288_v41 = vld [vmem:[#allocation7 + $0xc0] sm:$0xff]  }
 0x703   :  { %5608 = vmatpush3.bf16.msra.mxu0 %v6261_v52  ;;  %5636 = vmatpush3.bf16.msra.mxu1 %v6262_v57  ;;  %v5311_v55 = vpack.c.bf16 %v7513_v22, %v7505_v12  ;;  %v5299_v62 = vpack.c.bf16 %v7525_v44, %v7519_v25  ;;  %v7535_v4 = vsel %vm222_vm1, %v3070_v11, %v3074_v1  ;;  %v6270_v11 = vld [vmem:[#allocation6 + $0x198] sm:$0xff]   ;;  %v6290_v18 = vld [vmem:[#allocation7 + $0x80] sm:$0xff]   ;;  %v6292_v52 = vld [vmem:[#allocation7 + $0xc8] sm:$0xff]  }
 0x704   :  { %5609 = vmatprep.subr.bf16.mxu0 %v6263_v6  ;;  %5637 = vmatprep.subr.bf16.mxu1 %v6264_v39  ;;  %v7541_v35 = vsel %vm222_vm1, %v3074_v1, %v7668_v21  ;;  %v6286_v30 = vld [vmem:[#allocation6 + $0x1b8] sm:$0xff]   ;;  %v6291_v1 = vld [vmem:[#allocation7 + $0x48] sm:$0xff]   ;;  %v6295_v39 = vld [vmem:[#allocation7 + $0x50] sm:$0xff]  }
 0x705   :  { %v5315_v31 = vpack.c.bf16 %v7541_v35, %v7535_v4  ;;  %v6293_v57 = vld [vmem:[#allocation7 + $0x8] sm:$0xff]   ;;  %v6298_v21 = vld [vmem:[#allocation7 + $0x90] sm:$0xff]   ;;  %v6337_v50 = vld [vmem:[#allocation7 + $0x120] sm:$0xff]  }
 0x706   :  { %5204 = vmatmul.mubr.msk.bf16.gmra.mrb[60].mxu0 %vm6646_vm10, %v5203_v42  ;;  %5220 = vmatmul.mubr.msk.bf16.gmra.mrb[36].mxu1 %vm6646_vm10, %v5219_v32  ;;  %v6276_v42 = vld [vmem:[#allocation6 + $0x1e8] sm:$0xff]   ;;  %v6289_v32 = vld [vmem:[#allocation7] sm:$0xff]  }
 0x707   :  { %5610 = vmatpush3.bf16.msra.mxu0 %v6265_v33  ;;  %5638 = vmatpush3.bf16.msra.mxu1 %v6266_v34  ;;  %v6294_v6 = vld [vmem:[#allocation7 + $0x88] sm:$0xff]   ;;  %v6296_v33 = vld [vmem:[#allocation7 + $0xd0] sm:$0xff]   ;;  %v6338_v3 = vld [vmem:[#allocation7 + $0x1a0] sm:$0xff]  }
 0x708   :  { %3765 = vmatprep.mubr.bf16.mxu0 %v7420_v15  ;;  %3814 = vmatprep.mubr.bf16.mxu1 %v7429_v37  ;;  %v6297_v34 = vld [vmem:[#allocation7 + $0x10] sm:$0xff]   ;;  %v6341_v5 = vld [vmem:[#allocation7 + $0x128] sm:$0xff]  }
 0x709   :  { %5611 = vmatprep.subr.bf16.mxu0 %v6267_v20  ;;  %5639 = vmatprep.subr.bf16.mxu1 %v6268_v7  ;;  %v6299_v20 = vld [vmem:[#allocation7 + $0x58] sm:$0xff]   ;;  %v6342_v9 = vld [vmem:[#allocation7 + $0x1a8] sm:$0xff]  }
 0x70a   :  { %v6300_v7 = vld [vmem:[#allocation7 + $0xd8] sm:$0xff]  }
 0x70b   :  { %5612 = vmatpush3.bf16.msra.mxu0 %v6269_v0  ;;  %5640 = vmatpush3.bf16.msra.mxu1 %v6270_v11  ;;  %v6301_v0 = vld [vmem:[#allocation7 + $0x18] sm:$0xff]  }
 0x70c   :  { %5613 = vmatprep.subr.bf16.mxu0 %v6271_v13  ;;  %5641 = vmatprep.subr.bf16.mxu1 %v6272_v24  ;;  %v6302_v11 = vld [vmem:[#allocation7 + $0x98] sm:$0xff]   ;;  %v6303_v13 = vld [vmem:[#allocation7 + $0x60] sm:$0xff]  }
 0x70d   :  { %v6304_v24 = vld [vmem:[#allocation7 + $0xe0] sm:$0xff]  }
 0x70f   :  { %5614 = vmatpush3.bf16.msra.mxu0 %v6273_v60  ;;  %5642 = vmatpush3.bf16.msra.mxu1 %v6274_v61  ;;  %v6305_v60 = vld [vmem:[#allocation7 + $0x20] sm:$0xff]  }
 0x710   :  { %5615 = vmatprep.subr.bf16.mxu0 %v6275_v63  ;;  %5643 = vmatprep.subr.bf16.mxu1 %v6276_v42  ;;  %v6306_v61 = vld [vmem:[#allocation7 + $0xa0] sm:$0xff]   ;;  %v6307_v63 = vld [vmem:[#allocation7 + $0x68] sm:$0xff]  }
 0x711   :  { %v6308_v42 = vld [vmem:[#allocation7 + $0xe8] sm:$0xff]  }
 0x713   :  { %5616 = vmatpush3.bf16.msra.mxu0 %v6277_v8  ;;  %5644 = vmatpush3.bf16.msra.mxu1 %v6278_v36  ;;  %v6311_v8 = vld [vmem:[#allocation7 + $0x70] sm:$0xff]  }
 0x714   :  { %5617 = vmatprep.subr.bf16.mxu0 %v6279_v10  ;;  %5645 = vmatprep.subr.bf16.mxu1 %v6280_v23  ;;  %v6312_v36 = vld [vmem:[#allocation7 + $0xf0] sm:$0xff]  }
 0x715   :  { %v6313_v10 = vld [vmem:[#allocation7 + $0x30] sm:$0xff]  }
 0x716   :  { %v6314_v23 = vld [vmem:[#allocation7 + $0xb0] sm:$0xff]  }
 0x717   :  { %5618 = vmatpush3.bf16.msra.mxu0 %v6281_v38  ;;  %5646 = vmatpush3.bf16.msra.mxu1 %v6282_v45  ;;  %v6315_v38 = vld [vmem:[#allocation7 + $0x78] sm:$0xff]  }
 0x718   :  { %5619 = vmatprep.subr.bf16.mxu0 %v6283_v14  ;;  %5647 = vmatprep.subr.bf16.mxu1 %v6284_v28  ;;  %v6316_v45 = vld [vmem:[#allocation7 + $0xf8] sm:$0xff]  }
 0x719   :  { %v6317_v14 = vld [vmem:[#allocation7 + $0x38] sm:$0xff]  }
 0x71a   :  { %v6318_v28 = vld [vmem:[#allocation7 + $0xb8] sm:$0xff]  }
 0x71b   :  { %5620 = vmatpush3.bf16.msra.mxu0 %v6285_v47  ;;  %5648 = vmatpush3.bf16.msra.mxu1 %v6286_v30  ;;  %v6319_v47 = vld [vmem:[#allocation7 + $0x140] sm:$0xff]  }
 0x71c   :  { %5661 = vmatprep.subr.bf16.mxu0 %v6287_v51  ;;  %5689 = vmatprep.subr.bf16.mxu1 %v6288_v41  ;;  %v6320_v30 = vld [vmem:[#allocation7 + $0x1c0] sm:$0xff]  }
 0x71d   :  { %v6321_v51 = vld [vmem:[#allocation7 + $0x100] sm:$0xff]  }
 0x71e   :  { %3766 = vmatmul.mubr.bf16.vlgmr.msra.gmra.mrb[64].mxu0 %v7286_v29  ;;  %3815 = vmatmul.mubr.bf16.vlgmr.msra.gmra.mrb[40].mxu1 %v7292_v46  ;;  %v6322_v41 = vld [vmem:[#allocation7 + $0x180] sm:$0xff]  }
 0x71f   :  { %3773 = vmatprep.mubr.bf16.mxu0 %v7433_v43  ;;  %3822 = vmatprep.mubr.bf16.mxu1 %v7442_v17 }
 0x720   :  { %5662 = vmatpush3.bf16.msra.mxu0 %v6289_v32  ;;  %5690 = vmatpush3.bf16.msra.mxu1 %v6290_v18  ;;  %v6323_v32 = vld [vmem:[#allocation7 + $0x148] sm:$0xff]  }
 0x721   :  { %5663 = vmatprep.subr.bf16.mxu0 %v6291_v1  ;;  %5691 = vmatprep.subr.bf16.mxu1 %v6292_v52  ;;  %v6324_v18 = vld [vmem:[#allocation7 + $0x1c8] sm:$0xff]  }
 0x722   :  { %v6325_v1 = vld [vmem:[#allocation7 + $0x108] sm:$0xff]  }
 0x723   :  { %v6326_v52 = vld [vmem:[#allocation7 + $0x188] sm:$0xff]  }
 0x724   :  { %5664 = vmatpush3.bf16.msra.mxu0 %v6293_v57  ;;  %5692 = vmatpush3.bf16.msra.mxu1 %v6294_v6  ;;  %v6327_v57 = vld [vmem:[#allocation7 + $0x150] sm:$0xff]  }
 0x725   :  { %5665 = vmatprep.subr.bf16.mxu0 %v6295_v39  ;;  %5693 = vmatprep.subr.bf16.mxu1 %v6296_v33  ;;  %v6328_v6 = vld [vmem:[#allocation7 + $0x1d0] sm:$0xff]  }
 0x726   :  { %3774 = vmatmul.mubr.bf16.gmra.mrb[68].mxu0 %v7446_v59  ;;  %3823 = vmatmul.mubr.bf16.gmra.mrb[44].mxu1 %v7450_v40  ;;  %v6329_v39 = vld [vmem:[#allocation7 + $0x110] sm:$0xff]  }
 0x727   :  { %4375 = vmatprep.mubr.bf16.mxu0 %v7420_v15  ;;  %4424 = vmatprep.mubr.bf16.mxu1 %v7429_v37  ;;  %v6309_v15 = vld [vmem:[#allocation7 + $0x28] sm:$0xff]   ;;  %v6330_v33 = vld [vmem:[#allocation7 + $0x190] sm:$0xff]  }
 0x728   :  { %5666 = vmatpush3.bf16.msra.mxu0 %v6297_v34  ;;  %5694 = vmatpush3.bf16.msra.mxu1 %v6298_v21  ;;  %v6310_v37 = vld [vmem:[#allocation7 + $0xa8] sm:$0xff]   ;;  %v6344_v21 = vld [vmem:[#allocation7 + $0x1f0] sm:$0xff]  }
 0x729   :  { %5667 = vmatprep.subr.bf16.mxu0 %v6299_v20  ;;  %5695 = vmatprep.subr.bf16.mxu1 %v6300_v7  ;;  %v6340_v34 = vld [vmem:[#allocation7 + $0x1e8] sm:$0xff]   ;;  %v6345_v20 = vld [vmem:[#allocation7 + $0x130] sm:$0xff]  }
 0x72a   :  { %v6346_v7 = vld [vmem:[#allocation7 + $0x1b0] sm:$0xff]  }
 0x72c   :  { %5668 = vmatpush3.bf16.msra.mxu0 %v6301_v0  ;;  %5696 = vmatpush3.bf16.msra.mxu1 %v6302_v11  ;;  %v6347_v0 = vld [vmem:[#allocation7 + $0x178] sm:$0xff]  }
 0x72d   :  { %5669 = vmatprep.subr.bf16.mxu0 %v6303_v13  ;;  %5697 = vmatprep.subr.bf16.mxu1 %v6304_v24  ;;  %v6348_v11 = vld [vmem:[#allocation7 + $0x1f8] sm:$0xff]  }
 0x72e   :  { %v6349_v13 = vld [vmem:[#allocation7 + $0x138] sm:$0xff]  }
 0x72f   :  { %v6350_v24 = vld [vmem:[#allocation7 + $0x1b8] sm:$0xff]  }
 0x730   :  { %5670 = vmatpush3.bf16.msra.mxu0 %v6305_v60  ;;  %5698 = vmatpush3.bf16.msra.mxu1 %v6306_v61  ;;  %v7669_v60 = vpack.c.bf16 %v7350_v16, %v7309_v58  ;;  %v7670_v61 = vpack.c.bf16 %v7356_v19, %v7322_v54  ;;  %v7608_v54 = vld [vmem:[%s7651_s9] ss:$0 sm:$0xff] }
 0x731   :  { %5671 = vmatprep.subr.bf16.mxu0 %v6307_v63  ;;  %5699 = vmatprep.subr.bf16.mxu1 %v6308_v42 }
 0x734   :  { %5672 = vmatpush3.bf16.msra.mxu0 %v6309_v15  ;;  %5700 = vmatpush3.bf16.msra.mxu1 %v6310_v37 }
 0x735   :  { %5673 = vmatprep.subr.bf16.mxu0 %v6311_v8  ;;  %5701 = vmatprep.subr.bf16.mxu1 %v6312_v36 }
 0x738   :  { %5674 = vmatpush3.bf16.msra.mxu0 %v6313_v10  ;;  %5702 = vmatpush3.bf16.msra.mxu1 %v6314_v23 }
 0x739   :  { %5675 = vmatprep.subr.bf16.mxu0 %v6315_v38  ;;  %5703 = vmatprep.subr.bf16.mxu1 %v6316_v45 }
 0x73c   :  { %5676 = vmatpush3.bf16.msra.mxu0 %v6317_v14  ;;  %5704 = vmatpush3.bf16.msra.mxu1 %v6318_v28 }
 0x73d   :  { %5717 = vmatprep.subr.bf16.mxu0 %v6319_v47  ;;  %5745 = vmatprep.subr.bf16.mxu1 %v6320_v30 }
 0x73f   :  { %4376 = vmatmul.mubr.bf16.vlgmr.msra.gmra.mrb[72].mxu0 %v7286_v29  ;;  %4425 = vmatmul.mubr.bf16.vlgmr.msra.gmra.mrb[48].mxu1 %v7292_v46  ;;  %v6331_v29 = vld [vmem:[#allocation7 + $0x158] sm:$0xff]  }
 0x740   :  { %4383 = vmatprep.mubr.bf16.mxu0 %v7433_v43  ;;  %4432 = vmatprep.mubr.bf16.mxu1 %v7442_v17  ;;  %v6332_v46 = vld [vmem:[#allocation7 + $0x1d8] sm:$0xff]  }
 0x741   :  { %5718 = vmatpush3.bf16.msra.mxu0 %v6321_v51  ;;  %5746 = vmatpush3.bf16.msra.mxu1 %v6322_v41  ;;  %v6333_v43 = vld [vmem:[#allocation7 + $0x118] sm:$0xff]  }
 0x742   :  { %5719 = vmatprep.subr.bf16.mxu0 %v6323_v32  ;;  %5747 = vmatprep.subr.bf16.mxu1 %v6324_v18  ;;  %v6334_v17 = vld [vmem:[#allocation7 + $0x198] sm:$0xff]  }
 0x745   :  { %5720 = vmatpush3.bf16.msra.mxu0 %v6325_v1  ;;  %5748 = vmatpush3.bf16.msra.mxu1 %v6326_v52 }
 0x746   :  { %5721 = vmatprep.subr.bf16.mxu0 %v6327_v57  ;;  %5749 = vmatprep.subr.bf16.mxu1 %v6328_v6 }
 0x747   :  { %4384 = vmatmul.mubr.bf16.gmra.mrb[76].mxu0 %v7446_v59  ;;  %4433 = vmatmul.mubr.bf16.gmra.mrb[52].mxu1 %v7450_v40  ;;  %v6335_v59 = vld [vmem:[#allocation7 + $0x160] sm:$0xff]  }
 0x748   :  { %5288 = vmatprep.mubr.msk.bf16.mxu0 %vm6624_vm7, %v5287_v26  ;;  %5304 = vmatprep.mubr.msk.bf16.mxu1 %vm6624_vm7, %v5303_v48  ;;  %v6336_v40 = vld [vmem:[#allocation7 + $0x1e0] sm:$0xff]   ;;  %v6339_v26 = vld [vmem:[#allocation7 + $0x168] sm:$0xff]   ;;  %v6343_v48 = vld [vmem:[#allocation7 + $0x170] sm:$0xff]  }
 0x749   :  { %5722 = vmatpush3.bf16.msra.mxu0 %v6329_v39  ;;  %5750 = vmatpush3.bf16.msra.mxu1 %v6330_v33 }
 0x74a   :  { %5723 = vmatprep.subr.bf16.mxu0 %v6331_v29  ;;  %5751 = vmatprep.subr.bf16.mxu1 %v6332_v46 }
 0x74d   :  { %5724 = vmatpush3.bf16.msra.mxu0 %v6333_v43  ;;  %5752 = vmatpush3.bf16.msra.mxu1 %v6334_v17 }
 0x74e   :  { %5725 = vmatprep.subr.bf16.mxu0 %v6335_v59  ;;  %5753 = vmatprep.subr.bf16.mxu1 %v6336_v40 }
 0x751   :  { %5726 = vmatpush3.bf16.msra.mxu0 %v6337_v50  ;;  %5754 = vmatpush3.bf16.msra.mxu1 %v6338_v3 }
 0x752   :  { %5727 = vmatprep.subr.bf16.mxu0 %v6339_v26  ;;  %5755 = vmatprep.subr.bf16.mxu1 %v6340_v34 }
 0x755   :  { %5728 = vmatpush3.bf16.msra.mxu0 %v6341_v5  ;;  %5756 = vmatpush3.bf16.msra.mxu1 %v6342_v9 }
 0x756   :  { %5729 = vmatprep.subr.bf16.mxu0 %v6343_v48  ;;  %5757 = vmatprep.subr.bf16.mxu1 %v6344_v21 }
 0x759   :  { %5730 = vmatpush3.bf16.msra.mxu0 %v6345_v20  ;;  %5758 = vmatpush3.bf16.msra.mxu1 %v6346_v7 }
 0x75a   :  { %5731 = vmatprep.subr.bf16.mxu0 %v6347_v0  ;;  %5759 = vmatprep.subr.bf16.mxu1 %v6348_v11 }
 0x75d   :  { %5732 = vmatpush3.bf16.msra.mxu0 %v6349_v13  ;;  %5760 = vmatpush3.bf16.msra.mxu1 %v6350_v24 }
 0x760   :  { %5292 = vmatmul.mubr.msk.bf16.vlgmr.msra.gmra.mrb[80].mxu0 %vm6624_vm7, %v7669_v60  ;;  %5308 = vmatmul.mubr.msk.bf16.vlgmr.msra.gmra.mrb[56].mxu1 %vm6624_vm7, %v7670_v61 }
 0x761   :  { %5296 = vmatprep.mubr.msk.bf16.mxu0 %vm6634_vm9, %v5295_v2  ;;  %5312 = vmatprep.mubr.msk.bf16.mxu1 %vm6634_vm9, %v5311_v55 }
 0x768   :  { %5300 = vmatmul.mubr.msk.bf16.gmra.mrb[84].mxu0 %vm6634_vm9, %v5299_v62  ;;  %5316 = vmatmul.mubr.msk.bf16.gmra.mrb[60].mxu1 %vm6634_vm9, %v5315_v31 }
 0x7d1   :  { %v5565_v53 = vpop.f32.mrb[56].mxu0  ;;  %v5593_v58 = vpop.f32.mrb[32].mxu1 }
 0x7d2   :  { %v5566_v16 = vpop.f32.mrb[57].mxu0  ;;  %v5594_v19 = vpop.f32.mrb[33].mxu1 }
 0x7d3   :  { %v5567_v27 = vadd.f32 %v5566_v16, %v5565_v53  ;;  %v5595_v49 = vadd.f32 %v5594_v19, %v5593_v58  ;;  %v5568_v12 = vpop.f32.mrb[58].mxu0  ;;  %v5596_v2 = vpop.f32.mrb[34].mxu1 }
 0x7d4   :  { %v5569_v22 = vpop.f32.mrb[59].mxu0  ;;  %v5597_v25 = vpop.f32.mrb[35].mxu1 }
 0x7d5   :  { %v3670_v44 = vadd.f32 %v5567_v27, %v7608_v54  ;;  %v5570_v55 = vadd.f32 %v5569_v22, %v5568_v12  ;;  %v5598_v56 = vadd.f32 %v5597_v25, %v5596_v2 }
 0x7d7   :  { %v3719_v62 = vadd.f32 %v5595_v49, %v3670_v44  ;;  %v3673_v4 = vadd.f32 %v5570_v55, %v7608_v54 }
 0x7d9   :  { %v3722_v35 = vadd.f32 %v5598_v56, %v3673_v4  ;;  %v5571_v31 = vpop.f32.mrb[60].mxu0  ;;  %v5599_v63 = vpop.f32.mrb[36].mxu1 }
 0x7da   :  { %v5572_v42 = vpop.f32.mrb[61].mxu0  ;;  %v5600_v15 = vpop.f32.mrb[37].mxu1 }
 0x7db   :  { %v5573_v37 = vadd.f32 %v5572_v42, %v5571_v31  ;;  %v5601_v8 = vadd.f32 %v5600_v15, %v5599_v63  ;;  %v5574_v36 = vpop.f32.mrb[62].mxu0  ;;  %v5602_v10 = vpop.f32.mrb[38].mxu1 }
 0x7dc   :  { %v5575_v23 = vpop.f32.mrb[63].mxu0  ;;  %v5603_v38 = vpop.f32.mrb[39].mxu1 }
 0x7dd   :  { %v3678_v45 = vadd.f32 %v5573_v37, %v7608_v54  ;;  %v5576_v14 = vadd.f32 %v5575_v23, %v5574_v36  ;;  %v5604_v28 = vadd.f32 %v5603_v38, %v5602_v10 }
 0x7df   :  { %v3727_v47 = vadd.f32 %v5601_v8, %v3678_v45  ;;  %v3681_v30 = vadd.f32 %v5576_v14, %v7608_v54 }
 0x7e1   :  { %v3730_v51 = vadd.f32 %v5604_v28, %v3681_v30 }
 0x7f1   :  { %v5621_v41 = vpop.f32.mrb[64].mxu0  ;;  %v5649_v32 = vpop.f32.mrb[40].mxu1 }
 0x7f2   :  { %v5622_v18 = vpop.f32.mrb[65].mxu0  ;;  %v5650_v1 = vpop.f32.mrb[41].mxu1 }
 0x7f3   :  { %v5623_v52 = vadd.f32 %v5622_v18, %v5621_v41  ;;  %v5651_v57 = vadd.f32 %v5650_v1, %v5649_v32  ;;  %v5624_v6 = vpop.f32.mrb[66].mxu0  ;;  %v5652_v39 = vpop.f32.mrb[42].mxu1 }
 0x7f4   :  { %v5625_v33 = vpop.f32.mrb[67].mxu0  ;;  %v5653_v29 = vpop.f32.mrb[43].mxu1 }
 0x7f5   :  { %v3768_v46 = vadd.f32 %v5623_v52, %v3719_v62  ;;  %v5626_v43 = vadd.f32 %v5625_v33, %v5624_v6  ;;  %v5654_v17 = vadd.f32 %v5653_v29, %v5652_v39 }
 0x7f7   :  { %v3817_v59 = vadd.f32 %v5651_v57, %v3768_v46  ;;  %v3771_v40 = vadd.f32 %v5626_v43, %v3722_v35 }
 0x7f9   :  { %4539 = vst [vmem:[%s7652_s10] sm:$0xff] %v3817_v59  ;;  %v3820_v50 = vadd.f32 %v5654_v17, %v3771_v40  ;;  %v5627_v3 = vpop.f32.mrb[68].mxu0  ;;  %v5655_v26 = vpop.f32.mrb[44].mxu1 }
 0x7fa   :  { %v5628_v34 = vpop.f32.mrb[69].mxu0  ;;  %v5656_v5 = vpop.f32.mrb[45].mxu1 }
 0x7fb   :  { %4541 = vst [vmem:[%s7652_s10 + $0x10] sm:$0xff] %v3820_v50  ;;  %v5629_v9 = vadd.f32 %v5628_v34, %v5627_v3  ;;  %v5657_v48 = vadd.f32 %v5656_v5, %v5655_v26  ;;  %v5630_v21 = vpop.f32.mrb[70].mxu0  ;;  %v5658_v20 = vpop.f32.mrb[46].mxu1 }
 0x7fc   :  { %v5631_v7 = vpop.f32.mrb[71].mxu0  ;;  %v5659_v0 = vpop.f32.mrb[47].mxu1 }
 0x7fd   :  { %v3776_v11 = vadd.f32 %v5629_v9, %v3727_v47  ;;  %v5632_v13 = vadd.f32 %v5631_v7, %v5630_v21  ;;  %v5660_v24 = vadd.f32 %v5659_v0, %v5658_v20 }
 0x7ff   :  { %v3825_v60 = vadd.f32 %v5657_v48, %v3776_v11  ;;  %v3779_v61 = vadd.f32 %v5632_v13, %v3730_v51 }
 0x801   :  { %4543 = vst [vmem:[%s7652_s10 + $0x20] sm:$0xff] %v3825_v60  ;;  %v3828_v53 = vadd.f32 %v5660_v24, %v3779_v61 }
 0x803   :  { %4545 = vst [vmem:[%s7652_s10 + $0x30] sm:$0xff] %v3828_v53 }
 0x812   :  { %v5677_v58 = vpop.f32.mrb[72].mxu0  ;;  %v5705_v16 = vpop.f32.mrb[48].mxu1 }
 0x813   :  { %v5678_v19 = vpop.f32.mrb[73].mxu0  ;;  %v5706_v27 = vpop.f32.mrb[49].mxu1 }
 0x814   :  { %v5679_v49 = vadd.f32 %v5678_v19, %v5677_v58  ;;  %v5707_v12 = vadd.f32 %v5706_v27, %v5705_v16  ;;  %v5680_v2 = vpop.f32.mrb[74].mxu0  ;;  %v5708_v22 = vpop.f32.mrb[50].mxu1 }
 0x815   :  { %v5681_v25 = vpop.f32.mrb[75].mxu0  ;;  %v5709_v44 = vpop.f32.mrb[51].mxu1 }
 0x816   :  { %v4378_v55 = vadd.f32 %v5679_v49, %v7608_v54  ;;  %v5682_v56 = vadd.f32 %v5681_v25, %v5680_v2  ;;  %v5710_v62 = vadd.f32 %v5709_v44, %v5708_v22 }
 0x818   :  { %v4427_v4 = vadd.f32 %v5707_v12, %v4378_v55  ;;  %v4381_v35 = vadd.f32 %v5682_v56, %v7608_v54 }
 0x81a   :  { %v4430_v31 = vadd.f32 %v5710_v62, %v4381_v35  ;;  %v5683_v63 = vpop.f32.mrb[76].mxu0  ;;  %v5711_v42 = vpop.f32.mrb[52].mxu1 }
 0x81b   :  { %v5684_v15 = vpop.f32.mrb[77].mxu0  ;;  %v5712_v37 = vpop.f32.mrb[53].mxu1 }
 0x81c   :  { %v5685_v8 = vadd.f32 %v5684_v15, %v5683_v63  ;;  %v5713_v36 = vadd.f32 %v5712_v37, %v5711_v42  ;;  %v5686_v10 = vpop.f32.mrb[78].mxu0  ;;  %v5714_v23 = vpop.f32.mrb[54].mxu1 }
 0x81d   :  { %v5687_v38 = vpop.f32.mrb[79].mxu0  ;;  %v5715_v45 = vpop.f32.mrb[55].mxu1 }
 0x81e   :  { %v4386_v14 = vadd.f32 %v5685_v8, %v7608_v54  ;;  %v5688_v28 = vadd.f32 %v5687_v38, %v5686_v10  ;;  %v5716_v47 = vadd.f32 %v5715_v45, %v5714_v23 }
 0x820   :  { %v4435_v30 = vadd.f32 %v5713_v36, %v4386_v14  ;;  %v4389_v51 = vadd.f32 %v5688_v28, %v7608_v54 }
 0x822   :  { %v4438_v41 = vadd.f32 %v5716_v47, %v4389_v51 }
 0x833   :  { %v5733_v32 = vpop.f32.mrb[80].mxu0  ;;  %v5761_v18 = vpop.f32.mrb[56].mxu1 }
 0x834   :  { %v5734_v1 = vpop.f32.mrb[81].mxu0  ;;  %v5762_v52 = vpop.f32.mrb[57].mxu1 }
 0x835   :  { %v5735_v57 = vadd.f32 %v5734_v1, %v5733_v32  ;;  %v5763_v6 = vadd.f32 %v5762_v52, %v5761_v18  ;;  %v5736_v39 = vpop.f32.mrb[82].mxu0  ;;  %v5764_v33 = vpop.f32.mrb[58].mxu1 }
 0x836   :  { %v5737_v29 = vpop.f32.mrb[83].mxu0  ;;  %v5765_v46 = vpop.f32.mrb[59].mxu1 }
 0x837   :  { %v4476_v43 = vadd.f32 %v5735_v57, %v4427_v4  ;;  %v5738_v17 = vadd.f32 %v5737_v29, %v5736_v39  ;;  %v5766_v59 = vadd.f32 %v5765_v46, %v5764_v33 }
 0x839   :  { %v4525_v40 = vadd.f32 %v5763_v6, %v4476_v43  ;;  %v4479_v50 = vadd.f32 %v5738_v17, %v4430_v31 }
 0x83b   :  { %4540 = vst [vmem:[%s7652_s10 + $0x8] sm:$0xff] %v4525_v40  ;;  %v4528_v54 = vadd.f32 %v5766_v59, %v4479_v50  ;;  %v5739_v3 = vpop.f32.mrb[84].mxu0  ;;  %v5767_v26 = vpop.f32.mrb[60].mxu1 }
 0x83c   :  { %v5740_v34 = vpop.f32.mrb[85].mxu0  ;;  %v5768_v5 = vpop.f32.mrb[61].mxu1 }
 0x83d   :  { %4542 = vst [vmem:[%s7652_s10 + $0x18] sm:$0xff] %v4528_v54  ;;  %v5741_v9 = vadd.f32 %v5740_v34, %v5739_v3  ;;  %v5769_v48 = vadd.f32 %v5768_v5, %v5767_v26  ;;  %v5742_v21 = vpop.f32.mrb[86].mxu0  ;;  %v5770_v20 = vpop.f32.mrb[62].mxu1 }
 0x83e   :  { %v5743_v7 = vpop.f32.mrb[87].mxu0  ;;  %v5771_v0 = vpop.f32.mrb[63].mxu1 }
 0x83f   :  { %v4484_v11 = vadd.f32 %v5741_v9, %v4435_v30  ;;  %v5744_v13 = vadd.f32 %v5743_v7, %v5742_v21  ;;  %v5772_v24 = vadd.f32 %v5771_v0, %v5770_v20 }
 0x841   :  { %v4533_v60 = vadd.f32 %v5769_v48, %v4484_v11  ;;  %v4487_v61 = vadd.f32 %v5744_v13, %v4438_v41 }
 0x843   :  { %4544 = vst [vmem:[%s7652_s10 + $0x28] sm:$0xff] %v4533_v60  ;;  %v4536_v53 = vadd.f32 %v5772_v24, %v4487_v61 }
 0x845   :  { %4546 = vst [vmem:[%s7652_s10 + $0x38] sm:$0xff] %v4536_v53 }
 0x846   :  { %4551 = vsyncpa [#allocation3], 1 }
 0x847   :  { %4552 = vsyncpa [#allocation5], 1 }
 0x848   :  { %4553 = vsyncpa [#allocation8], 1 }

</bundles_post_ra>
